<compile_context>
chip_gen: v7x
topology: tpu7x:2x2x1
jax: 0.10.0
libtpu: 0.0.40
codegen_flags: <defaults>
</compile_context>

<pallas_src>
import jax
import jax.numpy as jnp
from jax.experimental import pallas as pl
from jax.experimental.pallas import tpu as pltpu

D = 64          # output_dim / feature_dim
H = 4           # num_heads
HD = D // H     # head_dim
SCALE = float(HD) ** 0.5
LN_EPS = 1e-5
AW_LANES = 128  # lane-dense slab width for the 3-way modality attention weights
NEG_BIG = -1e30

# ---------------------------------------------------------------------------
# static layout of the packed (N, 64) vector-parameter operand
# ---------------------------------------------------------------------------
_MODS = ("mri", "snp", "clin")
_PAIRS = ("ms", "mc", "sc")
_GATE_VECS = ("b1", "g1", "t1", "b2", "g2", "t2", "br")
_PAIR_VECS = ("bv", "bo", "bf", "gf", "tf")
_FUSION_VECS = ("ba1", "ga", "ta", "bg1", "gg", "tg",
                "bf1", "gf1", "tf1", "bf2", "gf2", "tf2", "gn", "tn")

VEC_NAMES = ([f"{m}_{v}" for m in _MODS for v in _GATE_VECS]
             + [f"{p}_{v}" for p in _PAIRS for v in _PAIR_VECS]
             + list(_FUSION_VECS))
VEC_IDX = {n: i for i, n in enumerate(VEC_NAMES)}
N_VECS = len(VEC_NAMES)


# ---------------------------------------------------------------------------
# shared math helper (pure jnp: usable inside Pallas kernels and in the ref)
# ---------------------------------------------------------------------------
def _layernorm(x, gamma, beta):
    mu = jnp.mean(x, axis=-1, keepdims=True)
    var = jnp.mean((x - mu) ** 2, axis=-1, keepdims=True)
    return (x - mu) * jax.lax.rsqrt(var + LN_EPS) * gamma + beta


# ---------------------------------------------------------------------------
# the single fused kernel
# ---------------------------------------------------------------------------
def hier_attn_kernel(x_mri_ref, x_snp_ref, x_clin_ref,
                     gw_mri_ref, gw1_snp_ref, gw_clin_ref, gw2_ref,
                     pw_vo_ref, pw_f_ref,
                     fu_ag_ref, fu_a2_ref, ba2_ref, fu_f1_ref, fu_f2_ref,
                     vecs_ref,
                     final_ref, aw_ref):
    f32 = jnp.float32
    vecs = vecs_ref[...]                                   # (N_VECS, 64), loaded once

    def V(name):                                           # (1, 64) row, static index
        r = VEC_IDX[name]
        return vecs[r:r + 1, :]

    def dot(a, b):
        return jnp.dot(a, b, preferred_element_type=f32)

    # ---------------- NonlinearGating (3 modalities) ----------------------
    def gate_modality(x, wcomb, w2, pre, identity_res):
        if identity_res:                                   # snp: nn.Identity residual
            h = dot(x, wcomb) + V(pre + "_b1")             # (B, 64)
            res = x
        else:                                              # wcomb = [w1 | w_res] (din, 128)
            y = dot(x, wcomb)
            h = y[:, :D] + V(pre + "_b1")
            res = y[:, D:] + V(pre + "_br")
        h = jnp.maximum(_layernorm(h, V(pre + "_g1"), V(pre + "_t1")), 0.0)  # ReLU; Dropout(0.2) id (eval)
        h = dot(h, w2) + V(pre + "_b2")
        h = _layernorm(h, V(pre + "_g2"), V(pre + "_t2"))
        return h + res

    x_mri = x_mri_ref[...]
    x_snp = x_snp_ref[...]
    x_clin = x_clin_ref[...]

    mri = gate_modality(x_mri, gw_mri_ref[...], gw2_ref[0 * D:1 * D, :], "mri", False)
    snp = gate_modality(x_snp, gw1_snp_ref[...], gw2_ref[1 * D:2 * D, :], "snp", True)
    clin = gate_modality(x_clin, gw_clin_ref[...], gw2_ref[2 * D:3 * D, :], "clin", False)

    # ------------- PairwiseAttention (seq len 1 => softmax == 1) ----------
    # attended == o_proj(v_proj(x2)); fusion concat done via split-weight accumulation.
    def pairwise(pidx, pre, x1, x2):
        wv = pw_vo_ref[pidx * D:(pidx + 1) * D, :]
        wo = pw_vo_ref[(3 + pidx) * D:(4 + pidx) * D, :]
        v = dot(x2, wv) + V(pre + "_bv")
        att = dot(v, wo) + V(pre + "_bo")
        base = pidx * 3 * D
        f = (dot(att, pw_f_ref[base:base + D, :])
             + dot(x1 * x2, pw_f_ref[base + D:base + 2 * D, :])
             + dot(jnp.abs(x1 - x2), pw_f_ref[base + 2 * D:base + 3 * D, :])
             + V(pre + "_bf"))
        f = jnp.maximum(_layernorm(f, V(pre + "_gf"), V(pre + "_tf")), 0.0)  # ReLU; Dropout(0.1) id
        return f

    f1 = pairwise(0, "ms", mri, snp)
    f2 = pairwise(1, "mc", mri, clin)
    f3 = pairwise(2, "sc", snp, clin)

    # ---------------- ModalityFusion + final LayerNorm --------------------
    wag = fu_ag_ref[...]                                   # (3D, 2D) = [wa1 | wg1]
    y = (dot(f1, wag[0:D, :]) + dot(f2, wag[D:2 * D, :]) + dot(f3, wag[2 * D:3 * D, :]))
    a = jnp.tanh(_layernorm(y[:, :D] + V("ba1"), V("ga"), V("ta")))
    g = jax.nn.sigmoid(_layernorm(y[:, D:] + V("bg1"), V("gg"), V("tg")))

    # 3-way softmax computed lane-dense over 128 lanes: lanes >= 3 are biased to -1e30
    # so they contribute exactly 0 after exp -> identical to a softmax over 3 entries.
    logits = dot(a, fu_a2_ref[...]) + ba2_ref[...]         # (B, 128)
    logits = logits - jnp.max(logits, axis=-1, keepdims=True)
    e = jnp.exp(logits)
    aw = e * pl.reciprocal(jnp.sum(e, axis=-1, keepdims=True))

    attended = f1 * aw[:, 0:1] + f2 * aw[:, 1:2] + f3 * aw[:, 2:3]
    gated = attended * g

    wf1 = fu_f1_ref[...]                                   # (4D, D)
    h = (dot(gated, wf1[0:D, :]) + dot(f1, wf1[D:2 * D, :])
         + dot(f2, wf1[2 * D:3 * D, :]) + dot(f3, wf1[3 * D:4 * D, :]) + V("bf1"))
    h = jnp.maximum(_layernorm(h, V("gf1"), V("tf1")), 0.0)  # ReLU; Dropout(0.1) identity
    h = dot(h, fu_f2_ref[...]) + V("bf2")
    h = _layernorm(h, V("gf2"), V("tf2"))
    fused = h + attended

    final_ref[...] = _layernorm(fused, V("gn"), V("tn"))   # outer .norm
    aw_ref[...] = aw                                       # lane-dense (B, 128) slab


# ---------------------------------------------------------------------------
# host-side parameter packing (pure jnp; done once per forward)
# ---------------------------------------------------------------------------
def pack_operands(params):
    f32 = jnp.float32
    gp = params["gating"]
    pair_keys = ("mri_snp", "mri_clinical", "snp_clinical")
    fu = params["fusion"]

    rowmap = {}
    for pre, p in zip(_MODS, gp):
        for v in _GATE_VECS:
            rowmap[f"{pre}_{v}"] = p[v]
    for pre, k in zip(_PAIRS, pair_keys):
        p = params[k]
        for v in _PAIR_VECS:
            rowmap[f"{pre}_{v}"] = p[v]
    for v in ("ba1", "ga", "ta", "bg1", "gg", "tg",
              "bf1", "gf1", "tf1", "bf2", "gf2", "tf2"):
        rowmap[v] = fu[v]
    rowmap["gn"] = params["norm_g"]
    rowmap["tn"] = params["norm_t"]
    vecs = jnp.concatenate([rowmap[n] for n in VEC_NAMES], axis=0)      # (N_VECS, 64)

    gw_mri = jnp.concatenate([gp[0]["w1"], gp[0]["wr"]], axis=1)        # (32, 128)
    gw1_snp = gp[1]["w1"]                                               # (64, 64) (identity residual)
    gw_clin = jnp.concatenate([gp[2]["w1"], gp[2]["wr"]], axis=1)       # (16, 128)
    gw2 = jnp.concatenate([gp[0]["w2"], gp[1]["w2"], gp[2]["w2"]], axis=0)   # (192, 64)

    pw_vo = jnp.concatenate([params[k]["wv"] for k in pair_keys]
                            + [params[k]["wo"] for k in pair_keys], axis=0)  # (384, 64)
    pw_f = jnp.concatenate([params[k]["wf"] for k in pair_keys], axis=0)     # (576, 64)

    fu_ag = jnp.concatenate([fu["wa1"], fu["wg1"]], axis=1)             # (192, 128)
    fu_a2 = jnp.concatenate(
        [fu["wa2"], jnp.zeros((D, AW_LANES - 3), f32)], axis=1)         # (64, 128)
    ba2 = jnp.concatenate(
        [fu["ba2"], jnp.full((1, AW_LANES - 3), NEG_BIG, f32)], axis=1) # (1, 128)
    fu_f1 = fu["wf1"]                                                   # (256, 64)
    fu_f2 = fu["wf2"]                                                   # (64, 64)

    return (gw_mri, gw1_snp, gw_clin, gw2, pw_vo, pw_f,
            fu_ag, fu_a2, ba2, fu_f1, fu_f2, vecs)


def hierarchical_attention_pallas(params, feats):
    f32 = jnp.float32
    B = feats[0].shape[0]
    args = tuple(feats) + pack_operands(params)

    vmem = pl.BlockSpec(memory_space=pltpu.MemorySpace.VMEM)
    final, aw_slab = pl.pallas_call(
        hier_attn_kernel,
        out_shape=(jax.ShapeDtypeStruct((B, D), f32),
                   jax.ShapeDtypeStruct((B, AW_LANES), f32)),
        in_specs=[vmem] * len(args),
        out_specs=(vmem, vmem),
    )(*args)

    # Per-pair attention weights: softmax over a single key position == 1 exactly.
    ones = jnp.ones((B, 1, 1), f32)
    weights = {"mri_snp": ones, "mri_clinical": ones, "snp_clinical": ones,
               "final": aw_slab[:, :3]}
    return final, weights


# ---------------------------------------------------------------------------
# deterministic parameter init (PyTorch-default-like uniform; LN gamma=1 beta=0)
# ---------------------------------------------------------------------------
def _init_linear(key, din, dout):
    kw, kb = jax.random.split(key)
    bound = 1.0 / (din ** 0.5)
    w = jax.random.uniform(kw, (din, dout), dtype=jnp.float32, minval=-bound, maxval=bound)
    b = jax.random.uniform(kb, (1, dout), dtype=jnp.float32, minval=-bound, maxval=bound)
    return w, b


def _init_ln(dout):
    return jnp.ones((1, dout), jnp.float32), jnp.zeros((1, dout), jnp.float32)


def init_params(key, input_dims):
    keys = iter(jax.random.split(key, 64))

    def lin(din, dout):
        return _init_linear(next(keys), din, dout)

    params = {"gating": []}
    for din in input_dims:
        w1, b1 = lin(din, D); g1, t1 = _init_ln(D)
        w2, b2 = lin(D, D);   g2, t2 = _init_ln(D)
        if din == D:  # nn.Identity residual projection
            wr, br = jnp.eye(D, dtype=jnp.float32), jnp.zeros((1, D), jnp.float32)
        else:
            wr, br = lin(din, D)
        params["gating"].append(dict(w1=w1, b1=b1, g1=g1, t1=t1,
                                     w2=w2, b2=b2, g2=g2, t2=t2, wr=wr, br=br))

    def pairwise_params():
        wq, bq = lin(D, D); wk, bk = lin(D, D); wv, bv = lin(D, D); wo, bo = lin(D, D)
        wf, bf = lin(3 * D, D); gf, tf = _init_ln(D)
        return dict(wq=wq, bq=bq, wk=wk, bk=bk, wv=wv, bv=bv, wo=wo, bo=bo,
                    wf=wf, bf=bf, gf=gf, tf=tf)

    params["mri_snp"] = pairwise_params()
    params["mri_clinical"] = pairwise_params()
    params["snp_clinical"] = pairwise_params()

    wa1, ba1 = lin(3 * D, D); ga, ta = _init_ln(D); wa2, ba2 = lin(D, 3)
    wg1, bg1 = lin(3 * D, D); gg, tg = _init_ln(D)
    wf1, bf1 = lin(4 * D, D); gf1, tf1 = _init_ln(D)
    wf2, bf2 = lin(D, D);     gf2, tf2 = _init_ln(D)
    params["fusion"] = dict(wa1=wa1, ba1=ba1, ga=ga, ta=ta, wa2=wa2, ba2=ba2,
                            wg1=wg1, bg1=bg1, gg=gg, tg=tg,
                            wf1=wf1, bf1=bf1, gf1=gf1, tf1=tf1,
                            wf2=wf2, bf2=bf2, gf2=gf2, tf2=tf2)
    params["norm_g"], params["norm_t"] = _init_ln(D)
    return params


# ---------------------------------------------------------------------------
# pure-JAX reference (literal transcription of the PyTorch forward, eval mode)
# ---------------------------------------------------------------------------
def _ref_pairwise(p, x1, x2):
    B = x1.shape[0]
    q = (x1 @ p["wq"] + p["bq"]).reshape(B, 1, H, HD).transpose(0, 2, 1, 3)
    k = (x2 @ p["wk"] + p["bk"]).reshape(B, 1, H, HD).transpose(0, 2, 1, 3)
    v = (x2 @ p["wv"] + p["bv"]).reshape(B, 1, H, HD).transpose(0, 2, 1, 3)
    s = jnp.einsum("bhqd,bhkd->bhqk", q, k) / SCALE
    w = jax.nn.softmax(s, axis=-1)
    att = jnp.einsum("bhqk,bhkd->bhqd", w, v).transpose(0, 2, 1, 3).reshape(B, D)
    att = att @ p["wo"] + p["bo"]
    cat = jnp.concatenate([att, x1 * x2, jnp.abs(x1 - x2)], axis=-1)
    f = jnp.maximum(_layernorm(cat @ p["wf"] + p["bf"], p["gf"], p["tf"]), 0.0)
    return f, w.mean(axis=1)


def hierarchical_attention_ref(params, feats):
    gated = []
    for x, p in zip(feats, params["gating"]):
        h = _layernorm(x @ p["w1"] + p["b1"], p["g1"], p["t1"])
        h = jnp.maximum(h, 0.0)
        h = _layernorm(h @ p["w2"] + p["b2"], p["g2"], p["t2"])
        gated.append(h + (x @ p["wr"] + p["br"]))
    mri, snp, clin = gated

    ms_f, ms_w = _ref_pairwise(params["mri_snp"], mri, snp)
    mc_f, mc_w = _ref_pairwise(params["mri_clinical"], mri, clin)
    sc_f, sc_w = _ref_pairwise(params["snp_clinical"], snp, clin)

    p = params["fusion"]
    cat = jnp.concatenate([ms_f, mc_f, sc_f], axis=-1)
    a = jnp.tanh(_layernorm(cat @ p["wa1"] + p["ba1"], p["ga"], p["ta"]))
    aw = jax.nn.softmax(a @ p["wa2"] + p["ba2"], axis=-1)
    g = jax.nn.sigmoid(_layernorm(cat @ p["wg1"] + p["bg1"], p["gg"], p["tg"]))
    stacked = jnp.stack([ms_f, mc_f, sc_f], axis=1)
    attended = jnp.sum(stacked * aw[..., None], axis=1)
    gatedv = attended * g
    cat2 = jnp.concatenate([gatedv, ms_f, mc_f, sc_f], axis=-1)
    h = jnp.maximum(_layernorm(cat2 @ p["wf1"] + p["bf1"], p["gf1"], p["tf1"]), 0.0)
    h = _layernorm(h @ p["wf2"] + p["bf2"], p["gf2"], p["tf2"])
    fused = h + attended
    final = _layernorm(fused, params["norm_g"], params["norm_t"])
    return final, {"mri_snp": ms_w, "mri_clinical": mc_w, "snp_clinical": sc_w, "final": aw}


# ---------------------------------------------------------------------------
if __name__ == "__main__":
    B = 8
    input_dims = [32, 64, 16]   # [mri, snp, clinical]

    key = jax.random.PRNGKey(0)
    k_feat, k_par = jax.random.split(key)
    fkeys = jax.random.split(k_feat, 3)
    feats = [jax.random.normal(fk, (B, d), jnp.float32) for fk, d in zip(fkeys, input_dims)]

    params = init_params(k_par, input_dims)

    final, weights = hierarchical_attention_pallas(params, feats)
    jax.block_until_ready((final, weights))

    ref_final, ref_weights = hierarchical_attention_ref(params, feats)
    assert final.shape == (B, D)
    assert jnp.allclose(final, ref_final, atol=1e-3, rtol=1e-3), "final features mismatch"
    for name in ("mri_snp", "mri_clinical", "snp_clinical", "final"):
        assert weights[name].shape == ref_weights[name].shape, name
        assert jnp.allclose(weights[name], ref_weights[name], atol=1e-3, rtol=1e-3), name

    print("KERNEL_OK")
</pallas_src>

<mosaic_0001>
module attributes {stable_mosaic.version = 11 : i64} {
  func.func @hier_attn_kernel(%arg0: memref<8x32xf32, #tpu.memory_space<vmem>>, %arg1: memref<8x64xf32, #tpu.memory_space<vmem>>, %arg2: memref<8x16xf32, #tpu.memory_space<vmem>>, %arg3: memref<32x128xf32, #tpu.memory_space<vmem>>, %arg4: memref<64x64xf32, #tpu.memory_space<vmem>>, %arg5: memref<16x128xf32, #tpu.memory_space<vmem>>, %arg6: memref<192x64xf32, #tpu.memory_space<vmem>>, %arg7: memref<384x64xf32, #tpu.memory_space<vmem>>, %arg8: memref<576x64xf32, #tpu.memory_space<vmem>>, %arg9: memref<192x128xf32, #tpu.memory_space<vmem>>, %arg10: memref<64x128xf32, #tpu.memory_space<vmem>>, %arg11: memref<1x128xf32, #tpu.memory_space<vmem>>, %arg12: memref<256x64xf32, #tpu.memory_space<vmem>>, %arg13: memref<64x64xf32, #tpu.memory_space<vmem>>, %arg14: memref<50x64xf32, #tpu.memory_space<vmem>>, %arg15: memref<8x64xf32, #tpu.memory_space<vmem>>, %arg16: memref<8x128xf32, #tpu.memory_space<vmem>>) attributes {dimension_semantics = [], scalar_prefetch = 0 : i64, scratch_operands = 0 : i64, tpu.core_type = #tpu.core_type<tc>} {
    %c0 = arith.constant 0 : index
    %c0_0 = arith.constant 0 : index
    %0 = vector.load %arg14[%c0, %c0_0] : memref<50x64xf32, #tpu.memory_space<vmem>>, vector<50x64xf32>
    %c0_1 = arith.constant 0 : index
    %c0_2 = arith.constant 0 : index
    %1 = vector.load %arg0[%c0_1, %c0_2] : memref<8x32xf32, #tpu.memory_space<vmem>>, vector<8x32xf32>
    %c0_3 = arith.constant 0 : index
    %c0_4 = arith.constant 0 : index
    %2 = vector.load %arg1[%c0_3, %c0_4] : memref<8x64xf32, #tpu.memory_space<vmem>>, vector<8x64xf32>
    %c0_5 = arith.constant 0 : index
    %c0_6 = arith.constant 0 : index
    %3 = vector.load %arg2[%c0_5, %c0_6] : memref<8x16xf32, #tpu.memory_space<vmem>>, vector<8x16xf32>
    %c0_7 = arith.constant 0 : index
    %c0_8 = arith.constant 0 : index
    %4 = vector.load %arg3[%c0_7, %c0_8] : memref<32x128xf32, #tpu.memory_space<vmem>>, vector<32x128xf32>
    %c0_9 = arith.constant 0 : index
    %c0_10 = arith.constant 0 : index
    %5 = vector.load %arg6[%c0_9, %c0_10] : memref<192x64xf32, #tpu.memory_space<vmem>>, vector<64x64xf32>
    %cst = arith.constant dense<0.000000e+00> : vector<8x128xf32>
    %6 = tpu.matmul %1, %4, %cst {dimension_numbers = #tpu.dot_dimension_numbers<[1], [0], [0], [1], [0, 0, 1, 1], [], []>} : vector<8x32xf32>, vector<32x128xf32>, vector<8x128xf32> -> vector<8x128xf32>
    %7 = vector.extract_strided_slice %6 {offsets = [0, 0], sizes = [8, 64], strides = [1, 1]} : vector<8x128xf32> to vector<8x64xf32>
    %8 = vector.extract_strided_slice %0 {offsets = [0, 0], sizes = [1, 64], strides = [1, 1]} : vector<50x64xf32> to vector<1x64xf32>
    %9 = vector.broadcast %8 : vector<1x64xf32> to vector<8x64xf32>
    %10 = arith.addf %7, %9 : vector<8x64xf32>
    %11 = vector.extract_strided_slice %6 {offsets = [0, 64], sizes = [8, 64], strides = [1, 1]} : vector<8x128xf32> to vector<8x64xf32>
    %12 = vector.extract_strided_slice %0 {offsets = [6, 0], sizes = [1, 64], strides = [1, 1]} : vector<50x64xf32> to vector<1x64xf32>
    %13 = vector.broadcast %12 : vector<1x64xf32> to vector<8x64xf32>
    %14 = arith.addf %11, %13 : vector<8x64xf32>
    %15 = vector.extract_strided_slice %0 {offsets = [1, 0], sizes = [1, 64], strides = [1, 1]} : vector<50x64xf32> to vector<1x64xf32>
    %16 = vector.extract_strided_slice %0 {offsets = [2, 0], sizes = [1, 64], strides = [1, 1]} : vector<50x64xf32> to vector<1x64xf32>
    %cst_11 = arith.constant dense<0.000000e+00> : vector<8xf32>
    %17 = vector.multi_reduction <add>, %10, %cst_11 [1] : vector<8x64xf32> to vector<8xf32>
    %18 = vector.shape_cast %17 : vector<8xf32> to vector<8x1xf32>
    %cst_12 = arith.constant 6.400000e+01 : f32
    %19 = vector.broadcast %cst_12 : f32 to vector<8x1xf32>
    %20 = arith.divf %18, %19 : vector<8x1xf32>
    %21 = vector.broadcast %20 : vector<8x1xf32> to vector<8x64xf32>
    %22 = arith.subf %10, %21 : vector<8x64xf32>
    %23 = arith.mulf %22, %22 : vector<8x64xf32>
    %cst_13 = arith.constant dense<0.000000e+00> : vector<8xf32>
    %24 = vector.multi_reduction <add>, %23, %cst_13 [1] : vector<8x64xf32> to vector<8xf32>
    %25 = vector.shape_cast %24 : vector<8xf32> to vector<8x1xf32>
    %cst_14 = arith.constant 6.400000e+01 : f32
    %26 = vector.broadcast %cst_14 : f32 to vector<8x1xf32>
    %27 = arith.divf %25, %26 : vector<8x1xf32>
    %28 = vector.broadcast %20 : vector<8x1xf32> to vector<8x64xf32>
    %29 = arith.subf %10, %28 : vector<8x64xf32>
    %cst_15 = arith.constant 9.99999974E-6 : f32
    %30 = vector.broadcast %cst_15 : f32 to vector<8x1xf32>
    %31 = arith.addf %27, %30 : vector<8x1xf32>
    %32 = math.rsqrt %31 : vector<8x1xf32>
    %33 = vector.broadcast %32 : vector<8x1xf32> to vector<8x64xf32>
    %34 = arith.mulf %29, %33 : vector<8x64xf32>
    %35 = vector.broadcast %15 : vector<1x64xf32> to vector<8x64xf32>
    %36 = arith.mulf %34, %35 : vector<8x64xf32>
    %37 = vector.broadcast %16 : vector<1x64xf32> to vector<8x64xf32>
    %38 = arith.addf %36, %37 : vector<8x64xf32>
    %cst_16 = arith.constant 0.000000e+00 : f32
    %39 = vector.broadcast %cst_16 : f32 to vector<8x64xf32>
    %40 = arith.maximumf %38, %39 : vector<8x64xf32>
    %cst_17 = arith.constant dense<0.000000e+00> : vector<8x64xf32>
    %41 = tpu.matmul %40, %5, %cst_17 {dimension_numbers = #tpu.dot_dimension_numbers<[1], [0], [0], [1], [0, 0, 1, 1], [], []>} : vector<8x64xf32>, vector<64x64xf32>, vector<8x64xf32> -> vector<8x64xf32>
    %42 = vector.extract_strided_slice %0 {offsets = [3, 0], sizes = [1, 64], strides = [1, 1]} : vector<50x64xf32> to vector<1x64xf32>
    %43 = vector.broadcast %42 : vector<1x64xf32> to vector<8x64xf32>
    %44 = arith.addf %41, %43 : vector<8x64xf32>
    %45 = vector.extract_strided_slice %0 {offsets = [4, 0], sizes = [1, 64], strides = [1, 1]} : vector<50x64xf32> to vector<1x64xf32>
    %46 = vector.extract_strided_slice %0 {offsets = [5, 0], sizes = [1, 64], strides = [1, 1]} : vector<50x64xf32> to vector<1x64xf32>
    %cst_18 = arith.constant dense<0.000000e+00> : vector<8xf32>
    %47 = vector.multi_reduction <add>, %44, %cst_18 [1] : vector<8x64xf32> to vector<8xf32>
    %48 = vector.shape_cast %47 : vector<8xf32> to vector<8x1xf32>
    %cst_19 = arith.constant 6.400000e+01 : f32
    %49 = vector.broadcast %cst_19 : f32 to vector<8x1xf32>
    %50 = arith.divf %48, %49 : vector<8x1xf32>
    %51 = vector.broadcast %50 : vector<8x1xf32> to vector<8x64xf32>
    %52 = arith.subf %44, %51 : vector<8x64xf32>
    %53 = arith.mulf %52, %52 : vector<8x64xf32>
    %cst_20 = arith.constant dense<0.000000e+00> : vector<8xf32>
    %54 = vector.multi_reduction <add>, %53, %cst_20 [1] : vector<8x64xf32> to vector<8xf32>
    %55 = vector.shape_cast %54 : vector<8xf32> to vector<8x1xf32>
    %cst_21 = arith.constant 6.400000e+01 : f32
    %56 = vector.broadcast %cst_21 : f32 to vector<8x1xf32>
    %57 = arith.divf %55, %56 : vector<8x1xf32>
    %58 = vector.broadcast %50 : vector<8x1xf32> to vector<8x64xf32>
    %59 = arith.subf %44, %58 : vector<8x64xf32>
    %cst_22 = arith.constant 9.99999974E-6 : f32
    %60 = vector.broadcast %cst_22 : f32 to vector<8x1xf32>
    %61 = arith.addf %57, %60 : vector<8x1xf32>
    %62 = math.rsqrt %61 : vector<8x1xf32>
    %63 = vector.broadcast %62 : vector<8x1xf32> to vector<8x64xf32>
    %64 = arith.mulf %59, %63 : vector<8x64xf32>
    %65 = vector.broadcast %45 : vector<1x64xf32> to vector<8x64xf32>
    %66 = arith.mulf %64, %65 : vector<8x64xf32>
    %67 = vector.broadcast %46 : vector<1x64xf32> to vector<8x64xf32>
    %68 = arith.addf %66, %67 : vector<8x64xf32>
    %69 = arith.addf %68, %14 : vector<8x64xf32>
    %c0_23 = arith.constant 0 : index
    %c0_24 = arith.constant 0 : index
    %70 = vector.load %arg4[%c0_23, %c0_24] : memref<64x64xf32, #tpu.memory_space<vmem>>, vector<64x64xf32>
    %c64 = arith.constant 64 : index
    %c0_25 = arith.constant 0 : index
    %71 = vector.load %arg6[%c64, %c0_25] : memref<192x64xf32, #tpu.memory_space<vmem>>, vector<64x64xf32>
    %cst_26 = arith.constant dense<0.000000e+00> : vector<8x64xf32>
    %72 = tpu.matmul %2, %70, %cst_26 {dimension_numbers = #tpu.dot_dimension_numbers<[1], [0], [0], [1], [0, 0, 1, 1], [], []>} : vector<8x64xf32>, vector<64x64xf32>, vector<8x64xf32> -> vector<8x64xf32>
    %73 = vector.extract_strided_slice %0 {offsets = [7, 0], sizes = [1, 64], strides = [1, 1]} : vector<50x64xf32> to vector<1x64xf32>
    %74 = vector.broadcast %73 : vector<1x64xf32> to vector<8x64xf32>
    %75 = arith.addf %72, %74 : vector<8x64xf32>
    %76 = vector.extract_strided_slice %0 {offsets = [8, 0], sizes = [1, 64], strides = [1, 1]} : vector<50x64xf32> to vector<1x64xf32>
    %77 = vector.extract_strided_slice %0 {offsets = [9, 0], sizes = [1, 64], strides = [1, 1]} : vector<50x64xf32> to vector<1x64xf32>
    %cst_27 = arith.constant dense<0.000000e+00> : vector<8xf32>
    %78 = vector.multi_reduction <add>, %75, %cst_27 [1] : vector<8x64xf32> to vector<8xf32>
    %79 = vector.shape_cast %78 : vector<8xf32> to vector<8x1xf32>
    %cst_28 = arith.constant 6.400000e+01 : f32
    %80 = vector.broadcast %cst_28 : f32 to vector<8x1xf32>
    %81 = arith.divf %79, %80 : vector<8x1xf32>
    %82 = vector.broadcast %81 : vector<8x1xf32> to vector<8x64xf32>
    %83 = arith.subf %75, %82 : vector<8x64xf32>
    %84 = arith.mulf %83, %83 : vector<8x64xf32>
    %cst_29 = arith.constant dense<0.000000e+00> : vector<8xf32>
    %85 = vector.multi_reduction <add>, %84, %cst_29 [1] : vector<8x64xf32> to vector<8xf32>
    %86 = vector.shape_cast %85 : vector<8xf32> to vector<8x1xf32>
    %cst_30 = arith.constant 6.400000e+01 : f32
    %87 = vector.broadcast %cst_30 : f32 to vector<8x1xf32>
    %88 = arith.divf %86, %87 : vector<8x1xf32>
    %89 = vector.broadcast %81 : vector<8x1xf32> to vector<8x64xf32>
    %90 = arith.subf %75, %89 : vector<8x64xf32>
    %cst_31 = arith.constant 9.99999974E-6 : f32
    %91 = vector.broadcast %cst_31 : f32 to vector<8x1xf32>
    %92 = arith.addf %88, %91 : vector<8x1xf32>
    %93 = math.rsqrt %92 : vector<8x1xf32>
    %94 = vector.broadcast %93 : vector<8x1xf32> to vector<8x64xf32>
    %95 = arith.mulf %90, %94 : vector<8x64xf32>
    %96 = vector.broadcast %76 : vector<1x64xf32> to vector<8x64xf32>
    %97 = arith.mulf %95, %96 : vector<8x64xf32>
    %98 = vector.broadcast %77 : vector<1x64xf32> to vector<8x64xf32>
    %99 = arith.addf %97, %98 : vector<8x64xf32>
    %cst_32 = arith.constant 0.000000e+00 : f32
    %100 = vector.broadcast %cst_32 : f32 to vector<8x64xf32>
    %101 = arith.maximumf %99, %100 : vector<8x64xf32>
    %cst_33 = arith.constant dense<0.000000e+00> : vector<8x64xf32>
    %102 = tpu.matmul %101, %71, %cst_33 {dimension_numbers = #tpu.dot_dimension_numbers<[1], [0], [0], [1], [0, 0, 1, 1], [], []>} : vector<8x64xf32>, vector<64x64xf32>, vector<8x64xf32> -> vector<8x64xf32>
    %103 = vector.extract_strided_slice %0 {offsets = [10, 0], sizes = [1, 64], strides = [1, 1]} : vector<50x64xf32> to vector<1x64xf32>
    %104 = vector.broadcast %103 : vector<1x64xf32> to vector<8x64xf32>
    %105 = arith.addf %102, %104 : vector<8x64xf32>
    %106 = vector.extract_strided_slice %0 {offsets = [11, 0], sizes = [1, 64], strides = [1, 1]} : vector<50x64xf32> to vector<1x64xf32>
    %107 = vector.extract_strided_slice %0 {offsets = [12, 0], sizes = [1, 64], strides = [1, 1]} : vector<50x64xf32> to vector<1x64xf32>
    %cst_34 = arith.constant dense<0.000000e+00> : vector<8xf32>
    %108 = vector.multi_reduction <add>, %105, %cst_34 [1] : vector<8x64xf32> to vector<8xf32>
    %109 = vector.shape_cast %108 : vector<8xf32> to vector<8x1xf32>
    %cst_35 = arith.constant 6.400000e+01 : f32
    %110 = vector.broadcast %cst_35 : f32 to vector<8x1xf32>
    %111 = arith.divf %109, %110 : vector<8x1xf32>
    %112 = vector.broadcast %111 : vector<8x1xf32> to vector<8x64xf32>
    %113 = arith.subf %105, %112 : vector<8x64xf32>
    %114 = arith.mulf %113, %113 : vector<8x64xf32>
    %cst_36 = arith.constant dense<0.000000e+00> : vector<8xf32>
    %115 = vector.multi_reduction <add>, %114, %cst_36 [1] : vector<8x64xf32> to vector<8xf32>
    %116 = vector.shape_cast %115 : vector<8xf32> to vector<8x1xf32>
    %cst_37 = arith.constant 6.400000e+01 : f32
    %117 = vector.broadcast %cst_37 : f32 to vector<8x1xf32>
    %118 = arith.divf %116, %117 : vector<8x1xf32>
    %119 = vector.broadcast %111 : vector<8x1xf32> to vector<8x64xf32>
    %120 = arith.subf %105, %119 : vector<8x64xf32>
    %cst_38 = arith.constant 9.99999974E-6 : f32
    %121 = vector.broadcast %cst_38 : f32 to vector<8x1xf32>
    %122 = arith.addf %118, %121 : vector<8x1xf32>
    %123 = math.rsqrt %122 : vector<8x1xf32>
    %124 = vector.broadcast %123 : vector<8x1xf32> to vector<8x64xf32>
    %125 = arith.mulf %120, %124 : vector<8x64xf32>
    %126 = vector.broadcast %106 : vector<1x64xf32> to vector<8x64xf32>
    %127 = arith.mulf %125, %126 : vector<8x64xf32>
    %128 = vector.broadcast %107 : vector<1x64xf32> to vector<8x64xf32>
    %129 = arith.addf %127, %128 : vector<8x64xf32>
    %130 = arith.addf %129, %2 : vector<8x64xf32>
    %c0_39 = arith.constant 0 : index
    %c0_40 = arith.constant 0 : index
    %131 = vector.load %arg5[%c0_39, %c0_40] : memref<16x128xf32, #tpu.memory_space<vmem>>, vector<16x128xf32>
    %c128 = arith.constant 128 : index
    %c0_41 = arith.constant 0 : index
    %132 = vector.load %arg6[%c128, %c0_41] : memref<192x64xf32, #tpu.memory_space<vmem>>, vector<64x64xf32>
    %cst_42 = arith.constant dense<0.000000e+00> : vector<8x128xf32>
    %133 = tpu.matmul %3, %131, %cst_42 {dimension_numbers = #tpu.dot_dimension_numbers<[1], [0], [0], [1], [0, 0, 1, 1], [], []>} : vector<8x16xf32>, vector<16x128xf32>, vector<8x128xf32> -> vector<8x128xf32>
    %134 = vector.extract_strided_slice %133 {offsets = [0, 0], sizes = [8, 64], strides = [1, 1]} : vector<8x128xf32> to vector<8x64xf32>
    %135 = vector.extract_strided_slice %0 {offsets = [14, 0], sizes = [1, 64], strides = [1, 1]} : vector<50x64xf32> to vector<1x64xf32>
    %136 = vector.broadcast %135 : vector<1x64xf32> to vector<8x64xf32>
    %137 = arith.addf %134, %136 : vector<8x64xf32>
    %138 = vector.extract_strided_slice %133 {offsets = [0, 64], sizes = [8, 64], strides = [1, 1]} : vector<8x128xf32> to vector<8x64xf32>
    %139 = vector.extract_strided_slice %0 {offsets = [20, 0], sizes = [1, 64], strides = [1, 1]} : vector<50x64xf32> to vector<1x64xf32>
    %140 = vector.broadcast %139 : vector<1x64xf32> to vector<8x64xf32>
    %141 = arith.addf %138, %140 : vector<8x64xf32>
    %142 = vector.extract_strided_slice %0 {offsets = [15, 0], sizes = [1, 64], strides = [1, 1]} : vector<50x64xf32> to vector<1x64xf32>
    %143 = vector.extract_strided_slice %0 {offsets = [16, 0], sizes = [1, 64], strides = [1, 1]} : vector<50x64xf32> to vector<1x64xf32>
    %cst_43 = arith.constant dense<0.000000e+00> : vector<8xf32>
    %144 = vector.multi_reduction <add>, %137, %cst_43 [1] : vector<8x64xf32> to vector<8xf32>
    %145 = vector.shape_cast %144 : vector<8xf32> to vector<8x1xf32>
    %cst_44 = arith.constant 6.400000e+01 : f32
    %146 = vector.broadcast %cst_44 : f32 to vector<8x1xf32>
    %147 = arith.divf %145, %146 : vector<8x1xf32>
    %148 = vector.broadcast %147 : vector<8x1xf32> to vector<8x64xf32>
    %149 = arith.subf %137, %148 : vector<8x64xf32>
    %150 = arith.mulf %149, %149 : vector<8x64xf32>
    %cst_45 = arith.constant dense<0.000000e+00> : vector<8xf32>
    %151 = vector.multi_reduction <add>, %150, %cst_45 [1] : vector<8x64xf32> to vector<8xf32>
    %152 = vector.shape_cast %151 : vector<8xf32> to vector<8x1xf32>
    %cst_46 = arith.constant 6.400000e+01 : f32
    %153 = vector.broadcast %cst_46 : f32 to vector<8x1xf32>
    %154 = arith.divf %152, %153 : vector<8x1xf32>
    %155 = vector.broadcast %147 : vector<8x1xf32> to vector<8x64xf32>
    %156 = arith.subf %137, %155 : vector<8x64xf32>
    %cst_47 = arith.constant 9.99999974E-6 : f32
    %157 = vector.broadcast %cst_47 : f32 to vector<8x1xf32>
    %158 = arith.addf %154, %157 : vector<8x1xf32>
    %159 = math.rsqrt %158 : vector<8x1xf32>
    %160 = vector.broadcast %159 : vector<8x1xf32> to vector<8x64xf32>
    %161 = arith.mulf %156, %160 : vector<8x64xf32>
    %162 = vector.broadcast %142 : vector<1x64xf32> to vector<8x64xf32>
    %163 = arith.mulf %161, %162 : vector<8x64xf32>
    %164 = vector.broadcast %143 : vector<1x64xf32> to vector<8x64xf32>
    %165 = arith.addf %163, %164 : vector<8x64xf32>
    %cst_48 = arith.constant 0.000000e+00 : f32
    %166 = vector.broadcast %cst_48 : f32 to vector<8x64xf32>
    %167 = arith.maximumf %165, %166 : vector<8x64xf32>
    %cst_49 = arith.constant dense<0.000000e+00> : vector<8x64xf32>
    %168 = tpu.matmul %167, %132, %cst_49 {dimension_numbers = #tpu.dot_dimension_numbers<[1], [0], [0], [1], [0, 0, 1, 1], [], []>} : vector<8x64xf32>, vector<64x64xf32>, vector<8x64xf32> -> vector<8x64xf32>
    %169 = vector.extract_strided_slice %0 {offsets = [17, 0], sizes = [1, 64], strides = [1, 1]} : vector<50x64xf32> to vector<1x64xf32>
    %170 = vector.broadcast %169 : vector<1x64xf32> to vector<8x64xf32>
    %171 = arith.addf %168, %170 : vector<8x64xf32>
    %172 = vector.extract_strided_slice %0 {offsets = [18, 0], sizes = [1, 64], strides = [1, 1]} : vector<50x64xf32> to vector<1x64xf32>
    %173 = vector.extract_strided_slice %0 {offsets = [19, 0], sizes = [1, 64], strides = [1, 1]} : vector<50x64xf32> to vector<1x64xf32>
    %cst_50 = arith.constant dense<0.000000e+00> : vector<8xf32>
    %174 = vector.multi_reduction <add>, %171, %cst_50 [1] : vector<8x64xf32> to vector<8xf32>
    %175 = vector.shape_cast %174 : vector<8xf32> to vector<8x1xf32>
    %cst_51 = arith.constant 6.400000e+01 : f32
    %176 = vector.broadcast %cst_51 : f32 to vector<8x1xf32>
    %177 = arith.divf %175, %176 : vector<8x1xf32>
    %178 = vector.broadcast %177 : vector<8x1xf32> to vector<8x64xf32>
    %179 = arith.subf %171, %178 : vector<8x64xf32>
    %180 = arith.mulf %179, %179 : vector<8x64xf32>
    %cst_52 = arith.constant dense<0.000000e+00> : vector<8xf32>
    %181 = vector.multi_reduction <add>, %180, %cst_52 [1] : vector<8x64xf32> to vector<8xf32>
    %182 = vector.shape_cast %181 : vector<8xf32> to vector<8x1xf32>
    %cst_53 = arith.constant 6.400000e+01 : f32
    %183 = vector.broadcast %cst_53 : f32 to vector<8x1xf32>
    %184 = arith.divf %182, %183 : vector<8x1xf32>
    %185 = vector.broadcast %177 : vector<8x1xf32> to vector<8x64xf32>
    %186 = arith.subf %171, %185 : vector<8x64xf32>
    %cst_54 = arith.constant 9.99999974E-6 : f32
    %187 = vector.broadcast %cst_54 : f32 to vector<8x1xf32>
    %188 = arith.addf %184, %187 : vector<8x1xf32>
    %189 = math.rsqrt %188 : vector<8x1xf32>
    %190 = vector.broadcast %189 : vector<8x1xf32> to vector<8x64xf32>
    %191 = arith.mulf %186, %190 : vector<8x64xf32>
    %192 = vector.broadcast %172 : vector<1x64xf32> to vector<8x64xf32>
    %193 = arith.mulf %191, %192 : vector<8x64xf32>
    %194 = vector.broadcast %173 : vector<1x64xf32> to vector<8x64xf32>
    %195 = arith.addf %193, %194 : vector<8x64xf32>
    %196 = arith.addf %195, %141 : vector<8x64xf32>
    %c0_55 = arith.constant 0 : index
    %c0_56 = arith.constant 0 : index
    %197 = vector.load %arg7[%c0_55, %c0_56] : memref<384x64xf32, #tpu.memory_space<vmem>>, vector<64x64xf32>
    %c192 = arith.constant 192 : index
    %c0_57 = arith.constant 0 : index
    %198 = vector.load %arg7[%c192, %c0_57] : memref<384x64xf32, #tpu.memory_space<vmem>>, vector<64x64xf32>
    %cst_58 = arith.constant dense<0.000000e+00> : vector<8x64xf32>
    %199 = tpu.matmul %130, %197, %cst_58 {dimension_numbers = #tpu.dot_dimension_numbers<[1], [0], [0], [1], [0, 0, 1, 1], [], []>} : vector<8x64xf32>, vector<64x64xf32>, vector<8x64xf32> -> vector<8x64xf32>
    %200 = vector.extract_strided_slice %0 {offsets = [21, 0], sizes = [1, 64], strides = [1, 1]} : vector<50x64xf32> to vector<1x64xf32>
    %201 = vector.broadcast %200 : vector<1x64xf32> to vector<8x64xf32>
    %202 = arith.addf %199, %201 : vector<8x64xf32>
    %cst_59 = arith.constant dense<0.000000e+00> : vector<8x64xf32>
    %203 = tpu.matmul %202, %198, %cst_59 {dimension_numbers = #tpu.dot_dimension_numbers<[1], [0], [0], [1], [0, 0, 1, 1], [], []>} : vector<8x64xf32>, vector<64x64xf32>, vector<8x64xf32> -> vector<8x64xf32>
    %204 = vector.extract_strided_slice %0 {offsets = [22, 0], sizes = [1, 64], strides = [1, 1]} : vector<50x64xf32> to vector<1x64xf32>
    %205 = vector.broadcast %204 : vector<1x64xf32> to vector<8x64xf32>
    %206 = arith.addf %203, %205 : vector<8x64xf32>
    %c0_60 = arith.constant 0 : index
    %c0_61 = arith.constant 0 : index
    %207 = vector.load %arg8[%c0_60, %c0_61] : memref<576x64xf32, #tpu.memory_space<vmem>>, vector<64x64xf32>
    %cst_62 = arith.constant dense<0.000000e+00> : vector<8x64xf32>
    %208 = tpu.matmul %206, %207, %cst_62 {dimension_numbers = #tpu.dot_dimension_numbers<[1], [0], [0], [1], [0, 0, 1, 1], [], []>} : vector<8x64xf32>, vector<64x64xf32>, vector<8x64xf32> -> vector<8x64xf32>
    %209 = arith.mulf %69, %130 : vector<8x64xf32>
    %c64_63 = arith.constant 64 : index
    %c0_64 = arith.constant 0 : index
    %210 = vector.load %arg8[%c64_63, %c0_64] : memref<576x64xf32, #tpu.memory_space<vmem>>, vector<64x64xf32>
    %cst_65 = arith.constant dense<0.000000e+00> : vector<8x64xf32>
    %211 = tpu.matmul %209, %210, %cst_65 {dimension_numbers = #tpu.dot_dimension_numbers<[1], [0], [0], [1], [0, 0, 1, 1], [], []>} : vector<8x64xf32>, vector<64x64xf32>, vector<8x64xf32> -> vector<8x64xf32>
    %212 = arith.addf %208, %211 : vector<8x64xf32>
    %213 = arith.subf %69, %130 : vector<8x64xf32>
    %214 = math.absf %213 : vector<8x64xf32>
    %c128_66 = arith.constant 128 : index
    %c0_67 = arith.constant 0 : index
    %215 = vector.load %arg8[%c128_66, %c0_67] : memref<576x64xf32, #tpu.memory_space<vmem>>, vector<64x64xf32>
    %cst_68 = arith.constant dense<0.000000e+00> : vector<8x64xf32>
    %216 = tpu.matmul %214, %215, %cst_68 {dimension_numbers = #tpu.dot_dimension_numbers<[1], [0], [0], [1], [0, 0, 1, 1], [], []>} : vector<8x64xf32>, vector<64x64xf32>, vector<8x64xf32> -> vector<8x64xf32>
    %217 = arith.addf %212, %216 : vector<8x64xf32>
    %218 = vector.extract_strided_slice %0 {offsets = [23, 0], sizes = [1, 64], strides = [1, 1]} : vector<50x64xf32> to vector<1x64xf32>
    %219 = vector.broadcast %218 : vector<1x64xf32> to vector<8x64xf32>
    %220 = arith.addf %217, %219 : vector<8x64xf32>
    %221 = vector.extract_strided_slice %0 {offsets = [24, 0], sizes = [1, 64], strides = [1, 1]} : vector<50x64xf32> to vector<1x64xf32>
    %222 = vector.extract_strided_slice %0 {offsets = [25, 0], sizes = [1, 64], strides = [1, 1]} : vector<50x64xf32> to vector<1x64xf32>
    %cst_69 = arith.constant dense<0.000000e+00> : vector<8xf32>
    %223 = vector.multi_reduction <add>, %220, %cst_69 [1] : vector<8x64xf32> to vector<8xf32>
    %224 = vector.shape_cast %223 : vector<8xf32> to vector<8x1xf32>
    %cst_70 = arith.constant 6.400000e+01 : f32
    %225 = vector.broadcast %cst_70 : f32 to vector<8x1xf32>
    %226 = arith.divf %224, %225 : vector<8x1xf32>
    %227 = vector.broadcast %226 : vector<8x1xf32> to vector<8x64xf32>
    %228 = arith.subf %220, %227 : vector<8x64xf32>
    %229 = arith.mulf %228, %228 : vector<8x64xf32>
    %cst_71 = arith.constant dense<0.000000e+00> : vector<8xf32>
    %230 = vector.multi_reduction <add>, %229, %cst_71 [1] : vector<8x64xf32> to vector<8xf32>
    %231 = vector.shape_cast %230 : vector<8xf32> to vector<8x1xf32>
    %cst_72 = arith.constant 6.400000e+01 : f32
    %232 = vector.broadcast %cst_72 : f32 to vector<8x1xf32>
    %233 = arith.divf %231, %232 : vector<8x1xf32>
    %234 = vector.broadcast %226 : vector<8x1xf32> to vector<8x64xf32>
    %235 = arith.subf %220, %234 : vector<8x64xf32>
    %cst_73 = arith.constant 9.99999974E-6 : f32
    %236 = vector.broadcast %cst_73 : f32 to vector<8x1xf32>
    %237 = arith.addf %233, %236 : vector<8x1xf32>
    %238 = math.rsqrt %237 : vector<8x1xf32>
    %239 = vector.broadcast %238 : vector<8x1xf32> to vector<8x64xf32>
    %240 = arith.mulf %235, %239 : vector<8x64xf32>
    %241 = vector.broadcast %221 : vector<1x64xf32> to vector<8x64xf32>
    %242 = arith.mulf %240, %241 : vector<8x64xf32>
    %243 = vector.broadcast %222 : vector<1x64xf32> to vector<8x64xf32>
    %244 = arith.addf %242, %243 : vector<8x64xf32>
    %cst_74 = arith.constant 0.000000e+00 : f32
    %245 = vector.broadcast %cst_74 : f32 to vector<8x64xf32>
    %246 = arith.maximumf %244, %245 : vector<8x64xf32>
    %c64_75 = arith.constant 64 : index
    %c0_76 = arith.constant 0 : index
    %247 = vector.load %arg7[%c64_75, %c0_76] : memref<384x64xf32, #tpu.memory_space<vmem>>, vector<64x64xf32>
    %c256 = arith.constant 256 : index
    %c0_77 = arith.constant 0 : index
    %248 = vector.load %arg7[%c256, %c0_77] : memref<384x64xf32, #tpu.memory_space<vmem>>, vector<64x64xf32>
    %cst_78 = arith.constant dense<0.000000e+00> : vector<8x64xf32>
    %249 = tpu.matmul %196, %247, %cst_78 {dimension_numbers = #tpu.dot_dimension_numbers<[1], [0], [0], [1], [0, 0, 1, 1], [], []>} : vector<8x64xf32>, vector<64x64xf32>, vector<8x64xf32> -> vector<8x64xf32>
    %250 = vector.extract_strided_slice %0 {offsets = [26, 0], sizes = [1, 64], strides = [1, 1]} : vector<50x64xf32> to vector<1x64xf32>
    %251 = vector.broadcast %250 : vector<1x64xf32> to vector<8x64xf32>
    %252 = arith.addf %249, %251 : vector<8x64xf32>
    %cst_79 = arith.constant dense<0.000000e+00> : vector<8x64xf32>
    %253 = tpu.matmul %252, %248, %cst_79 {dimension_numbers = #tpu.dot_dimension_numbers<[1], [0], [0], [1], [0, 0, 1, 1], [], []>} : vector<8x64xf32>, vector<64x64xf32>, vector<8x64xf32> -> vector<8x64xf32>
    %254 = vector.extract_strided_slice %0 {offsets = [27, 0], sizes = [1, 64], strides = [1, 1]} : vector<50x64xf32> to vector<1x64xf32>
    %255 = vector.broadcast %254 : vector<1x64xf32> to vector<8x64xf32>
    %256 = arith.addf %253, %255 : vector<8x64xf32>
    %c192_80 = arith.constant 192 : index
    %c0_81 = arith.constant 0 : index
    %257 = vector.load %arg8[%c192_80, %c0_81] : memref<576x64xf32, #tpu.memory_space<vmem>>, vector<64x64xf32>
    %cst_82 = arith.constant dense<0.000000e+00> : vector<8x64xf32>
    %258 = tpu.matmul %256, %257, %cst_82 {dimension_numbers = #tpu.dot_dimension_numbers<[1], [0], [0], [1], [0, 0, 1, 1], [], []>} : vector<8x64xf32>, vector<64x64xf32>, vector<8x64xf32> -> vector<8x64xf32>
    %259 = arith.mulf %69, %196 : vector<8x64xf32>
    %c256_83 = arith.constant 256 : index
    %c0_84 = arith.constant 0 : index
    %260 = vector.load %arg8[%c256_83, %c0_84] : memref<576x64xf32, #tpu.memory_space<vmem>>, vector<64x64xf32>
    %cst_85 = arith.constant dense<0.000000e+00> : vector<8x64xf32>
    %261 = tpu.matmul %259, %260, %cst_85 {dimension_numbers = #tpu.dot_dimension_numbers<[1], [0], [0], [1], [0, 0, 1, 1], [], []>} : vector<8x64xf32>, vector<64x64xf32>, vector<8x64xf32> -> vector<8x64xf32>
    %262 = arith.addf %258, %261 : vector<8x64xf32>
    %263 = arith.subf %69, %196 : vector<8x64xf32>
    %264 = math.absf %263 : vector<8x64xf32>
    %c320 = arith.constant 320 : index
    %c0_86 = arith.constant 0 : index
    %265 = vector.load %arg8[%c320, %c0_86] : memref<576x64xf32, #tpu.memory_space<vmem>>, vector<64x64xf32>
    %cst_87 = arith.constant dense<0.000000e+00> : vector<8x64xf32>
    %266 = tpu.matmul %264, %265, %cst_87 {dimension_numbers = #tpu.dot_dimension_numbers<[1], [0], [0], [1], [0, 0, 1, 1], [], []>} : vector<8x64xf32>, vector<64x64xf32>, vector<8x64xf32> -> vector<8x64xf32>
    %267 = arith.addf %262, %266 : vector<8x64xf32>
    %268 = vector.extract_strided_slice %0 {offsets = [28, 0], sizes = [1, 64], strides = [1, 1]} : vector<50x64xf32> to vector<1x64xf32>
    %269 = vector.broadcast %268 : vector<1x64xf32> to vector<8x64xf32>
    %270 = arith.addf %267, %269 : vector<8x64xf32>
    %271 = vector.extract_strided_slice %0 {offsets = [29, 0], sizes = [1, 64], strides = [1, 1]} : vector<50x64xf32> to vector<1x64xf32>
    %272 = vector.extract_strided_slice %0 {offsets = [30, 0], sizes = [1, 64], strides = [1, 1]} : vector<50x64xf32> to vector<1x64xf32>
    %cst_88 = arith.constant dense<0.000000e+00> : vector<8xf32>
    %273 = vector.multi_reduction <add>, %270, %cst_88 [1] : vector<8x64xf32> to vector<8xf32>
    %274 = vector.shape_cast %273 : vector<8xf32> to vector<8x1xf32>
    %cst_89 = arith.constant 6.400000e+01 : f32
    %275 = vector.broadcast %cst_89 : f32 to vector<8x1xf32>
    %276 = arith.divf %274, %275 : vector<8x1xf32>
    %277 = vector.broadcast %276 : vector<8x1xf32> to vector<8x64xf32>
    %278 = arith.subf %270, %277 : vector<8x64xf32>
    %279 = arith.mulf %278, %278 : vector<8x64xf32>
    %cst_90 = arith.constant dense<0.000000e+00> : vector<8xf32>
    %280 = vector.multi_reduction <add>, %279, %cst_90 [1] : vector<8x64xf32> to vector<8xf32>
    %281 = vector.shape_cast %280 : vector<8xf32> to vector<8x1xf32>
    %cst_91 = arith.constant 6.400000e+01 : f32
    %282 = vector.broadcast %cst_91 : f32 to vector<8x1xf32>
    %283 = arith.divf %281, %282 : vector<8x1xf32>
    %284 = vector.broadcast %276 : vector<8x1xf32> to vector<8x64xf32>
    %285 = arith.subf %270, %284 : vector<8x64xf32>
    %cst_92 = arith.constant 9.99999974E-6 : f32
    %286 = vector.broadcast %cst_92 : f32 to vector<8x1xf32>
    %287 = arith.addf %283, %286 : vector<8x1xf32>
    %288 = math.rsqrt %287 : vector<8x1xf32>
    %289 = vector.broadcast %288 : vector<8x1xf32> to vector<8x64xf32>
    %290 = arith.mulf %285, %289 : vector<8x64xf32>
    %291 = vector.broadcast %271 : vector<1x64xf32> to vector<8x64xf32>
    %292 = arith.mulf %290, %291 : vector<8x64xf32>
    %293 = vector.broadcast %272 : vector<1x64xf32> to vector<8x64xf32>
    %294 = arith.addf %292, %293 : vector<8x64xf32>
    %cst_93 = arith.constant 0.000000e+00 : f32
    %295 = vector.broadcast %cst_93 : f32 to vector<8x64xf32>
    %296 = arith.maximumf %294, %295 : vector<8x64xf32>
    %c128_94 = arith.constant 128 : index
    %c0_95 = arith.constant 0 : index
    %297 = vector.load %arg7[%c128_94, %c0_95] : memref<384x64xf32, #tpu.memory_space<vmem>>, vector<64x64xf32>
    %c320_96 = arith.constant 320 : index
    %c0_97 = arith.constant 0 : index
    %298 = vector.load %arg7[%c320_96, %c0_97] : memref<384x64xf32, #tpu.memory_space<vmem>>, vector<64x64xf32>
    %cst_98 = arith.constant dense<0.000000e+00> : vector<8x64xf32>
    %299 = tpu.matmul %196, %297, %cst_98 {dimension_numbers = #tpu.dot_dimension_numbers<[1], [0], [0], [1], [0, 0, 1, 1], [], []>} : vector<8x64xf32>, vector<64x64xf32>, vector<8x64xf32> -> vector<8x64xf32>
    %300 = vector.extract_strided_slice %0 {offsets = [31, 0], sizes = [1, 64], strides = [1, 1]} : vector<50x64xf32> to vector<1x64xf32>
    %301 = vector.broadcast %300 : vector<1x64xf32> to vector<8x64xf32>
    %302 = arith.addf %299, %301 : vector<8x64xf32>
    %cst_99 = arith.constant dense<0.000000e+00> : vector<8x64xf32>
    %303 = tpu.matmul %302, %298, %cst_99 {dimension_numbers = #tpu.dot_dimension_numbers<[1], [0], [0], [1], [0, 0, 1, 1], [], []>} : vector<8x64xf32>, vector<64x64xf32>, vector<8x64xf32> -> vector<8x64xf32>
    %304 = vector.extract_strided_slice %0 {offsets = [32, 0], sizes = [1, 64], strides = [1, 1]} : vector<50x64xf32> to vector<1x64xf32>
    %305 = vector.broadcast %304 : vector<1x64xf32> to vector<8x64xf32>
    %306 = arith.addf %303, %305 : vector<8x64xf32>
    %c384 = arith.constant 384 : index
    %c0_100 = arith.constant 0 : index
    %307 = vector.load %arg8[%c384, %c0_100] : memref<576x64xf32, #tpu.memory_space<vmem>>, vector<64x64xf32>
    %cst_101 = arith.constant dense<0.000000e+00> : vector<8x64xf32>
    %308 = tpu.matmul %306, %307, %cst_101 {dimension_numbers = #tpu.dot_dimension_numbers<[1], [0], [0], [1], [0, 0, 1, 1], [], []>} : vector<8x64xf32>, vector<64x64xf32>, vector<8x64xf32> -> vector<8x64xf32>
    %309 = arith.mulf %130, %196 : vector<8x64xf32>
    %c448 = arith.constant 448 : index
    %c0_102 = arith.constant 0 : index
    %310 = vector.load %arg8[%c448, %c0_102] : memref<576x64xf32, #tpu.memory_space<vmem>>, vector<64x64xf32>
    %cst_103 = arith.constant dense<0.000000e+00> : vector<8x64xf32>
    %311 = tpu.matmul %309, %310, %cst_103 {dimension_numbers = #tpu.dot_dimension_numbers<[1], [0], [0], [1], [0, 0, 1, 1], [], []>} : vector<8x64xf32>, vector<64x64xf32>, vector<8x64xf32> -> vector<8x64xf32>
    %312 = arith.addf %308, %311 : vector<8x64xf32>
    %313 = arith.subf %130, %196 : vector<8x64xf32>
    %314 = math.absf %313 : vector<8x64xf32>
    %c512 = arith.constant 512 : index
    %c0_104 = arith.constant 0 : index
    %315 = vector.load %arg8[%c512, %c0_104] : memref<576x64xf32, #tpu.memory_space<vmem>>, vector<64x64xf32>
    %cst_105 = arith.constant dense<0.000000e+00> : vector<8x64xf32>
    %316 = tpu.matmul %314, %315, %cst_105 {dimension_numbers = #tpu.dot_dimension_numbers<[1], [0], [0], [1], [0, 0, 1, 1], [], []>} : vector<8x64xf32>, vector<64x64xf32>, vector<8x64xf32> -> vector<8x64xf32>
    %317 = arith.addf %312, %316 : vector<8x64xf32>
    %318 = vector.extract_strided_slice %0 {offsets = [33, 0], sizes = [1, 64], strides = [1, 1]} : vector<50x64xf32> to vector<1x64xf32>
    %319 = vector.broadcast %318 : vector<1x64xf32> to vector<8x64xf32>
    %320 = arith.addf %317, %319 : vector<8x64xf32>
    %321 = vector.extract_strided_slice %0 {offsets = [34, 0], sizes = [1, 64], strides = [1, 1]} : vector<50x64xf32> to vector<1x64xf32>
    %322 = vector.extract_strided_slice %0 {offsets = [35, 0], sizes = [1, 64], strides = [1, 1]} : vector<50x64xf32> to vector<1x64xf32>
    %cst_106 = arith.constant dense<0.000000e+00> : vector<8xf32>
    %323 = vector.multi_reduction <add>, %320, %cst_106 [1] : vector<8x64xf32> to vector<8xf32>
    %324 = vector.shape_cast %323 : vector<8xf32> to vector<8x1xf32>
    %cst_107 = arith.constant 6.400000e+01 : f32
    %325 = vector.broadcast %cst_107 : f32 to vector<8x1xf32>
    %326 = arith.divf %324, %325 : vector<8x1xf32>
    %327 = vector.broadcast %326 : vector<8x1xf32> to vector<8x64xf32>
    %328 = arith.subf %320, %327 : vector<8x64xf32>
    %329 = arith.mulf %328, %328 : vector<8x64xf32>
    %cst_108 = arith.constant dense<0.000000e+00> : vector<8xf32>
    %330 = vector.multi_reduction <add>, %329, %cst_108 [1] : vector<8x64xf32> to vector<8xf32>
    %331 = vector.shape_cast %330 : vector<8xf32> to vector<8x1xf32>
    %cst_109 = arith.constant 6.400000e+01 : f32
    %332 = vector.broadcast %cst_109 : f32 to vector<8x1xf32>
    %333 = arith.divf %331, %332 : vector<8x1xf32>
    %334 = vector.broadcast %326 : vector<8x1xf32> to vector<8x64xf32>
    %335 = arith.subf %320, %334 : vector<8x64xf32>
    %cst_110 = arith.constant 9.99999974E-6 : f32
    %336 = vector.broadcast %cst_110 : f32 to vector<8x1xf32>
    %337 = arith.addf %333, %336 : vector<8x1xf32>
    %338 = math.rsqrt %337 : vector<8x1xf32>
    %339 = vector.broadcast %338 : vector<8x1xf32> to vector<8x64xf32>
    %340 = arith.mulf %335, %339 : vector<8x64xf32>
    %341 = vector.broadcast %321 : vector<1x64xf32> to vector<8x64xf32>
    %342 = arith.mulf %340, %341 : vector<8x64xf32>
    %343 = vector.broadcast %322 : vector<1x64xf32> to vector<8x64xf32>
    %344 = arith.addf %342, %343 : vector<8x64xf32>
    %cst_111 = arith.constant 0.000000e+00 : f32
    %345 = vector.broadcast %cst_111 : f32 to vector<8x64xf32>
    %346 = arith.maximumf %344, %345 : vector<8x64xf32>
    %c0_112 = arith.constant 0 : index
    %c0_113 = arith.constant 0 : index
    %347 = vector.load %arg9[%c0_112, %c0_113] : memref<192x128xf32, #tpu.memory_space<vmem>>, vector<192x128xf32>
    %348 = vector.extract_strided_slice %347 {offsets = [0, 0], sizes = [64, 128], strides = [1, 1]} : vector<192x128xf32> to vector<64x128xf32>
    %cst_114 = arith.constant dense<0.000000e+00> : vector<8x128xf32>
    %349 = tpu.matmul %246, %348, %cst_114 {dimension_numbers = #tpu.dot_dimension_numbers<[1], [0], [0], [1], [0, 0, 1, 1], [], []>} : vector<8x64xf32>, vector<64x128xf32>, vector<8x128xf32> -> vector<8x128xf32>
    %350 = vector.extract_strided_slice %347 {offsets = [64, 0], sizes = [64, 128], strides = [1, 1]} : vector<192x128xf32> to vector<64x128xf32>
    %cst_115 = arith.constant dense<0.000000e+00> : vector<8x128xf32>
    %351 = tpu.matmul %296, %350, %cst_115 {dimension_numbers = #tpu.dot_dimension_numbers<[1], [0], [0], [1], [0, 0, 1, 1], [], []>} : vector<8x64xf32>, vector<64x128xf32>, vector<8x128xf32> -> vector<8x128xf32>
    %352 = arith.addf %349, %351 : vector<8x128xf32>
    %353 = vector.extract_strided_slice %347 {offsets = [128, 0], sizes = [64, 128], strides = [1, 1]} : vector<192x128xf32> to vector<64x128xf32>
    %cst_116 = arith.constant dense<0.000000e+00> : vector<8x128xf32>
    %354 = tpu.matmul %346, %353, %cst_116 {dimension_numbers = #tpu.dot_dimension_numbers<[1], [0], [0], [1], [0, 0, 1, 1], [], []>} : vector<8x64xf32>, vector<64x128xf32>, vector<8x128xf32> -> vector<8x128xf32>
    %355 = arith.addf %352, %354 : vector<8x128xf32>
    %356 = vector.extract_strided_slice %355 {offsets = [0, 0], sizes = [8, 64], strides = [1, 1]} : vector<8x128xf32> to vector<8x64xf32>
    %357 = vector.extract_strided_slice %0 {offsets = [36, 0], sizes = [1, 64], strides = [1, 1]} : vector<50x64xf32> to vector<1x64xf32>
    %358 = vector.broadcast %357 : vector<1x64xf32> to vector<8x64xf32>
    %359 = arith.addf %356, %358 : vector<8x64xf32>
    %360 = vector.extract_strided_slice %0 {offsets = [37, 0], sizes = [1, 64], strides = [1, 1]} : vector<50x64xf32> to vector<1x64xf32>
    %361 = vector.extract_strided_slice %0 {offsets = [38, 0], sizes = [1, 64], strides = [1, 1]} : vector<50x64xf32> to vector<1x64xf32>
    %cst_117 = arith.constant dense<0.000000e+00> : vector<8xf32>
    %362 = vector.multi_reduction <add>, %359, %cst_117 [1] : vector<8x64xf32> to vector<8xf32>
    %363 = vector.shape_cast %362 : vector<8xf32> to vector<8x1xf32>
    %cst_118 = arith.constant 6.400000e+01 : f32
    %364 = vector.broadcast %cst_118 : f32 to vector<8x1xf32>
    %365 = arith.divf %363, %364 : vector<8x1xf32>
    %366 = vector.broadcast %365 : vector<8x1xf32> to vector<8x64xf32>
    %367 = arith.subf %359, %366 : vector<8x64xf32>
    %368 = arith.mulf %367, %367 : vector<8x64xf32>
    %cst_119 = arith.constant dense<0.000000e+00> : vector<8xf32>
    %369 = vector.multi_reduction <add>, %368, %cst_119 [1] : vector<8x64xf32> to vector<8xf32>
    %370 = vector.shape_cast %369 : vector<8xf32> to vector<8x1xf32>
    %cst_120 = arith.constant 6.400000e+01 : f32
    %371 = vector.broadcast %cst_120 : f32 to vector<8x1xf32>
    %372 = arith.divf %370, %371 : vector<8x1xf32>
    %373 = vector.broadcast %365 : vector<8x1xf32> to vector<8x64xf32>
    %374 = arith.subf %359, %373 : vector<8x64xf32>
    %cst_121 = arith.constant 9.99999974E-6 : f32
    %375 = vector.broadcast %cst_121 : f32 to vector<8x1xf32>
    %376 = arith.addf %372, %375 : vector<8x1xf32>
    %377 = math.rsqrt %376 : vector<8x1xf32>
    %378 = vector.broadcast %377 : vector<8x1xf32> to vector<8x64xf32>
    %379 = arith.mulf %374, %378 : vector<8x64xf32>
    %380 = vector.broadcast %360 : vector<1x64xf32> to vector<8x64xf32>
    %381 = arith.mulf %379, %380 : vector<8x64xf32>
    %382 = vector.broadcast %361 : vector<1x64xf32> to vector<8x64xf32>
    %383 = arith.addf %381, %382 : vector<8x64xf32>
    %384 = math.tanh %383 : vector<8x64xf32>
    %385 = vector.extract_strided_slice %355 {offsets = [0, 64], sizes = [8, 64], strides = [1, 1]} : vector<8x128xf32> to vector<8x64xf32>
    %386 = vector.extract_strided_slice %0 {offsets = [39, 0], sizes = [1, 64], strides = [1, 1]} : vector<50x64xf32> to vector<1x64xf32>
    %387 = vector.broadcast %386 : vector<1x64xf32> to vector<8x64xf32>
    %388 = arith.addf %385, %387 : vector<8x64xf32>
    %389 = vector.extract_strided_slice %0 {offsets = [40, 0], sizes = [1, 64], strides = [1, 1]} : vector<50x64xf32> to vector<1x64xf32>
    %390 = vector.extract_strided_slice %0 {offsets = [41, 0], sizes = [1, 64], strides = [1, 1]} : vector<50x64xf32> to vector<1x64xf32>
    %cst_122 = arith.constant dense<0.000000e+00> : vector<8xf32>
    %391 = vector.multi_reduction <add>, %388, %cst_122 [1] : vector<8x64xf32> to vector<8xf32>
    %392 = vector.shape_cast %391 : vector<8xf32> to vector<8x1xf32>
    %cst_123 = arith.constant 6.400000e+01 : f32
    %393 = vector.broadcast %cst_123 : f32 to vector<8x1xf32>
    %394 = arith.divf %392, %393 : vector<8x1xf32>
    %395 = vector.broadcast %394 : vector<8x1xf32> to vector<8x64xf32>
    %396 = arith.subf %388, %395 : vector<8x64xf32>
    %397 = arith.mulf %396, %396 : vector<8x64xf32>
    %cst_124 = arith.constant dense<0.000000e+00> : vector<8xf32>
    %398 = vector.multi_reduction <add>, %397, %cst_124 [1] : vector<8x64xf32> to vector<8xf32>
    %399 = vector.shape_cast %398 : vector<8xf32> to vector<8x1xf32>
    %cst_125 = arith.constant 6.400000e+01 : f32
    %400 = vector.broadcast %cst_125 : f32 to vector<8x1xf32>
    %401 = arith.divf %399, %400 : vector<8x1xf32>
    %402 = vector.broadcast %394 : vector<8x1xf32> to vector<8x64xf32>
    %403 = arith.subf %388, %402 : vector<8x64xf32>
    %cst_126 = arith.constant 9.99999974E-6 : f32
    %404 = vector.broadcast %cst_126 : f32 to vector<8x1xf32>
    %405 = arith.addf %401, %404 : vector<8x1xf32>
    %406 = math.rsqrt %405 : vector<8x1xf32>
    %407 = vector.broadcast %406 : vector<8x1xf32> to vector<8x64xf32>
    %408 = arith.mulf %403, %407 : vector<8x64xf32>
    %409 = vector.broadcast %389 : vector<1x64xf32> to vector<8x64xf32>
    %410 = arith.mulf %408, %409 : vector<8x64xf32>
    %411 = vector.broadcast %390 : vector<1x64xf32> to vector<8x64xf32>
    %412 = arith.addf %410, %411 : vector<8x64xf32>
    %413 = arith.negf %412 : vector<8x64xf32>
    %414 = math.exp %413 : vector<8x64xf32>
    %cst_127 = arith.constant 1.000000e+00 : f32
    %415 = vector.broadcast %cst_127 : f32 to vector<8x64xf32>
    %416 = arith.addf %415, %414 : vector<8x64xf32>
    %417 = arith.divf %415, %416 : vector<8x64xf32>
    %c0_128 = arith.constant 0 : index
    %c0_129 = arith.constant 0 : index
    %418 = vector.load %arg10[%c0_128, %c0_129] : memref<64x128xf32, #tpu.memory_space<vmem>>, vector<64x128xf32>
    %cst_130 = arith.constant dense<0.000000e+00> : vector<8x128xf32>
    %419 = tpu.matmul %384, %418, %cst_130 {dimension_numbers = #tpu.dot_dimension_numbers<[1], [0], [0], [1], [0, 0, 1, 1], [], []>} : vector<8x64xf32>, vector<64x128xf32>, vector<8x128xf32> -> vector<8x128xf32>
    %c0_131 = arith.constant 0 : index
    %c0_132 = arith.constant 0 : index
    %420 = vector.load %arg11[%c0_131, %c0_132] : memref<1x128xf32, #tpu.memory_space<vmem>>, vector<1x128xf32>
    %421 = vector.broadcast %420 : vector<1x128xf32> to vector<8x128xf32>
    %422 = arith.addf %419, %421 : vector<8x128xf32>
    %cst_133 = arith.constant dense<0xFF800000> : vector<8xf32>
    %423 = vector.multi_reduction <maximumf>, %422, %cst_133 [1] : vector<8x128xf32> to vector<8xf32>
    %424 = vector.shape_cast %423 : vector<8xf32> to vector<8x1xf32>
    %425 = vector.broadcast %424 : vector<8x1xf32> to vector<8x128xf32>
    %426 = arith.subf %422, %425 : vector<8x128xf32>
    %427 = math.exp %426 : vector<8x128xf32>
    %cst_134 = arith.constant dense<0.000000e+00> : vector<8xf32>
    %428 = vector.multi_reduction <add>, %427, %cst_134 [1] : vector<8x128xf32> to vector<8xf32>
    %429 = vector.shape_cast %428 : vector<8xf32> to vector<8x1xf32>
    %430 = tpu.reciprocal %429 : vector<8x1xf32> -> vector<8x1xf32>
    %431 = vector.broadcast %430 : vector<8x1xf32> to vector<8x128xf32>
    %432 = arith.mulf %427, %431 : vector<8x128xf32>
    %433 = vector.extract_strided_slice %432 {offsets = [0, 0], sizes = [8, 1], strides = [1, 1]} : vector<8x128xf32> to vector<8x1xf32>
    %434 = vector.broadcast %433 : vector<8x1xf32> to vector<8x64xf32>
    %435 = arith.mulf %246, %434 : vector<8x64xf32>
    %436 = vector.extract_strided_slice %432 {offsets = [0, 1], sizes = [8, 1], strides = [1, 1]} : vector<8x128xf32> to vector<8x1xf32>
    %437 = vector.broadcast %436 : vector<8x1xf32> to vector<8x64xf32>
    %438 = arith.mulf %296, %437 : vector<8x64xf32>
    %439 = arith.addf %435, %438 : vector<8x64xf32>
    %440 = vector.extract_strided_slice %432 {offsets = [0, 2], sizes = [8, 1], strides = [1, 1]} : vector<8x128xf32> to vector<8x1xf32>
    %441 = vector.broadcast %440 : vector<8x1xf32> to vector<8x64xf32>
    %442 = arith.mulf %346, %441 : vector<8x64xf32>
    %443 = arith.addf %439, %442 : vector<8x64xf32>
    %444 = arith.mulf %443, %417 : vector<8x64xf32>
    %c0_135 = arith.constant 0 : index
    %c0_136 = arith.constant 0 : index
    %445 = vector.load %arg12[%c0_135, %c0_136] : memref<256x64xf32, #tpu.memory_space<vmem>>, vector<256x64xf32>
    %446 = vector.extract_strided_slice %445 {offsets = [0, 0], sizes = [64, 64], strides = [1, 1]} : vector<256x64xf32> to vector<64x64xf32>
    %cst_137 = arith.constant dense<0.000000e+00> : vector<8x64xf32>
    %447 = tpu.matmul %444, %446, %cst_137 {dimension_numbers = #tpu.dot_dimension_numbers<[1], [0], [0], [1], [0, 0, 1, 1], [], []>} : vector<8x64xf32>, vector<64x64xf32>, vector<8x64xf32> -> vector<8x64xf32>
    %448 = vector.extract_strided_slice %445 {offsets = [64, 0], sizes = [64, 64], strides = [1, 1]} : vector<256x64xf32> to vector<64x64xf32>
    %cst_138 = arith.constant dense<0.000000e+00> : vector<8x64xf32>
    %449 = tpu.matmul %246, %448, %cst_138 {dimension_numbers = #tpu.dot_dimension_numbers<[1], [0], [0], [1], [0, 0, 1, 1], [], []>} : vector<8x64xf32>, vector<64x64xf32>, vector<8x64xf32> -> vector<8x64xf32>
    %450 = arith.addf %447, %449 : vector<8x64xf32>
    %451 = vector.extract_strided_slice %445 {offsets = [128, 0], sizes = [64, 64], strides = [1, 1]} : vector<256x64xf32> to vector<64x64xf32>
    %cst_139 = arith.constant dense<0.000000e+00> : vector<8x64xf32>
    %452 = tpu.matmul %296, %451, %cst_139 {dimension_numbers = #tpu.dot_dimension_numbers<[1], [0], [0], [1], [0, 0, 1, 1], [], []>} : vector<8x64xf32>, vector<64x64xf32>, vector<8x64xf32> -> vector<8x64xf32>
    %453 = arith.addf %450, %452 : vector<8x64xf32>
    %454 = vector.extract_strided_slice %445 {offsets = [192, 0], sizes = [64, 64], strides = [1, 1]} : vector<256x64xf32> to vector<64x64xf32>
    %cst_140 = arith.constant dense<0.000000e+00> : vector<8x64xf32>
    %455 = tpu.matmul %346, %454, %cst_140 {dimension_numbers = #tpu.dot_dimension_numbers<[1], [0], [0], [1], [0, 0, 1, 1], [], []>} : vector<8x64xf32>, vector<64x64xf32>, vector<8x64xf32> -> vector<8x64xf32>
    %456 = arith.addf %453, %455 : vector<8x64xf32>
    %457 = vector.extract_strided_slice %0 {offsets = [42, 0], sizes = [1, 64], strides = [1, 1]} : vector<50x64xf32> to vector<1x64xf32>
    %458 = vector.broadcast %457 : vector<1x64xf32> to vector<8x64xf32>
    %459 = arith.addf %456, %458 : vector<8x64xf32>
    %460 = vector.extract_strided_slice %0 {offsets = [43, 0], sizes = [1, 64], strides = [1, 1]} : vector<50x64xf32> to vector<1x64xf32>
    %461 = vector.extract_strided_slice %0 {offsets = [44, 0], sizes = [1, 64], strides = [1, 1]} : vector<50x64xf32> to vector<1x64xf32>
    %cst_141 = arith.constant dense<0.000000e+00> : vector<8xf32>
    %462 = vector.multi_reduction <add>, %459, %cst_141 [1] : vector<8x64xf32> to vector<8xf32>
    %463 = vector.shape_cast %462 : vector<8xf32> to vector<8x1xf32>
    %cst_142 = arith.constant 6.400000e+01 : f32
    %464 = vector.broadcast %cst_142 : f32 to vector<8x1xf32>
    %465 = arith.divf %463, %464 : vector<8x1xf32>
    %466 = vector.broadcast %465 : vector<8x1xf32> to vector<8x64xf32>
    %467 = arith.subf %459, %466 : vector<8x64xf32>
    %468 = arith.mulf %467, %467 : vector<8x64xf32>
    %cst_143 = arith.constant dense<0.000000e+00> : vector<8xf32>
    %469 = vector.multi_reduction <add>, %468, %cst_143 [1] : vector<8x64xf32> to vector<8xf32>
    %470 = vector.shape_cast %469 : vector<8xf32> to vector<8x1xf32>
    %cst_144 = arith.constant 6.400000e+01 : f32
    %471 = vector.broadcast %cst_144 : f32 to vector<8x1xf32>
    %472 = arith.divf %470, %471 : vector<8x1xf32>
    %473 = vector.broadcast %465 : vector<8x1xf32> to vector<8x64xf32>
    %474 = arith.subf %459, %473 : vector<8x64xf32>
    %cst_145 = arith.constant 9.99999974E-6 : f32
    %475 = vector.broadcast %cst_145 : f32 to vector<8x1xf32>
    %476 = arith.addf %472, %475 : vector<8x1xf32>
    %477 = math.rsqrt %476 : vector<8x1xf32>
    %478 = vector.broadcast %477 : vector<8x1xf32> to vector<8x64xf32>
    %479 = arith.mulf %474, %478 : vector<8x64xf32>
    %480 = vector.broadcast %460 : vector<1x64xf32> to vector<8x64xf32>
    %481 = arith.mulf %479, %480 : vector<8x64xf32>
    %482 = vector.broadcast %461 : vector<1x64xf32> to vector<8x64xf32>
    %483 = arith.addf %481, %482 : vector<8x64xf32>
    %cst_146 = arith.constant 0.000000e+00 : f32
    %484 = vector.broadcast %cst_146 : f32 to vector<8x64xf32>
    %485 = arith.maximumf %483, %484 : vector<8x64xf32>
    %c0_147 = arith.constant 0 : index
    %c0_148 = arith.constant 0 : index
    %486 = vector.load %arg13[%c0_147, %c0_148] : memref<64x64xf32, #tpu.memory_space<vmem>>, vector<64x64xf32>
    %cst_149 = arith.constant dense<0.000000e+00> : vector<8x64xf32>
    %487 = tpu.matmul %485, %486, %cst_149 {dimension_numbers = #tpu.dot_dimension_numbers<[1], [0], [0], [1], [0, 0, 1, 1], [], []>} : vector<8x64xf32>, vector<64x64xf32>, vector<8x64xf32> -> vector<8x64xf32>
    %488 = vector.extract_strided_slice %0 {offsets = [45, 0], sizes = [1, 64], strides = [1, 1]} : vector<50x64xf32> to vector<1x64xf32>
    %489 = vector.broadcast %488 : vector<1x64xf32> to vector<8x64xf32>
    %490 = arith.addf %487, %489 : vector<8x64xf32>
    %491 = vector.extract_strided_slice %0 {offsets = [46, 0], sizes = [1, 64], strides = [1, 1]} : vector<50x64xf32> to vector<1x64xf32>
    %492 = vector.extract_strided_slice %0 {offsets = [47, 0], sizes = [1, 64], strides = [1, 1]} : vector<50x64xf32> to vector<1x64xf32>
    %cst_150 = arith.constant dense<0.000000e+00> : vector<8xf32>
    %493 = vector.multi_reduction <add>, %490, %cst_150 [1] : vector<8x64xf32> to vector<8xf32>
    %494 = vector.shape_cast %493 : vector<8xf32> to vector<8x1xf32>
    %cst_151 = arith.constant 6.400000e+01 : f32
    %495 = vector.broadcast %cst_151 : f32 to vector<8x1xf32>
    %496 = arith.divf %494, %495 : vector<8x1xf32>
    %497 = vector.broadcast %496 : vector<8x1xf32> to vector<8x64xf32>
    %498 = arith.subf %490, %497 : vector<8x64xf32>
    %499 = arith.mulf %498, %498 : vector<8x64xf32>
    %cst_152 = arith.constant dense<0.000000e+00> : vector<8xf32>
    %500 = vector.multi_reduction <add>, %499, %cst_152 [1] : vector<8x64xf32> to vector<8xf32>
    %501 = vector.shape_cast %500 : vector<8xf32> to vector<8x1xf32>
    %cst_153 = arith.constant 6.400000e+01 : f32
    %502 = vector.broadcast %cst_153 : f32 to vector<8x1xf32>
    %503 = arith.divf %501, %502 : vector<8x1xf32>
    %504 = vector.broadcast %496 : vector<8x1xf32> to vector<8x64xf32>
    %505 = arith.subf %490, %504 : vector<8x64xf32>
    %cst_154 = arith.constant 9.99999974E-6 : f32
    %506 = vector.broadcast %cst_154 : f32 to vector<8x1xf32>
    %507 = arith.addf %503, %506 : vector<8x1xf32>
    %508 = math.rsqrt %507 : vector<8x1xf32>
    %509 = vector.broadcast %508 : vector<8x1xf32> to vector<8x64xf32>
    %510 = arith.mulf %505, %509 : vector<8x64xf32>
    %511 = vector.broadcast %491 : vector<1x64xf32> to vector<8x64xf32>
    %512 = arith.mulf %510, %511 : vector<8x64xf32>
    %513 = vector.broadcast %492 : vector<1x64xf32> to vector<8x64xf32>
    %514 = arith.addf %512, %513 : vector<8x64xf32>
    %515 = arith.addf %514, %443 : vector<8x64xf32>
    %516 = vector.extract_strided_slice %0 {offsets = [48, 0], sizes = [1, 64], strides = [1, 1]} : vector<50x64xf32> to vector<1x64xf32>
    %517 = vector.extract_strided_slice %0 {offsets = [49, 0], sizes = [1, 64], strides = [1, 1]} : vector<50x64xf32> to vector<1x64xf32>
    %cst_155 = arith.constant dense<0.000000e+00> : vector<8xf32>
    %518 = vector.multi_reduction <add>, %515, %cst_155 [1] : vector<8x64xf32> to vector<8xf32>
    %519 = vector.shape_cast %518 : vector<8xf32> to vector<8x1xf32>
    %cst_156 = arith.constant 6.400000e+01 : f32
    %520 = vector.broadcast %cst_156 : f32 to vector<8x1xf32>
    %521 = arith.divf %519, %520 : vector<8x1xf32>
    %522 = vector.broadcast %521 : vector<8x1xf32> to vector<8x64xf32>
    %523 = arith.subf %515, %522 : vector<8x64xf32>
    %524 = arith.mulf %523, %523 : vector<8x64xf32>
    %cst_157 = arith.constant dense<0.000000e+00> : vector<8xf32>
    %525 = vector.multi_reduction <add>, %524, %cst_157 [1] : vector<8x64xf32> to vector<8xf32>
    %526 = vector.shape_cast %525 : vector<8xf32> to vector<8x1xf32>
    %cst_158 = arith.constant 6.400000e+01 : f32
    %527 = vector.broadcast %cst_158 : f32 to vector<8x1xf32>
    %528 = arith.divf %526, %527 : vector<8x1xf32>
    %529 = vector.broadcast %521 : vector<8x1xf32> to vector<8x64xf32>
    %530 = arith.subf %515, %529 : vector<8x64xf32>
    %cst_159 = arith.constant 9.99999974E-6 : f32
    %531 = vector.broadcast %cst_159 : f32 to vector<8x1xf32>
    %532 = arith.addf %528, %531 : vector<8x1xf32>
    %533 = math.rsqrt %532 : vector<8x1xf32>
    %534 = vector.broadcast %533 : vector<8x1xf32> to vector<8x64xf32>
    %535 = arith.mulf %530, %534 : vector<8x64xf32>
    %536 = vector.broadcast %516 : vector<1x64xf32> to vector<8x64xf32>
    %537 = arith.mulf %535, %536 : vector<8x64xf32>
    %538 = vector.broadcast %517 : vector<1x64xf32> to vector<8x64xf32>
    %539 = arith.addf %537, %538 : vector<8x64xf32>
    %c0_160 = arith.constant 0 : index
    %c0_161 = arith.constant 0 : index
    %540 = vector.load %arg15[%c0_160, %c0_161] : memref<8x64xf32, #tpu.memory_space<vmem>>, vector<8x64xf32>
    tpu.vector_store %arg15[%c0_160, %c0_161], %539 {strides = array<i32>} : memref<8x64xf32, #tpu.memory_space<vmem>>, vector<8x64xf32>,
    %c0_162 = arith.constant 0 : index
    %c0_163 = arith.constant 0 : index
    %541 = vector.load %arg16[%c0_162, %c0_163] : memref<8x128xf32, #tpu.memory_space<vmem>>, vector<8x128xf32>
    tpu.vector_store %arg16[%c0_162, %c0_163], %432 {strides = array<i32>} : memref<8x128xf32, #tpu.memory_space<vmem>>, vector<8x128xf32>,
    return
  }
}

</mosaic_0001>

<bundles_post_ra>
// kernel: tpu_custom_call.1
= control target key start
LH: loop header
LB: loop body
LE: loop exit
PB: predicated region body
PF: predicated region fallthrough
CT: control target
= control target key end

     0   :  { %s5629_s0 = inlined_call_operand.vmem [shape: f32[8,32], index: 0, kind: input, shape index: {}]   ;;  %s5630_s1 = inlined_call_operand.vmem [shape: f32[8,64], index: 1, kind: input, shape index: {}]   ;;  %s5631_s2 = inlined_call_operand.vmem [shape: f32[8,16], index: 2, kind: input, shape index: {}]   ;;  %s5632_s3 = inlined_call_operand.vmem [shape: f32[32,128], index: 3, kind: input, shape index: {}]   ;;  %s5633_s4 = inlined_call_operand.vmem [shape: f32[64,64], index: 4, kind: input, shape index: {}]   ;;  %s5634_s5 = inlined_call_operand.vmem [shape: f32[16,128], index: 5, kind: input, shape index: {}]   ;;  %s5635_s6 = inlined_call_operand.vmem [shape: f32[192,64], index: 6, kind: input, shape index: {}]   ;;  %s5636_s7 = inlined_call_operand.vmem [shape: f32[384,64], index: 7, kind: input, shape index: {}]   ;;  %s5637_s8 = inlined_call_operand.vmem [shape: f32[576,64], index: 8, kind: input, shape index: {}]   ;;  %s5638_s9 = inlined_call_operand.vmem [shape: f32[192,128], index: 9, kind: input, shape index: {}]   ;;  %s5639_s10 = inlined_call_operand.vmem [shape: f32[64,128], index: 10, kind: input, shape index: {}]   ;;  %s5640_s11 = inlined_call_operand.vmem [shape: f32[1,128], index: 11, kind: input, shape index: {}]   ;;  %s5641_s12 = inlined_call_operand.vmem [shape: f32[256,64], index: 12, kind: input, shape index: {}]   ;;  %s5642_s13 = inlined_call_operand.vmem [shape: f32[64,64], index: 13, kind: input, shape index: {}]   ;;  %s5643_s14 = inlined_call_operand.vmem [shape: f32[50,64], index: 14, kind: input, shape index: {}]   ;;  %s5644_s15 = inlined_call_operand.hbm [shape: f32[8,64], index: 15, kind: output, shape index: {0}]   ;;  %s5645_s16 = inlined_call_operand.hbm [shape: f32[8,128], index: 16, kind: output, shape index: {1}]  }
   0x1   :  { %5646 = sst [smem:[#allocation8_spill]] %s5629_s0 }
   0x2   :  { %22 = vsyncpa [#allocation3], 0  ;;  %v64_v0 = vld [vmem:[%s5632_s3] sm:$0xff]  ;;  %v65_v1 = vld [vmem:[%s5632_s3 + $0x8] sm:$0xff]  ;;  %v4320_v3 = vmov 0.0|0.0   ;;  %vm4321_vm0 = vmmov 0  }
   0x3   :  { %v295_v2 = vld [vmem:[%s5633_s4] sm:$0xff]  ;;  %3872 = vmatprep.subr.bf16.mxu1 %v4320_v3  ;;  %3890 = vmatprep.subr.bf16.mxu0 %v4320_v3  ;;  %v3873_v4 = vpack.c.bf16 %v65_v1, %v64_v0  ;;  %v296_v5 = vld [vmem:[%s5633_s4 + $0x8] sm:$0xff]  ;;  %v66_v6 = vld [vmem:[%s5632_s3 + $0x10] sm:$0xff]  ;;  %v4322_v11 = vmov 0.0  }
   0x4   :  { %v67_v7 = vld [vmem:[%s5632_s3 + $0x18] sm:$0xff]  ;;  %v3891_v8 = vpack.c.bf16 %v296_v5, %v295_v2  ;;  %v297_v9 = vld [vmem:[%s5633_s4 + $0x10] sm:$0xff]  ;;  %3330 = vmatprep.mubr.msk.f32.mxu1 %vm4321_vm0, %v4322_v11  ;;  %3368 = vmatprep.mubr.msk.f32.mxu0 %vm4321_vm0, %v4322_v11  ;;  %v299_v14 = vld [vmem:[%s5633_s4 + $0x20] sm:$0xff] }
   0x5   :  { %v298_v10 = vld [vmem:[%s5633_s4 + $0x18] sm:$0xff]  ;;  %3874 = vmatpush3.bf16.msra.mxu1 %v3873_v4  ;;  %v3876_v12 = vpack.c.bf16 %v67_v7, %v66_v6  ;;  %v300_v15 = vld [vmem:[%s5633_s4 + $0x28] sm:$0xff] }
   0x6   :  { %3892 = vmatpush3.bf16.msra.mxu0 %v3891_v8  ;;  %3875 = vmatprep.subr.bf16.mxu1 %v4320_v3  ;;  %v3894_v13 = vpack.c.bf16 %v298_v10, %v297_v9 }
   0x7   :  { %3893 = vmatprep.subr.bf16.mxu0 %v4320_v3 }
   0x8   :  { %23 = vsyncpa [#allocation5], 0  ;;  %s5647_s27 = sld [smem:[#allocation8_spill]]  ;;  %vm76_vm1 = vcmask 261120   ;;  %v3897_v17 = vpack.c.bf16 %v300_v15, %v299_v14  ;;  %v301_v18 = vld [vmem:[%s5633_s4 + $0x30] sm:$0xff]  ;;  %v302_v19 = vld [vmem:[%s5633_s4 + $0x38] sm:$0xff]  ;;  %v150_v26 = vlaneseq }
   0x9   :  { %3877 = vmatpush3.bf16.msra.mxu1 %v3876_v12  ;;  %v3900_v20 = vpack.c.bf16 %v302_v19, %v301_v18  ;;  %v513_v21 = vld [vmem:[%s5634_s5] sm:$0xff]  ;;  %v514_v22 = vld [vmem:[%s5634_s5 + $0x8] sm:$0xff]  ;;  %vm164_vm2 = vcmask 523264   ;;  %vm523_vm3 = vcmask 130048   ;;  %v70_v61 = vld [vmem:[%s5635_s6 + $0x10] sm:$0xff]  ;;  %s4323_s4 = smov 64  }
   0xa   :  { %3895 = vmatpush3.bf16.msra.mxu0 %v3894_v13  ;;  %3878 = vmatprep.subr.bf16.mxu1 %v4320_v3  ;;  %v4475_v23 = vld [vmem:[%s5630_s1] sm:$0xff]  ;;  %v3915_v24 = vpack.c.bf16 %v514_v22, %v513_v21  ;;  %v4488_v27 = vshrl.u32 %v150_v26, 7  ;;  %v4519_v49 = vld [vmem:[%s5643_s14 + $0x8] sm:$0xff]  ;;  %v71_v62 = vld [vmem:[%s5635_s6 + $0x18] sm:$0xff] }
   0xb   :  { %3896 = vmatprep.subr.bf16.mxu0 %v4320_v3  ;;  %v63_v25 = vld [vmem:[%s5631_s2] sm:$0xff]  ;;  %v69_v59 = vld [vmem:[%s5635_s6 + $0x8] sm:$0xff]  ;;  %v3882_v63 = vpack.c.bf16 %v71_v62, %v70_v61  ;;  %v74_v4 = vld [vmem:[%s5635_s6 + $0x30] sm:$0xff] }
   0xc   :  { %v4491_v28 = vsub.s32 0, %v4488_v27  ;;  %v4496_v29 = vld [vmem:[%s5643_s14] sm:$0xff]  ;;  %v4504_v34 = vsub.s32 7, %v4488_v27  ;;  %v4513_v47 = vsub.s32 6, %v4488_v27  ;;  %v73_v1 = vld [vmem:[%s5635_s6 + $0x28] sm:$0xff]  ;;  %v75_v5 = vld [vmem:[%s5635_s6 + $0x38] sm:$0xff] }
   0xd   :  { %v68_v58 = vld [vmem:[%s5635_s6] sm:$0xff]  ;;  %v3888_v6 = vpack.c.bf16 %v75_v5, %v74_v4  ;;  %v4555_v13 = vsub.s32 1, %v4488_v27  ;;  %v4558_v15 = vsub.s32 2, %v4488_v27  ;;  %v517_v62 = vld [vmem:[%s5635_s6 + $0x90] sm:$0xff] }
   0xe   :  { %v61_v16 = vld [vmem:[%s5647_s27] sm:$0xff]  ;;  %3898 = vmatpush3.bf16.msra.mxu0 %v3897_v17  ;;  %v153_v30 = vrot.slane %v4496_v29, %v4491_v28  ;;  %v314_v36 = vrot.slane %v4496_v29, %v4504_v34  ;;  %v600_v52 = vrot.slane %v4519_v49, %v4513_v47  ;;  %v3879_v60 = vpack.c.bf16 %v69_v59, %v68_v58  ;;  %v521_v5 = vld [vmem:[%s5635_s6 + $0xb0] sm:$0xff] }
   0xf   :  { %3331 = vmatmul.mubr.msk.f32.vlgmr.msra.gmra.mrb[0].mxu1 %vm76_vm1, %v61_v16  ;;  %3899 = vmatprep.subr.bf16.mxu0 %v4320_v3  ;;  %v72_v0 = vld [vmem:[%s5635_s6 + $0x20] sm:$0xff]  ;;  %v182_v18 = vrot.slane %v4496_v29, %v4555_v13  ;;  %v187_v22 = vrot.slane %v4496_v29, %v4558_v15 }
  0x10   :  { %3349 = vmatprep.mubr.msk.f32.mxu1 %vm4321_vm0, %v4322_v11  ;;  %3880 = vmatpush3.bf16.msra.mxu1 %v3879_v60  ;;  %v3885_v2 = vpack.c.bf16 %v73_v1, %v72_v0  ;;  %v303_v26 = vld [vmem:[%s5635_s6 + $0x40] sm:$0xff]  ;;  %v516_v60 = vld [vmem:[%s5635_s6 + $0x88] sm:$0xff] }
  0x11   :  { %3881 = vmatprep.subr.bf16.mxu1 %v4320_v3  ;;  %v515_v59 = vld [vmem:[%s5635_s6 + $0x80] sm:$0xff] }
  0x12   :  { %3901 = vmatpush3.bf16.msra.mxu0 %v3900_v20  ;;  %v3918_v61 = vpack.c.bf16 %v516_v60, %v515_v59  ;;  %v519_v1 = vld [vmem:[%s5635_s6 + $0xa0] sm:$0xff]  ;;  %v745_v60 = vld [vmem:[%s5636_s7 + $0x28] sm:$0xff] }
  0x13   :  { %3914 = vmatprep.subr.bf16.mxu0 %v4320_v3  ;;  %v744_v59 = vld [vmem:[%s5636_s7 + $0x20] sm:$0xff] }
  0x14   :  { %3883 = vmatpush3.bf16.msra.mxu1 %v3882_v63  ;;  %v518_v63 = vld [vmem:[%s5635_s6 + $0x98] sm:$0xff] }
  0x15   :  { %3369 = vmatmul.mubr.msk.f32.vlgmr.msra.gmra.mrb[0].mxu0 %vm164_vm2, %v4475_v23  ;;  %3884 = vmatprep.subr.bf16.mxu1 %v4320_v3  ;;  %v3921_v0 = vpack.c.bf16 %v518_v63, %v517_v62  ;;  %v746_v62 = vld [vmem:[%s5636_s7 + $0x30] sm:$0xff]  ;;  %v747_v63 = vld [vmem:[%s5636_s7 + $0x38] sm:$0xff] }
  0x16   :  { %3916 = vmatpush3.bf16.msra.mxu0 %v3915_v24  ;;  %3394 = vmatprep.mubr.msk.f32.mxu0 %vm4321_vm0, %v4322_v11 }
  0x17   :  { %3917 = vmatprep.subr.bf16.mxu0 %v4320_v3 }
  0x18   :  { %3886 = vmatpush3.bf16.msra.mxu1 %v3885_v2  ;;  %v520_v2 = vld [vmem:[%s5635_s6 + $0xa8] sm:$0xff] }
  0x19   :  { %3395 = vmatmul.mubr.msk.f32.vlgmr.msra.gmra.mrb[2].mxu0 %vm523_vm3, %v63_v25  ;;  %3887 = vmatprep.subr.bf16.mxu1 %v4320_v3  ;;  %v3924_v4 = vpack.c.bf16 %v520_v2, %v519_v1 }
  0x1a   :  { %3413 = vmatprep.mubr.msk.f32.mxu0 %vm4321_vm0, %v4322_v11  ;;  %3919 = vmatpush3.bf16.msra.mxu0 %v3918_v61  ;;  %v3936_v61 = vpack.c.bf16 %v745_v60, %v744_v59  ;;  %v926_v59 = vld [vmem:[%s5637_s8 + $0x78] sm:$0xff] }
  0x1b   :  { %3920 = vmatprep.subr.bf16.mxu0 %v4320_v3 }
  0x1c   :  { %3889 = vmatpush3.bf16.msra.mxu1 %v3888_v6  ;;  %v522_v6 = vld [vmem:[%s5635_s6 + $0xb8] sm:$0xff] }
  0x1d   :  { %3902 = vmatprep.subr.bf16.mxu1 %v4320_v3 }
  0x1e   :  { %3922 = vmatpush3.bf16.msra.mxu0 %v3921_v0  ;;  %v3939_v0 = vpack.c.bf16 %v747_v63, %v746_v62 }
  0x1f   :  { %3923 = vmatprep.subr.bf16.mxu0 %v4320_v3 }
  0x22   :  { %3925 = vmatpush3.bf16.msra.mxu0 %v3924_v4 }
  0x23   :  { %3926 = vmatprep.subr.bf16.mxu0 %v4320_v3 }
  0xe2   :  { %v4500_v31 = vpop.f32.mrb[0].mxu1 }
  0xe3   :  { %v3332_v32 = vpop.f32.mrb[1].mxu1  ;;  %v154_v33 = vadd.f32 %v153_v30, %v4500_v31  ;;  %v304_v30 = vld [vmem:[%s5635_s6 + $0x48] sm:$0xff] }
  0xe5   :  { %v165_v35 = vsel %vm164_vm2, %v154_v33, 0.0 }
  0xe6   :  { %166 = vadd.xlane.f32.xlu0 %v165_v35  ;;  %v3903_v35 = vpack.c.bf16 %v304_v30, %v303_v26 }
  0xe8   :  { %v384_v37 = vpop.f32.mrb[0].mxu0 }
  0xe9   :  { %v385_v38 = vadd.f32 %v384_v37, %v314_v36  ;;  %v3370_v39 = vpop.f32.mrb[1].mxu0  ;;  %v305_v37 = vld [vmem:[%s5635_s6 + $0x50] sm:$0xff] }
  0xeb   :  { %v388_v40 = vsel %vm164_vm2, %v385_v38, 0.0 }
  0xec   :  { %389 = vadd.xlane.f32.xlu0 %v388_v40  ;;  %v4510_v41 = vpop.f32.mrb[2].mxu0 }
  0xed   :  { %v3396_v42 = vpop.f32.mrb[3].mxu0  ;;  %v601_v54 = vadd.f32 %v600_v52, %v4510_v41  ;;  %v409_v52 = vrot.slane %v4519_v49, %v4555_v13 }
  0xef   :  { %v611_v57 = vsel %vm164_vm2, %v601_v54, 0.0 }
 0x173   :  { %v167_v43 = vpop.xlane.xlu0 %166 }
 0x174   :  { %v169_v44 = vmul.f32 0.015625, %v167_v43  ;;  %v307_v43 = vld [vmem:[%s5635_s6 + $0x60] sm:$0xff] }
 0x176   :  { %v170_v45 = vsub.f32 %v154_v33, %v169_v44  ;;  %v308_v44 = vld [vmem:[%s5635_s6 + $0x68] sm:$0xff] }
 0x178   :  { %v171_v46 = vmul.f32 %v170_v45, %v170_v45 }
 0x179   :  { %v390_v50 = vpop.xlane.xlu0 %389 }
 0x17a   :  { %v172_v48 = vsel %vm164_vm2, %v171_v46, 0.0  ;;  %v391_v51 = vmul.f32 0.015625, %v390_v50  ;;  %v3909_v46 = vpack.c.bf16 %v308_v44, %v307_v43  ;;  %v310_v50 = vld [vmem:[%s5635_s6 + $0x78] sm:$0xff] }
 0x17b   :  { %173 = vadd.xlane.f32.xlu1 %v172_v48  ;;  %v309_v48 = vld [vmem:[%s5635_s6 + $0x70] sm:$0xff] }
 0x17c   :  { %v392_v53 = vsub.f32 %v385_v38, %v391_v51  ;;  %v306_v38 = vld [vmem:[%s5635_s6 + $0x58] sm:$0xff] }
 0x17d   :  { %v3906_v40 = vpack.c.bf16 %v306_v38, %v305_v37 }
 0x17e   :  { %v393_v55 = vmul.f32 %v392_v53, %v392_v53 }
 0x180   :  { %v394_v56 = vsel %vm164_vm2, %v393_v55, 0.0  ;;  %v3912_v55 = vpack.c.bf16 %v310_v50, %v309_v48 }
 0x181   :  { %395 = vadd.xlane.f32.xlu1 %v394_v56 }
 0x185   :  { %612 = vadd.xlane.f32.xlu1 %v611_v57 }
 0x208   :  { %v174_v7 = vpop.xlane.xlu1 %173 }
 0x209   :  { %v175_v8 = vmul.f32 0.015625, %v174_v7  ;;  %v3927_v7 = vpack.c.bf16 %v522_v6, %v521_v5 }
 0x20b   :  { %v176_v9 = vadd.f32 1e-05, %v175_v8  ;;  %3928 = vmatpush3.bf16.msra.mxu0 %v3927_v7 }
 0x20c   :  { %3941 = vmatprep.subr.bf16.mxu0 %v4320_v3 }
 0x20d   :  { %4234 = vrsqrt.f32 %v176_v9 }
 0x20e   :  { %v396_v10 = vpop.xlane.xlu1 %395 }
 0x20f   :  { %v397_v12 = vmul.f32 0.015625, %v396_v10 }
 0x211   :  { %v398_v14 = vadd.f32 1e-05, %v397_v12  ;;  %v627_v12 = vrot.slane %v4519_v49, %v4504_v34 }
 0x212   :  { %v613_v16 = vpop.xlane.xlu1 %612 }
 0x213   :  { %4236 = vrsqrt.f32 %v398_v14  ;;  %v614_v17 = vmul.f32 0.015625, %v613_v16 }
 0x215   :  { %v4562_v21 = vsub.f32 %v601_v54, %v614_v17  ;;  %v4608_v54 = vld [vmem:[%s5643_s14 + $0x10] sm:$0xff] }
 0x216   :  { %v632_v17 = vrot.slane %v4608_v54, %v4491_v28  ;;  %v638_v44 = vrot.slane %v4608_v54, %v4555_v13 }
 0x217   :  { %v4235_v19 = vpop.eup %4234  ;;  %v616_v24 = vmul.f32 %v4562_v21, %v4562_v21 }
 0x218   :  { %v178_v20 = vmul.f32 %v4235_v19, %v170_v45  ;;  %v404_v45 = vrot.slane %v4519_v49, %v4491_v28 }
 0x219   :  { %v617_v32 = vsel %vm164_vm2, %v616_v24, 0.0 }
 0x21a   :  { %v183_v25 = vmul.f32 %v182_v18, %v178_v20  ;;  %618 = vadd.xlane.f32.xlu1 %v617_v32  ;;  %v415_v32 = vrot.slane %v4519_v49, %v4558_v15 }
 0x21c   :  { %v188_v33 = vadd.f32 %v187_v22, %v183_v25  ;;  %v4655_v22 = vsub.s32 3, %v4488_v27 }
 0x21d   :  { %v4237_v39 = vpop.eup %4236 }
 0x21e   :  { %v189_v36 = vmax.f32 %v188_v33, 0.0  ;;  %v400_v42 = vmul.f32 %v4237_v39, %v392_v53  ;;  %v4603_v53 = vsub.s32 4, %v4488_v27  ;;  %v193_v24 = vrot.slane %v4496_v29, %v4655_v22 }
 0x220   :  { %3350 = vmatmul.mubr.msk.f32.vlgmr.msra.gmra.mrb[2].mxu1 %vm164_vm2, %v189_v36  ;;  %v405_v51 = vmul.f32 %v404_v45, %v400_v42  ;;  %v605_v57 = vrot.slane %v4608_v54, %v4603_v53 }
 0x221   :  { %3904 = vmatpush3.bf16.msra.mxu1 %v3903_v35  ;;  %3387 = vmatprep.mubr.msk.f32.mxu1 %vm4321_vm0, %v4322_v11 }
 0x222   :  { %3905 = vmatprep.subr.bf16.mxu1 %v4320_v3  ;;  %v410_v56 = vadd.f32 %v409_v52, %v405_v51  ;;  %v740_v51 = vld [vmem:[%s5636_s7] sm:$0xff]  ;;  %v741_v52 = vld [vmem:[%s5636_s7 + $0x8] sm:$0xff] }
 0x224   :  { %v411_v58 = vmax.f32 %v410_v56, 0.0  ;;  %v742_v56 = vld [vmem:[%s5636_s7 + $0x10] sm:$0xff] }
 0x225   :  { %3907 = vmatpush3.bf16.msra.mxu1 %v3906_v40 }
 0x226   :  { %3908 = vmatprep.subr.bf16.mxu1 %v4320_v3 }
 0x229   :  { %3910 = vmatpush3.bf16.msra.mxu1 %v3909_v46 }
 0x22a   :  { %3911 = vmatprep.subr.bf16.mxu1 %v4320_v3 }
 0x22b   :  { %607 = vrot.lane.b32.xlu1 %v605_v57, %s4323_s4  ;;  %v743_v57 = vld [vmem:[%s5636_s7 + $0x18] sm:$0xff] }
 0x22d   :  { %3913 = vmatpush3.bf16.msra.mxu1 %v3912_v55  ;;  %v3930_v55 = vpack.c.bf16 %v741_v52, %v740_v51  ;;  %v922_v51 = vld [vmem:[%s5637_s8 + $0x58] sm:$0xff] }
 0x22e   :  { %3929 = vmatprep.subr.bf16.mxu1 %v4320_v3 }
 0x230   :  { %3388 = vmatmul.mubr.msk.f32.vlgmr.msra.gmra.mrb[4].mxu1 %vm164_vm2, %v411_v58  ;;  %v3933_v58 = vpack.c.bf16 %v743_v57, %v742_v56  ;;  %v924_v56 = vld [vmem:[%s5637_s8 + $0x68] sm:$0xff] }
 0x231   :  { %3432 = vmatprep.mubr.msk.f32.mxu1 %vm4321_vm0, %v4322_v11  ;;  %3931 = vmatpush3.bf16.msra.mxu1 %v3930_v55  ;;  %v923_v55 = vld [vmem:[%s5637_s8 + $0x60] sm:$0xff] }
 0x232   :  { %3932 = vmatprep.subr.bf16.mxu1 %v4320_v3  ;;  %v3960_v57 = vpack.c.bf16 %v924_v56, %v923_v55  ;;  %v1079_v56 = vld [vmem:[%s5637_s8 + $0xa0] sm:$0xff] }
 0x235   :  { %3934 = vmatpush3.bf16.msra.mxu1 %v3933_v58  ;;  %v925_v58 = vld [vmem:[%s5637_s8 + $0x70] sm:$0xff] }
 0x236   :  { %3935 = vmatprep.subr.bf16.mxu1 %v4320_v3  ;;  %v3963_v60 = vpack.c.bf16 %v926_v59, %v925_v58  ;;  %v1081_v59 = vld [vmem:[%s5637_s8 + $0xb0] sm:$0xff] }
 0x239   :  { %3937 = vmatpush3.bf16.msra.mxu1 %v3936_v61 }
 0x23a   :  { %3938 = vmatprep.subr.bf16.mxu1 %v4320_v3 }
 0x23d   :  { %3940 = vmatpush3.bf16.msra.mxu1 %v3939_v0 }
 0x23e   :  { %3953 = vmatprep.subr.bf16.mxu1 %v4320_v3 }
 0x2a7   :  { %v619_v8 = vpop.xlane.xlu1 %618 }
 0x2a8   :  { %v620_v9 = vmul.f32 0.015625, %v619_v8 }
 0x2aa   :  { %v621_v10 = vadd.f32 1e-05, %v620_v9 }
 0x2ac   :  { %4238 = vrsqrt.f32 %v621_v10  ;;  %v505_v10 = vrot.slane %v4519_v49, %v4655_v22 }
 0x2b6   :  { %v4239_v14 = vpop.eup %4238 }
 0x2b7   :  { %v623_v16 = vmul.f32 %v4239_v14, %v4562_v21 }
 0x2b9   :  { %v628_v18 = vmul.f32 %v627_v12, %v623_v16  ;;  %v510_v16 = vrot.slane %v4519_v49, %v4603_v53 }
 0x2bb   :  { %v633_v19 = vadd.f32 %v632_v17, %v628_v18 }
 0x2bd   :  { %v634_v20 = vmax.f32 %v633_v19, 0.0 }
 0x2bf   :  { %3414 = vmatmul.mubr.msk.f32.vlgmr.msra.gmra.mrb[4].mxu0 %vm164_vm2, %v634_v20  ;;  %v608_v20 = vpop.permute.xlu1 %607 }
 0x2c0   :  { %3451 = vmatprep.mubr.msk.f32.mxu0 %vm4321_vm0, %v4322_v11 }
 0x2f3   :  { %v263_v25 = vpop.f32.mrb[2].mxu1 }
 0x2f4   :  { %v4659_v26 = vadd.f32 %v263_v25, %v193_v24  ;;  %v3351_v21 = vpop.f32.mrb[3].mxu1  ;;  %v610_v24 = vadd.f32 %v608_v20, %v4510_v41  ;;  %v158_v25 = vrot.slane %v4496_v29, %v4513_v47  ;;  %v748_v41 = vld [vmem:[%s5636_s7 + $0xc0] sm:$0xff] }
 0x2f6   :  { %v267_v30 = vsel %vm164_vm2, %v4659_v26, 0.0 }
 0x2f7   :  { %268 = vadd.xlane.f32.xlu1 %v267_v30 }
 0x303   :  { %v485_v33 = vpop.f32.mrb[4].mxu1 }
 0x304   :  { %v486_v35 = vadd.f32 %v485_v33, %v415_v32  ;;  %v3389_v36 = vpop.f32.mrb[5].mxu1  ;;  %v749_v33 = vld [vmem:[%s5636_s7 + $0xc8] sm:$0xff] }
 0x305   :  { %v751_v36 = vld [vmem:[%s5636_s7 + $0xd8] sm:$0xff] }
 0x306   :  { %v489_v37 = vsel %vm164_vm2, %v486_v35, 0.0 }
 0x307   :  { %490 = vadd.xlane.f32.xlu0 %v489_v37 }
 0x384   :  { %v269_v49 = vpop.xlane.xlu1 %268 }
 0x385   :  { %v270_v21 = vmul.f32 0.015625, %v269_v49 }
 0x392   :  { %v708_v40 = vpop.f32.mrb[4].mxu0 }
 0x393   :  { %v3415_v42 = vpop.f32.mrb[5].mxu0  ;;  %v709_v46 = vadd.f32 %v708_v40, %v638_v44 }
 0x394   :  { %v491_v38 = vpop.xlane.xlu0 %490  ;;  %v754_v42 = vld [vmem:[%s5636_s7 + $0xf0] sm:$0xff] }
 0x395   :  { %v492_v39 = vmul.f32 0.015625, %v491_v38  ;;  %v712_v50 = vsel %vm164_vm2, %v709_v46, 0.0  ;;  %v752_v38 = vld [vmem:[%s5636_s7 + $0xe0] sm:$0xff] }
 0x397   :  { %v493_v43 = vsub.f32 %v486_v35, %v492_v39  ;;  %v750_v35 = vld [vmem:[%s5636_s7 + $0xd0] sm:$0xff]  ;;  %v753_v39 = vld [vmem:[%s5636_s7 + $0xe8] sm:$0xff] }
 0x398   :  { %v3945_v37 = vpack.c.bf16 %v751_v36, %v750_v35  ;;  %v3948_v40 = vpack.c.bf16 %v753_v39, %v752_v38 }
 0x399   :  { %v494_v45 = vmul.f32 %v493_v43, %v493_v43 }
 0x39b   :  { %v495_v48 = vsel %vm164_vm2, %v494_v45, 0.0  ;;  %v919_v45 = vld [vmem:[%s5637_s8 + $0x40] sm:$0xff] }
 0x39c   :  { %496 = vadd.xlane.f32.xlu0 %v495_v48  ;;  %v921_v48 = vld [vmem:[%s5637_s8 + $0x50] sm:$0xff] }
 0x39d   :  { %v3957_v52 = vpack.c.bf16 %v922_v51, %v921_v48 }
 0x3a0   :  { %713 = vadd.xlane.f32.xlu0 %v712_v50 }
 0x429   :  { %v497_v1 = vpop.xlane.xlu0 %496 }
 0x42a   :  { %v498_v2 = vmul.f32 0.015625, %v497_v1 }
 0x42c   :  { %v499_v4 = vadd.f32 1e-05, %v498_v2 }
 0x42d   :  { %v714_v5 = vpop.xlane.xlu0 %713 }
 0x42e   :  { %4240 = vrsqrt.f32 %v499_v4  ;;  %v715_v6 = vmul.f32 0.015625, %v714_v5  ;;  %v728_v4 = vrot.slane %v4608_v54, %v4558_v15 }
 0x430   :  { %v4698_v7 = vsub.f32 %v709_v46, %v715_v6  ;;  %v920_v46 = vld [vmem:[%s5637_s8 + $0x48] sm:$0xff] }
 0x431   :  { %v3954_v50 = vpack.c.bf16 %v920_v46, %v919_v45  ;;  %v1075_v45 = vld [vmem:[%s5637_s8 + $0x80] sm:$0xff]  ;;  %v1076_v46 = vld [vmem:[%s5637_s8 + $0x88] sm:$0xff] }
 0x432   :  { %v717_v8 = vmul.f32 %v4698_v7, %v4698_v7 }
 0x434   :  { %v718_v9 = vsel %vm164_vm2, %v717_v8, 0.0  ;;  %v733_v8 = vrot.slane %v4608_v54, %v4655_v22 }
 0x435   :  { %719 = vadd.xlane.f32.xlu0 %v718_v9 }
 0x438   :  { %v4241_v12 = vpop.eup %4240 }
 0x439   :  { %v501_v14 = vmul.f32 %v4241_v12, %v493_v43  ;;  %v755_v43 = vld [vmem:[%s5636_s7 + $0xf8] sm:$0xff] }
 0x43a   :  { %v3951_v44 = vpack.c.bf16 %v755_v43, %v754_v42 }
 0x43b   :  { %v506_v17 = vmul.f32 %v505_v10, %v501_v14  ;;  %v4791_v14 = vsub.s32 5, %v4488_v27  ;;  %v912_v27 = vld [vmem:[%s5637_s8 + $0x10] sm:$0xff] }
 0x43d   :  { %v511_v18 = vadd.f32 %v510_v16, %v506_v17  ;;  %v910_v16 = vld [vmem:[%s5637_s8] sm:$0xff]  ;;  %v288_v43 = vrot.slane %v4496_v29, %v4791_v14 }
 0x43f   :  { %v4708_v19 = vadd.f32 %v511_v18, %v4475_v23  ;;  %v4720_v23 = vsub.f32 %v4659_v26, %v270_v21  ;;  %v3942_v26 = vpack.c.bf16 %v749_v33, %v748_v41  ;;  %v914_v21 = vld [vmem:[%s5637_s8 + $0x20] sm:$0xff]  ;;  %v916_v41 = vld [vmem:[%s5637_s8 + $0x30] sm:$0xff]  ;;  %v917_v33 = vld [vmem:[%s5637_s8 + $0x38] sm:$0xff] }
 0x441   :  { %3433 = vmatmul.mubr.msk.f32.vlgmr.msra.gmra.mrb[6].mxu1 %vm164_vm2, %v4708_v19  ;;  %v272_v30 = vmul.f32 %v4720_v23, %v4720_v23  ;;  %3943 = vmatpush3.bf16.msra.mxu0 %v3942_v26  ;;  %v3975_v26 = vpack.c.bf16 %v917_v33, %v916_v41  ;;  %v1369_v41 = vld [vmem:[%s5637_s8 + $0x120] sm:$0xff]  ;;  %v1370_v33 = vld [vmem:[%s5637_s8 + $0x128] sm:$0xff] }
 0x442   :  { %3470 = vmatprep.mubr.msk.f32.mxu1 %vm4321_vm0, %v4322_v11  ;;  %3944 = vmatprep.subr.bf16.mxu0 %v4320_v3 }
 0x443   :  { %v273_v32 = vsel %vm164_vm2, %v272_v30, 0.0  ;;  %3955 = vmatpush3.bf16.msra.mxu1 %v3954_v50  ;;  %v915_v30 = vld [vmem:[%s5637_s8 + $0x28] sm:$0xff] }
 0x444   :  { %3956 = vmatprep.subr.bf16.mxu1 %v4320_v3 }
 0x445   :  { %3946 = vmatpush3.bf16.msra.mxu0 %v3945_v37 }
 0x446   :  { %3947 = vmatprep.subr.bf16.mxu0 %v4320_v3 }
 0x447   :  { %3958 = vmatpush3.bf16.msra.mxu1 %v3957_v52  ;;  %v1078_v52 = vld [vmem:[%s5637_s8 + $0x98] sm:$0xff] }
 0x448   :  { %3959 = vmatprep.subr.bf16.mxu1 %v4320_v3 }
 0x449   :  { %3949 = vmatpush3.bf16.msra.mxu0 %v3948_v40  ;;  %v283_v40 = vrot.slane %v4496_v29, %v4603_v53  ;;  %v1077_v29 = vld [vmem:[%s5637_s8 + $0x90] sm:$0xff] }
 0x44a   :  { %3950 = vmatprep.subr.bf16.mxu0 %v4320_v3  ;;  %v3981_v55 = vpack.c.bf16 %v1078_v52, %v1077_v29  ;;  %v1528_v29 = vld [vmem:[%s5637_s8 + $0x178] sm:$0xff] }
 0x44b   :  { %736 = vrot.lane.b32.xlu0 %v610_v24, %s4323_s4  ;;  %3961 = vmatpush3.bf16.msra.mxu1 %v3960_v57  ;;  %v1080_v57 = vld [vmem:[%s5637_s8 + $0xa8] sm:$0xff] }
 0x44c   :  { %3962 = vmatprep.subr.bf16.mxu1 %v4320_v3  ;;  %v3984_v58 = vpack.c.bf16 %v1080_v57, %v1079_v56 }
 0x44d   :  { %3952 = vmatpush3.bf16.msra.mxu0 %v3951_v44 }
 0x44e   :  { %3965 = vmatprep.subr.bf16.mxu0 %v4320_v3 }
 0x44f   :  { %160 = vrot.lane.b32.xlu0 %v158_v25, %s4323_s4  ;;  %3964 = vmatpush3.bf16.msra.mxu1 %v3963_v60  ;;  %v913_v25 = vld [vmem:[%s5637_s8 + $0x18] sm:$0xff] }
 0x450   :  { %3977 = vmatprep.subr.bf16.mxu1 %v4320_v3  ;;  %v3969_v49 = vpack.c.bf16 %v913_v25, %v912_v27  ;;  %v1082_v60 = vld [vmem:[%s5637_s8 + $0xb8] sm:$0xff]  ;;  %v1365_v27 = vld [vmem:[%s5637_s8 + $0x100] sm:$0xff]  ;;  %v1366_v25 = vld [vmem:[%s5637_s8 + $0x108] sm:$0xff] }
 0x46e   :  { %274 = vadd.xlane.f32.xlu0 %v273_v32  ;;  %v3972_v32 = vpack.c.bf16 %v915_v30, %v914_v21  ;;  %v1367_v21 = vld [vmem:[%s5637_s8 + $0x110] sm:$0xff]  ;;  %v1368_v30 = vld [vmem:[%s5637_s8 + $0x118] sm:$0xff] }
 0x4c2   :  { %v720_v61 = vpop.xlane.xlu0 %719 }
 0x4c3   :  { %v721_v62 = vmul.f32 0.015625, %v720_v61  ;;  %v3987_v61 = vpack.c.bf16 %v1082_v60, %v1081_v59 }
 0x4c5   :  { %v722_v63 = vadd.f32 1e-05, %v721_v62 }
 0x4c6   :  { %v737_v0 = vpop.permute.xlu0 %736 }
 0x4c7   :  { %4242 = vrsqrt.f32 %v722_v63 }
 0x4ca   :  { %v161_v1 = vpop.permute.xlu0 %160 }
 0x4cb   :  { %v163_v2 = vadd.f32 %v161_v1, %v4500_v31  ;;  %v759_v31 = vrot.slane %v4608_v54, %v4791_v14  ;;  %v1186_v1 = vld [vmem:[%s5636_s7 + $0x40] sm:$0xff] }
 0x4cd   :  { %291 = vrot.lane.b32.xlu1 %v163_v2, %s4323_s4  ;;  %v1187_v2 = vld [vmem:[%s5636_s7 + $0x48] sm:$0xff] }
 0x4d1   :  { %v4243_v5 = vpop.eup %4242 }
 0x4d2   :  { %v724_v6 = vmul.f32 %v4243_v5, %v4698_v7  ;;  %v911_v7 = vld [vmem:[%s5637_s8 + $0x8] sm:$0xff]  ;;  %v3990_v5 = vpack.c.bf16 %v1187_v2, %v1186_v1  ;;  %v1198_v2 = vld [vmem:[%s5636_s7 + $0x120] sm:$0xff] }
 0x4d3   :  { %v3966_v18 = vpack.c.bf16 %v911_v7, %v910_v16  ;;  %v1190_v16 = vld [vmem:[%s5636_s7 + $0x60] sm:$0xff]  ;;  %v1191_v7 = vld [vmem:[%s5636_s7 + $0x68] sm:$0xff] }
 0x4d4   :  { %v729_v9 = vmul.f32 %v728_v4, %v724_v6 }
 0x4d6   :  { %v734_v10 = vadd.f32 %v733_v8, %v729_v9  ;;  %v1188_v9 = vld [vmem:[%s5636_s7 + $0x50] sm:$0xff] }
 0x4d8   :  { %v4788_v12 = vadd.f32 %v737_v0, %v734_v10  ;;  %v836_v0 = vrot.slane %v4608_v54, %v4513_v47  ;;  %v1189_v10 = vld [vmem:[%s5636_s7 + $0x58] sm:$0xff] }
 0x4fb   :  { %v275_v35 = vpop.xlane.xlu0 %274 }
 0x4fc   :  { %v276_v36 = vmul.f32 0.015625, %v275_v35  ;;  %v4020_v35 = vpack.c.bf16 %v1370_v33, %v1369_v41  ;;  %v1360_v33 = vld [vmem:[%s5637_s8 + $0xe0] sm:$0xff] }
 0x4fe   :  { %v277_v37 = vadd.f32 1e-05, %v276_v36  ;;  %v1372_v36 = vld [vmem:[%s5637_s8 + $0x138] sm:$0xff] }
 0x500   :  { %4244 = vrsqrt.f32 %v277_v37 }
 0x50a   :  { %v4245_v38 = vpop.eup %4244 }
 0x50b   :  { %v279_v39 = vmul.f32 %v4245_v38, %v4720_v23  ;;  %v3978_v23 = vpack.c.bf16 %v1076_v46, %v1075_v45  ;;  %v1521_v38 = vld [vmem:[%s5637_s8 + $0x140] sm:$0xff] }
 0x50c   :  { %v1525_v46 = vld [vmem:[%s5637_s8 + $0x160] sm:$0xff] }
 0x50d   :  { %v284_v42 = vmul.f32 %v283_v40, %v279_v39  ;;  %v1522_v39 = vld [vmem:[%s5637_s8 + $0x148] sm:$0xff] }
 0x50e   :  { %v4038_v40 = vpack.c.bf16 %v1522_v39, %v1521_v38 }
 0x50f   :  { %v289_v44 = vadd.f32 %v288_v43, %v284_v42  ;;  %v1523_v43 = vld [vmem:[%s5637_s8 + $0x150] sm:$0xff] }
 0x514   :  { %v829_v17 = vpop.f32.mrb[6].mxu1 }
 0x515   :  { %v830_v20 = vadd.f32 %v829_v17, %v759_v31  ;;  %v3434_v24 = vpop.f32.mrb[7].mxu1  ;;  %v3993_v31 = vpack.c.bf16 %v1189_v10, %v1188_v9  ;;  %v3996_v17 = vpack.c.bf16 %v1191_v7, %v1190_v16 }
 0x517   :  { %3452 = vmatmul.mubr.msk.f32.vlgmr.msra.gmra.mrb[6].mxu0 %vm164_vm2, %v830_v20  ;;  %v1193_v20 = vld [vmem:[%s5636_s7 + $0x78] sm:$0xff] }
 0x518   :  { %3967 = vmatpush3.bf16.msra.mxu0 %v3966_v18  ;;  %3489 = vmatprep.mubr.msk.f32.mxu0 %vm4321_vm0, %v4322_v11  ;;  %v1192_v18 = vld [vmem:[%s5636_s7 + $0x70] sm:$0xff] }
 0x519   :  { %3968 = vmatprep.subr.bf16.mxu0 %v4320_v3  ;;  %v3999_v24 = vpack.c.bf16 %v1193_v20, %v1192_v18  ;;  %v1356_v20 = vld [vmem:[%s5637_s8 + $0xc0] sm:$0xff] }
 0x51c   :  { %3970 = vmatpush3.bf16.msra.mxu0 %v3969_v49  ;;  %v4014_v49 = vpack.c.bf16 %v1366_v25, %v1365_v27 }
 0x51d   :  { %3971 = vmatprep.subr.bf16.mxu0 %v4320_v3 }
 0x520   :  { %3973 = vmatpush3.bf16.msra.mxu0 %v3972_v32  ;;  %v4017_v32 = vpack.c.bf16 %v1368_v30, %v1367_v21  ;;  %v1358_v30 = vld [vmem:[%s5637_s8 + $0xd0] sm:$0xff] }
 0x521   :  { %3974 = vmatprep.subr.bf16.mxu0 %v4320_v3 }
 0x524   :  { %3976 = vmatpush3.bf16.msra.mxu0 %v3975_v26  ;;  %v1371_v26 = vld [vmem:[%s5637_s8 + $0x130] sm:$0xff] }
 0x525   :  { %3989 = vmatprep.subr.bf16.mxu0 %v4320_v3  ;;  %v4023_v37 = vpack.c.bf16 %v1372_v36, %v1371_v26  ;;  %v1362_v36 = vld [vmem:[%s5637_s8 + $0xf0] sm:$0xff] }
 0x53f   :  { %v292_v48 = vpop.permute.xlu1 %291 }
 0x540   :  { %v4837_v50 = vadd.f32 %v292_v48, %v289_v44  ;;  %v1524_v44 = vld [vmem:[%s5637_s8 + $0x158] sm:$0xff]  ;;  %v1526_v48 = vld [vmem:[%s5637_s8 + $0x168] sm:$0xff] }
 0x541   :  { %v4041_v45 = vpack.c.bf16 %v1524_v44, %v1523_v43 }
 0x542   :  { %v918_v51 = vmul.f32 %v4708_v19, %v4837_v50  ;;  %v1073_v62 = vsub.f32 %v4837_v50, %v4708_v19  ;;  %v1364_v42 = vmul.f32 %v4788_v12, %v4837_v50 }
 0x544   :  { %3471 = vmatmul.mubr.msk.f32.vlgmr.msra.gmra.mrb[8].mxu1 %vm164_vm2, %v918_v51  ;;  %v1074_v63 = vand.u32 2147483647, %v1073_v62  ;;  %v1527_v51 = vld [vmem:[%s5637_s8 + $0x170] sm:$0xff] }
 0x545   :  { %3979 = vmatpush3.bf16.msra.mxu1 %v3978_v23  ;;  %3508 = vmatprep.mubr.msk.f32.mxu1 %vm4321_vm0, %v4322_v11  ;;  %v4044_v23 = vpack.c.bf16 %v1526_v48, %v1525_v46  ;;  %v4047_v52 = vpack.c.bf16 %v1528_v29, %v1527_v51  ;;  %v1633_v46 = vld [vmem:[%s5636_s7 + $0x88] sm:$0xff] }
 0x546   :  { %3980 = vmatprep.subr.bf16.mxu1 %v4320_v3 }
 0x549   :  { %3982 = vmatpush3.bf16.msra.mxu1 %v3981_v55  ;;  %v1519_v55 = vsub.f32 %v4837_v50, %v4788_v12  ;;  %v1195_v50 = vld [vmem:[%s5636_s7 + $0x108] sm:$0xff] }
 0x54a   :  { %3983 = vmatprep.subr.bf16.mxu1 %v4320_v3 }
 0x54d   :  { %3985 = vmatpush3.bf16.msra.mxu1 %v3984_v58  ;;  %v1520_v58 = vand.u32 2147483647, %v1519_v55  ;;  %v1635_v55 = vld [vmem:[%s5636_s7 + $0x98] sm:$0xff] }
 0x54e   :  { %3986 = vmatprep.subr.bf16.mxu1 %v4320_v3 }
 0x551   :  { %3988 = vmatpush3.bf16.msra.mxu1 %v3987_v61  ;;  %v1194_v61 = vld [vmem:[%s5636_s7 + $0x100] sm:$0xff] }
 0x552   :  { %4001 = vmatprep.subr.bf16.mxu1 %v4320_v3  ;;  %v4002_v62 = vpack.c.bf16 %v1195_v50, %v1194_v61  ;;  %v1639_v61 = vld [vmem:[%s5636_s7 + $0xb8] sm:$0xff] }
 0x554   :  { %3509 = vmatmul.mubr.msk.f32.vlgmr.msra.gmra.mrb[10].mxu1 %vm164_vm2, %v1074_v63  ;;  %v1196_v63 = vld [vmem:[%s5636_s7 + $0x110] sm:$0xff] }
 0x555   :  { %3546 = vmatprep.mubr.msk.f32.mxu1 %vm4321_vm0, %v4322_v11  ;;  %4003 = vmatpush3.bf16.msra.mxu1 %v4002_v62  ;;  %v1808_v62 = vld [vmem:[%s5637_s8 + $0x1c0] sm:$0xff] }
 0x556   :  { %4004 = vmatprep.subr.bf16.mxu1 %v4320_v3 }
 0x5ea   :  { %v906_v4 = vpop.f32.mrb[6].mxu0 }
 0x5eb   :  { %v907_v6 = vadd.f32 %v906_v4, %v836_v0  ;;  %v3453_v8 = vpop.f32.mrb[7].mxu0  ;;  %v1197_v0 = vld [vmem:[%s5636_s7 + $0x118] sm:$0xff]  ;;  %v1199_v4 = vld [vmem:[%s5636_s7 + $0x128] sm:$0xff] }
 0x5ec   :  { %v4005_v1 = vpack.c.bf16 %v1197_v0, %v1196_v63  ;;  %v1201_v8 = vld [vmem:[%s5636_s7 + $0x138] sm:$0xff]  ;;  %v1809_v63 = vld [vmem:[%s5637_s8 + $0x1c8] sm:$0xff] }
 0x5ed   :  { %3490 = vmatmul.mubr.msk.f32.vlgmr.msra.gmra.mrb[8].mxu0 %vm164_vm2, %v907_v6  ;;  %v1200_v6 = vld [vmem:[%s5636_s7 + $0x130] sm:$0xff]  ;;  %v4074_v0 = vpack.c.bf16 %v1809_v63, %v1808_v62 }
 0x5ee   :  { %3991 = vmatpush3.bf16.msra.mxu0 %v3990_v5  ;;  %3527 = vmatprep.mubr.msk.f32.mxu0 %vm4321_vm0, %v4322_v11  ;;  %v4008_v5 = vpack.c.bf16 %v1199_v4, %v1198_v2  ;;  %v4011_v9 = vpack.c.bf16 %v1201_v8, %v1200_v6  ;;  %v1811_v2 = vld [vmem:[%s5637_s8 + $0x1d8] sm:$0xff]  ;;  %v1813_v6 = vld [vmem:[%s5637_s8 + $0x1e8] sm:$0xff] }
 0x5ef   :  { %3992 = vmatprep.subr.bf16.mxu0 %v4320_v3  ;;  %4006 = vmatpush3.bf16.msra.mxu1 %v4005_v1  ;;  %v1810_v1 = vld [vmem:[%s5637_s8 + $0x1d0] sm:$0xff] }
 0x5f0   :  { %4007 = vmatprep.subr.bf16.mxu1 %v4320_v3  ;;  %v4077_v4 = vpack.c.bf16 %v1811_v2, %v1810_v1  ;;  %v1800_v1 = vld [vmem:[%s5637_s8 + $0x188] sm:$0xff]  ;;  %v1801_v2 = vld [vmem:[%s5637_s8 + $0x190] sm:$0xff] }
 0x5f2   :  { %3994 = vmatpush3.bf16.msra.mxu0 %v3993_v31 }
 0x5f3   :  { %3995 = vmatprep.subr.bf16.mxu0 %v4320_v3  ;;  %4009 = vmatpush3.bf16.msra.mxu1 %v4008_v5  ;;  %v1812_v5 = vld [vmem:[%s5637_s8 + $0x1e0] sm:$0xff] }
 0x5f4   :  { %4010 = vmatprep.subr.bf16.mxu1 %v4320_v3  ;;  %v4080_v8 = vpack.c.bf16 %v1813_v6, %v1812_v5  ;;  %v1802_v5 = vld [vmem:[%s5637_s8 + $0x198] sm:$0xff] }
 0x5f5   :  { %v4089_v6 = vpack.c.bf16 %v1802_v5, %v1801_v2 }
 0x5f6   :  { %3997 = vmatpush3.bf16.msra.mxu0 %v3996_v17  ;;  %v5007_v17 = vld [vmem:[%s5643_s14 + $0x18] sm:$0xff] }
 0x5f7   :  { %3998 = vmatprep.subr.bf16.mxu0 %v4320_v3  ;;  %4012 = vmatpush3.bf16.msra.mxu1 %v4011_v9  ;;  %v1205_v18 = vrot.slane %v5007_v17, %v4558_v15  ;;  %v1282_v44 = vrot.slane %v5007_v17, %v4655_v22  ;;  %v1814_v9 = vld [vmem:[%s5637_s8 + $0x1f0] sm:$0xff] }
 0x5f8   :  { %4025 = vmatprep.subr.bf16.mxu1 %v4320_v3 }
 0x5fa   :  { %4000 = vmatpush3.bf16.msra.mxu0 %v3999_v24  ;;  %v1357_v24 = vld [vmem:[%s5637_s8 + $0xc8] sm:$0xff] }
 0x5fb   :  { %4013 = vmatprep.subr.bf16.mxu0 %v4320_v3  ;;  %v4026_v25 = vpack.c.bf16 %v1357_v24, %v1356_v20  ;;  %v1807_v24 = vmul.f32 %v4788_v12, %v4708_v19 }
 0x5fd   :  { %3528 = vmatmul.mubr.msk.f32.vlgmr.msra.gmra.mrb[10].mxu0 %vm164_vm2, %v4788_v12 }
 0x5fe   :  { %4015 = vmatpush3.bf16.msra.mxu0 %v4014_v49  ;;  %3565 = vmatprep.mubr.msk.f32.mxu0 %vm4321_vm0, %v4322_v11 }
 0x5ff   :  { %4016 = vmatprep.subr.bf16.mxu0 %v4320_v3 }
 0x602   :  { %4018 = vmatpush3.bf16.msra.mxu0 %v4017_v32  ;;  %v1359_v32 = vld [vmem:[%s5637_s8 + $0xd8] sm:$0xff] }
 0x603   :  { %4019 = vmatprep.subr.bf16.mxu0 %v4320_v3  ;;  %v4029_v41 = vpack.c.bf16 %v1359_v32, %v1358_v30  ;;  %v1969_v30 = vld [vmem:[%s5637_s8 + $0x228] sm:$0xff] }
 0x606   :  { %4021 = vmatpush3.bf16.msra.mxu0 %v4020_v35  ;;  %v1361_v35 = vld [vmem:[%s5637_s8 + $0xe8] sm:$0xff] }
 0x607   :  { %4022 = vmatprep.subr.bf16.mxu0 %v4320_v3  ;;  %v4032_v26 = vpack.c.bf16 %v1361_v35, %v1360_v33  ;;  %v1971_v33 = vld [vmem:[%s5637_s8 + $0x238] sm:$0xff] }
 0x60a   :  { %4024 = vmatpush3.bf16.msra.mxu0 %v4023_v37  ;;  %v1363_v37 = vld [vmem:[%s5637_s8 + $0xf8] sm:$0xff] }
 0x60b   :  { %4037 = vmatprep.subr.bf16.mxu0 %v4320_v3  ;;  %v4035_v38 = vpack.c.bf16 %v1363_v37, %v1362_v36  ;;  %v1640_v37 = vld [vmem:[%s5636_s7 + $0x140] sm:$0xff] }
 0x60d   :  { %3566 = vmatmul.mubr.msk.f32.vlgmr.msra.gmra.mrb[12].mxu0 %vm164_vm2, %v1364_v42 }
 0x60e   :  { %4039 = vmatpush3.bf16.msra.mxu0 %v4038_v40  ;;  %3603 = vmatprep.mubr.msk.f32.mxu0 %vm4321_vm0, %v4322_v11 }
 0x60f   :  { %4040 = vmatprep.subr.bf16.mxu0 %v4320_v3 }
 0x612   :  { %4042 = vmatpush3.bf16.msra.mxu0 %v4041_v45  ;;  %v1632_v45 = vld [vmem:[%s5636_s7 + $0x80] sm:$0xff] }
 0x613   :  { %4043 = vmatprep.subr.bf16.mxu0 %v4320_v3 }
 0x616   :  { %4045 = vmatpush3.bf16.msra.mxu0 %v4044_v23  ;;  %v4050_v23 = vpack.c.bf16 %v1633_v46, %v1632_v45  ;;  %v1645_v45 = vld [vmem:[%s5636_s7 + $0x168] sm:$0xff] }
 0x617   :  { %v996_v56 = vpop.f32.mrb[8].mxu1  ;;  %4046 = vmatprep.subr.bf16.mxu0 %v4320_v3 }
 0x618   :  { %v3472_v57 = vpop.f32.mrb[9].mxu1 }
 0x619   :  { %v1636_v57 = vld [vmem:[%s5636_s7 + $0xa0] sm:$0xff] }
 0x61a   :  { %4048 = vmatpush3.bf16.msra.mxu0 %v4047_v52  ;;  %v1634_v52 = vld [vmem:[%s5636_s7 + $0x90] sm:$0xff] }
 0x61b   :  { %4061 = vmatprep.subr.bf16.mxu0 %v4320_v3 }
 0x61d   :  { %3604 = vmatmul.mubr.msk.f32.vlgmr.msra.gmra.mrb[14].mxu0 %vm164_vm2, %v1520_v58  ;;  %v1637_v58 = vld [vmem:[%s5636_s7 + $0xa8] sm:$0xff] }
 0x61e   :  { %3641 = vmatprep.mubr.msk.f32.mxu0 %vm4321_vm0, %v4322_v11 }
 0x627   :  { %v1152_v59 = vpop.f32.mrb[10].mxu1 }
 0x628   :  { %v3510_v60 = vpop.f32.mrb[11].mxu1 }
 0x629   :  { %v1638_v60 = vld [vmem:[%s5636_s7 + $0xb0] sm:$0xff] }
 0x62a   :  { %v4059_v50 = vpack.c.bf16 %v1639_v61, %v1638_v60 }
 0x6c0   :  { %v1069_v10 = vpop.f32.mrb[8].mxu0 }
 0x6c1   :  { %v1070_v31 = vadd.f32 %v1069_v10, %v996_v56  ;;  %v3491_v16 = vpop.f32.mrb[9].mxu0  ;;  %v4053_v56 = vpack.c.bf16 %v1635_v55, %v1634_v52  ;;  %v1815_v10 = vld [vmem:[%s5637_s8 + $0x1f8] sm:$0xff] }
 0x6c2   :  { %v1964_v16 = vld [vmem:[%s5637_s8 + $0x200] sm:$0xff] }
 0x6c3   :  { %v5002_v7 = vadd.f32 %v1152_v59, %v1070_v31  ;;  %v4056_v59 = vpack.c.bf16 %v1637_v58, %v1636_v57  ;;  %v4083_v31 = vpack.c.bf16 %v1815_v10, %v1814_v9  ;;  %v1160_v58 = vrot.slane %v4608_v54, %v4504_v34  ;;  %v1804_v9 = vld [vmem:[%s5637_s8 + $0x1a8] sm:$0xff] }
 0x6c5   :  { %v1161_v61 = vadd.f32 %v1160_v58, %v5002_v7  ;;  %v1799_v7 = vld [vmem:[%s5637_s8 + $0x180] sm:$0xff] }
 0x6d0   :  { %v1275_v27 = vpop.f32.mrb[10].mxu0 }
 0x6d1   :  { %v1276_v49 = vadd.f32 %v1275_v27, %v1205_v18  ;;  %v3529_v21 = vpop.f32.mrb[11].mxu0  ;;  %v1965_v18 = vld [vmem:[%s5637_s8 + $0x208] sm:$0xff]  ;;  %v1966_v27 = vld [vmem:[%s5637_s8 + $0x210] sm:$0xff] }
 0x6d2   :  { %v4098_v20 = vpack.c.bf16 %v1965_v18, %v1964_v16  ;;  %v1968_v21 = vld [vmem:[%s5637_s8 + $0x220] sm:$0xff]  ;;  %v1805_v18 = vld [vmem:[%s5637_s8 + $0x1b0] sm:$0xff] }
 0x6d3   :  { %3547 = vmatmul.mubr.msk.f32.vlgmr.msra.gmra.mrb[12].mxu1 %vm164_vm2, %v1276_v49  ;;  %v4104_v32 = vpack.c.bf16 %v1969_v30, %v1968_v21 }
 0x6d4   :  { %4027 = vmatpush3.bf16.msra.mxu1 %v4026_v25  ;;  %3584 = vmatprep.mubr.msk.f32.mxu1 %vm4321_vm0, %v4322_v11  ;;  %v1967_v25 = vld [vmem:[%s5637_s8 + $0x218] sm:$0xff] }
 0x6d5   :  { %4028 = vmatprep.subr.bf16.mxu1 %v4320_v3  ;;  %v4101_v49 = vpack.c.bf16 %v1967_v25, %v1966_v27 }
 0x6d8   :  { %4030 = vmatpush3.bf16.msra.mxu1 %v4029_v41  ;;  %v1970_v41 = vld [vmem:[%s5637_s8 + $0x230] sm:$0xff] }
 0x6d9   :  { %4031 = vmatprep.subr.bf16.mxu1 %v4320_v3  ;;  %v4107_v35 = vpack.c.bf16 %v1971_v33, %v1970_v41 }
 0x6dc   :  { %4033 = vmatpush3.bf16.msra.mxu1 %v4032_v26  ;;  %v1962_v26 = vsub.f32 %v4708_v19, %v4788_v12  ;;  %v1642_v19 = vld [vmem:[%s5636_s7 + $0x150] sm:$0xff] }
 0x6dd   :  { %4034 = vmatprep.subr.bf16.mxu1 %v4320_v3 }
 0x6de   :  { %v1963_v36 = vand.u32 2147483647, %v1962_v26 }
 0x6e0   :  { %v5041_v39 = vpop.f32.mrb[12].mxu0  ;;  %4036 = vmatpush3.bf16.msra.mxu1 %v4035_v38  ;;  %v1641_v38 = vld [vmem:[%s5636_s7 + $0x148] sm:$0xff] }
 0x6e1   :  { %v3567_v40 = vpop.f32.mrb[13].mxu0  ;;  %4049 = vmatprep.subr.bf16.mxu1 %v4320_v3 }
 0x6e2   :  { %v4062_v40 = vpack.c.bf16 %v1641_v38, %v1640_v37  ;;  %v2083_v38 = vld [vmem:[%s5638_s9 + $0x40] sm:$0xff] }
 0x6e4   :  { %4063 = vmatpush3.bf16.msra.mxu0 %v4062_v40  ;;  %v2084_v40 = vld [vmem:[%s5638_s9 + $0x48] sm:$0xff] }
 0x6e5   :  { %4064 = vmatprep.subr.bf16.mxu0 %v4320_v3 }
 0x6f0   :  { %v5044_v42 = vpop.f32.mrb[14].mxu0 }
 0x6f1   :  { %v3605_v43 = vpop.f32.mrb[15].mxu0 }
 0x7a6   :  { %v1352_v48 = vpop.f32.mrb[12].mxu1 }
 0x7a7   :  { %v1353_v51 = vadd.f32 %v1352_v48, %v1282_v44  ;;  %v3548_v29 = vpop.f32.mrb[13].mxu1  ;;  %v1644_v44 = vld [vmem:[%s5636_s7 + $0x160] sm:$0xff]  ;;  %v1646_v48 = vld [vmem:[%s5636_s7 + $0x170] sm:$0xff] }
 0x7a8   :  { %v4068_v46 = vpack.c.bf16 %v1645_v45, %v1644_v44  ;;  %v2085_v45 = vld [vmem:[%s5638_s9 + $0x50] sm:$0xff] }
 0x7a9   :  { %3585 = vmatmul.mubr.msk.f32.vlgmr.msra.gmra.mrb[14].mxu1 %vm164_vm2, %v1353_v51 }
 0x7aa   :  { %4051 = vmatpush3.bf16.msra.mxu1 %v4050_v23  ;;  %3622 = vmatprep.mubr.msk.f32.mxu1 %vm4321_vm0, %v4322_v11  ;;  %v1647_v23 = vld [vmem:[%s5636_s7 + $0x178] sm:$0xff] }
 0x7ab   :  { %4052 = vmatprep.subr.bf16.mxu1 %v4320_v3  ;;  %v4071_v51 = vpack.c.bf16 %v1647_v23, %v1646_v48  ;;  %v2087_v23 = vld [vmem:[%s5638_s9 + $0x60] sm:$0xff] }
 0x7ae   :  { %4054 = vmatpush3.bf16.msra.mxu1 %v4053_v56  ;;  %v1606_v56 = vrot.slane %v5007_v17, %v4603_v53 }
 0x7af   :  { %4055 = vmatprep.subr.bf16.mxu1 %v4320_v3 }
 0x7b2   :  { %4057 = vmatpush3.bf16.msra.mxu1 %v4056_v59 }
 0x7b3   :  { %4058 = vmatprep.subr.bf16.mxu1 %v4320_v3 }
 0x7b6   :  { %4060 = vmatpush3.bf16.msra.mxu1 %v4059_v50  ;;  %v1162_v50 = vsel %vm164_vm2, %v1161_v61, 0.0 }
 0x7b7   :  { %4073 = vmatprep.subr.bf16.mxu1 %v4320_v3 }
 0x7b9   :  { %3623 = vmatmul.mubr.msk.f32.vlgmr.msra.gmra.mrb[16].mxu1 %vm164_vm2, %v4788_v12  ;;  %v1643_v12 = vld [vmem:[%s5636_s7 + $0x158] sm:$0xff] }
 0x7ba   :  { %4075 = vmatpush3.bf16.msra.mxu1 %v4074_v0  ;;  %3660 = vmatprep.mubr.msk.f32.mxu1 %vm4321_vm0, %v4322_v11  ;;  %v4065_v43 = vpack.c.bf16 %v1643_v12, %v1642_v19  ;;  %v4110_v12 = vpack.c.bf16 %v2084_v40, %v2083_v38 }
 0x7bb   :  { %4076 = vmatprep.subr.bf16.mxu1 %v4320_v3 }
 0x7bc   :  { %4066 = vmatpush3.bf16.msra.mxu0 %v4065_v43 }
 0x7bd   :  { %4067 = vmatprep.subr.bf16.mxu0 %v4320_v3 }
 0x7be   :  { %4078 = vmatpush3.bf16.msra.mxu1 %v4077_v4  ;;  %v4086_v4 = vpack.c.bf16 %v1800_v1, %v1799_v7  ;;  %v2075_v7 = vld [vmem:[%s5638_s9] sm:$0xff]  ;;  %v2076_v1 = vld [vmem:[%s5638_s9 + $0x8] sm:$0xff] }
 0x7bf   :  { %4079 = vmatprep.subr.bf16.mxu1 %v4320_v3 }
 0x7c0   :  { %4069 = vmatpush3.bf16.msra.mxu0 %v4068_v46  ;;  %v2086_v46 = vld [vmem:[%s5638_s9 + $0x58] sm:$0xff] }
 0x7c1   :  { %4070 = vmatprep.subr.bf16.mxu0 %v4320_v3  ;;  %v4113_v48 = vpack.c.bf16 %v2086_v46, %v2085_v45 }
 0x7c2   :  { %4081 = vmatpush3.bf16.msra.mxu1 %v4080_v8  ;;  %v1803_v8 = vld [vmem:[%s5637_s8 + $0x1a0] sm:$0xff] }
 0x7c3   :  { %4082 = vmatprep.subr.bf16.mxu1 %v4320_v3  ;;  %v4092_v10 = vpack.c.bf16 %v1804_v9, %v1803_v8  ;;  %v2078_v8 = vld [vmem:[%s5638_s9 + $0x18] sm:$0xff] }
 0x7c4   :  { %4072 = vmatpush3.bf16.msra.mxu0 %v4071_v51  ;;  %v2088_v51 = vld [vmem:[%s5638_s9 + $0x68] sm:$0xff] }
 0x7c5   :  { %4085 = vmatprep.subr.bf16.mxu0 %v4320_v3 }
 0x7c6   :  { %4084 = vmatpush3.bf16.msra.mxu1 %v4083_v31 }
 0x7c7   :  { %4097 = vmatprep.subr.bf16.mxu1 %v4320_v3 }
 0x7c9   :  { %3661 = vmatmul.mubr.msk.f32.vlgmr.msra.gmra.mrb[18].mxu1 %vm164_vm2, %v1807_v24 }
 0x7ca   :  { %4099 = vmatpush3.bf16.msra.mxu1 %v4098_v20  ;;  %3698 = vmatprep.mubr.msk.f32.mxu1 %vm4321_vm0, %v4322_v11  ;;  %v1806_v20 = vld [vmem:[%s5637_s8 + $0x1b8] sm:$0xff] }
 0x7cb   :  { %4100 = vmatprep.subr.bf16.mxu1 %v4320_v3  ;;  %v4095_v24 = vpack.c.bf16 %v1806_v20, %v1805_v18  ;;  %v2079_v18 = vld [vmem:[%s5638_s9 + $0x20] sm:$0xff]  ;;  %v2080_v20 = vld [vmem:[%s5638_s9 + $0x28] sm:$0xff] }
 0x7ce   :  { %4102 = vmatpush3.bf16.msra.mxu1 %v4101_v49 }
 0x7cf   :  { %4103 = vmatprep.subr.bf16.mxu1 %v4320_v3 }
 0x7d2   :  { %4105 = vmatpush3.bf16.msra.mxu1 %v4104_v32 }
 0x7d3   :  { %4106 = vmatprep.subr.bf16.mxu1 %v4320_v3 }
 0x7d6   :  { %4108 = vmatpush3.bf16.msra.mxu1 %v4107_v35 }
 0x7d7   :  { %4145 = vmatprep.subr.bf16.mxu1 %v4320_v3 }
 0x7d9   :  { %3699 = vmatmul.mubr.msk.f32.vlgmr.msra.gmra.mrb[20].mxu1 %vm164_vm2, %v1963_v36  ;;  %v5228_v36 = vld [vmem:[%s5643_s14 + $0x20] sm:$0xff] }
 0x7da   :  { %3774 = vmatprep.mubr.msk.f32.mxu1 %vm4321_vm0, %v4322_v11  ;;  %v1725_v37 = vrot.slane %v5228_v36, %v4491_v28 }
 0x87c   :  { %v1515_v29 = vpop.f32.mrb[14].mxu1 }
 0x87d   :  { %v1516_v52 = vadd.f32 %v1515_v29, %v5041_v39  ;;  %v3586_v55 = vpop.f32.mrb[15].mxu1  ;;  %v1651_v39 = vrot.slane %v5007_v17, %v4504_v34  ;;  %v4116_v29 = vpack.c.bf16 %v2088_v51, %v2087_v23  ;;  %v2093_v23 = vld [vmem:[%s5638_s9 + $0x90] sm:$0xff]  ;;  %v2094_v51 = vld [vmem:[%s5638_s9 + $0x98] sm:$0xff] }
 0x87e   :  { %v2090_v55 = vld [vmem:[%s5638_s9 + $0x78] sm:$0xff] }
 0x87f   :  { %v1602_v57 = vadd.f32 %v5044_v42, %v1516_v52  ;;  %v2089_v52 = vld [vmem:[%s5638_s9 + $0x70] sm:$0xff] }
 0x881   :  { %v1607_v59 = vadd.f32 %v1606_v56, %v1602_v57  ;;  %v4119_v56 = vpack.c.bf16 %v2090_v55, %v2089_v52  ;;  %v2095_v52 = vld [vmem:[%s5638_s9 + $0xa0] sm:$0xff]  ;;  %v2096_v55 = vld [vmem:[%s5638_s9 + $0xa8] sm:$0xff] }
 0x883   :  { %v1608_v60 = vsel %vm164_vm2, %v1607_v59, 0.0 }
 0x884   :  { %1609 = vadd.xlane.f32.xlu0 %v1608_v60 }
 0x888   :  { %1163 = vadd.xlane.f32.xlu0 %v1162_v50 }
 0x88c   :  { %v1718_v62 = vpop.f32.mrb[16].mxu1 }
 0x88d   :  { %v1719_v63 = vadd.f32 %v1718_v62, %v1651_v39  ;;  %v3624_v0 = vpop.f32.mrb[17].mxu1  ;;  %v1624_v39 = vrot.slane %v5007_v17, %v4791_v14 }
 0x88e   :  { %v1629_v0 = vrot.slane %v5007_v17, %v4513_v47 }
 0x88f   :  { %3642 = vmatmul.mubr.msk.f32.vlgmr.msra.gmra.mrb[16].mxu0 %vm164_vm2, %v1719_v63 }
 0x890   :  { %3679 = vmatprep.mubr.msk.f32.mxu0 %vm4321_vm0, %v4322_v11  ;;  %4087 = vmatpush3.bf16.msra.mxu0 %v4086_v4  ;;  %v4122_v4 = vpack.c.bf16 %v2076_v1, %v2075_v7  ;;  %v2538_v7 = vld [vmem:[%s5641_s12 + $0x80] sm:$0xff]  ;;  %v2539_v1 = vld [vmem:[%s5641_s12 + $0x88] sm:$0xff] }
 0x891   :  { %4088 = vmatprep.subr.bf16.mxu0 %v4320_v3 }
 0x894   :  { %4090 = vmatpush3.bf16.msra.mxu0 %v4089_v6  ;;  %v2077_v6 = vld [vmem:[%s5638_s9 + $0x10] sm:$0xff] }
 0x895   :  { %4091 = vmatprep.subr.bf16.mxu0 %v4320_v3 }
 0x898   :  { %4093 = vmatpush3.bf16.msra.mxu0 %v4092_v10  ;;  %v4125_v10 = vpack.c.bf16 %v2078_v8, %v2077_v6  ;;  %v2540_v8 = vld [vmem:[%s5641_s12 + $0x90] sm:$0xff] }
 0x899   :  { %4094 = vmatprep.subr.bf16.mxu0 %v4320_v3 }
 0x89c   :  { %v5191_v54 = vpop.f32.mrb[18].mxu1  ;;  %4096 = vmatpush3.bf16.msra.mxu0 %v4095_v24  ;;  %v1178_v24 = vrot.slane %v5007_v17, %v4491_v28 }
 0x89d   :  { %v3662_v42 = vpop.f32.mrb[19].mxu1  ;;  %4109 = vmatprep.subr.bf16.mxu0 %v4320_v3 }
 0x8ac   :  { %v5214_v31 = vpop.f32.mrb[20].mxu1 }
 0x8ad   :  { %v3700_v16 = vpop.f32.mrb[21].mxu1 }
 0x911   :  { %v1610_v27 = vpop.xlane.xlu0 %1609 }
 0x912   :  { %v1611_v25 = vmul.f32 0.015625, %v1610_v27  ;;  %v4128_v27 = vpack.c.bf16 %v2080_v20, %v2079_v18  ;;  %v2543_v18 = vld [vmem:[%s5641_s12 + $0xa8] sm:$0xff] }
 0x914   :  { %v1612_v49 = vsub.f32 %v1607_v59, %v1611_v25  ;;  %v2081_v25 = vld [vmem:[%s5638_s9 + $0x30] sm:$0xff] }
 0x915   :  { %v1164_v21 = vpop.xlane.xlu0 %1163 }
 0x916   :  { %v1165_v30 = vmul.f32 0.015625, %v1164_v21  ;;  %v1613_v32 = vmul.f32 %v1612_v49, %v1612_v49 }
 0x918   :  { %v1166_v41 = vsub.f32 %v1161_v61, %v1165_v30  ;;  %v1614_v33 = vsel %vm164_vm2, %v1613_v32, 0.0  ;;  %v1183_v30 = vrot.slane %v5007_v17, %v4555_v13 }
 0x919   :  { %1615 = vadd.xlane.f32.xlu0 %v1614_v33 }
 0x91a   :  { %v1167_v35 = vmul.f32 %v1166_v41, %v1166_v41 }
 0x91c   :  { %v1168_v26 = vsel %vm164_vm2, %v1167_v35, 0.0 }
 0x91d   :  { %1169 = vadd.xlane.f32.xlu0 %v1168_v26 }
 0x962   :  { %v1795_v19 = vpop.f32.mrb[16].mxu0 }
 0x963   :  { %v1796_v43 = vadd.f32 %v1795_v19, %v1725_v37  ;;  %v3643_v44 = vpop.f32.mrb[17].mxu0  ;;  %v2049_v37 = vrot.slane %v5228_v36, %v4555_v13 }
 0x965   :  { %3680 = vmatmul.mubr.msk.f32.vlgmr.msra.gmra.mrb[18].mxu0 %vm164_vm2, %v1796_v43 }
 0x966   :  { %4111 = vmatpush3.bf16.msra.mxu0 %v4110_v12  ;;  %3717 = vmatprep.mubr.msk.f32.mxu0 %vm4321_vm0, %v4322_v11 }
 0x967   :  { %4112 = vmatprep.subr.bf16.mxu0 %v4320_v3 }
 0x96a   :  { %4114 = vmatpush3.bf16.msra.mxu0 %v4113_v48  ;;  %v2092_v48 = vld [vmem:[%s5638_s9 + $0x88] sm:$0xff] }
 0x96b   :  { %4115 = vmatprep.subr.bf16.mxu0 %v4320_v3 }
 0x96e   :  { %4117 = vmatpush3.bf16.msra.mxu0 %v4116_v29  ;;  %v4137_v29 = vpack.c.bf16 %v2094_v51, %v2093_v23  ;;  %v2407_v23 = vld [vmem:[%s5639_s10 + $0x28] sm:$0xff] }
 0x96f   :  { %4118 = vmatprep.subr.bf16.mxu0 %v4320_v3 }
 0x972   :  { %4120 = vmatpush3.bf16.msra.mxu0 %v4119_v56  ;;  %v4140_v56 = vpack.c.bf16 %v2096_v55, %v2095_v52  ;;  %v2409_v52 = vld [vmem:[%s5639_s10 + $0x38] sm:$0xff] }
 0x973   :  { %4121 = vmatprep.subr.bf16.mxu0 %v4320_v3 }
 0x9a6   :  { %v1616_v57 = vpop.xlane.xlu0 %1615 }
 0x9a7   :  { %v1617_v58 = vmul.f32 0.015625, %v1616_v57  ;;  %v2097_v57 = vld [vmem:[%s5638_s9 + $0xb0] sm:$0xff] }
 0x9a9   :  { %v1618_v59 = vadd.f32 1e-05, %v1617_v58  ;;  %v2098_v58 = vld [vmem:[%s5638_s9 + $0xb8] sm:$0xff] }
 0x9aa   :  { %v1170_v60 = vpop.xlane.xlu0 %1169 }
 0x9ab   :  { %4246 = vrsqrt.f32 %v1618_v59  ;;  %v1171_v61 = vmul.f32 0.015625, %v1170_v60  ;;  %v4143_v59 = vpack.c.bf16 %v2098_v58, %v2097_v57 }
 0x9ad   :  { %v1172_v50 = vadd.f32 1e-05, %v1171_v61 }
 0x9af   :  { %4248 = vrsqrt.f32 %v1172_v50 }
 0x9b5   :  { %v4247_v62 = vpop.eup %4246 }
 0x9b6   :  { %v1620_v63 = vmul.f32 %v4247_v62, %v1612_v49  ;;  %v2082_v49 = vld [vmem:[%s5638_s9 + $0x38] sm:$0xff] }
 0x9b7   :  { %v4131_v32 = vpack.c.bf16 %v2082_v49, %v2081_v25  ;;  %v2322_v49 = vrot.slane %v5228_v36, %v4603_v53 }
 0x9b8   :  { %v1625_v42 = vmul.f32 %v1624_v39, %v1620_v63  ;;  %v2067_v39 = vrot.slane %v5228_v36, %v4558_v15 }
 0x9b9   :  { %v4249_v9 = vpop.eup %4248 }
 0x9ba   :  { %v1630_v2 = vadd.f32 %v1629_v0, %v1625_v42  ;;  %v1174_v16 = vmul.f32 %v4249_v9, %v1166_v41  ;;  %v2072_v0 = vrot.slane %v5228_v36, %v4655_v22  ;;  %v2541_v9 = vld [vmem:[%s5641_s12 + $0x98] sm:$0xff] }
 0x9bc   :  { %v5273_v5 = vmax.f32 %v1630_v2, 0.0  ;;  %v1179_v21 = vmul.f32 %v1178_v24, %v1174_v16  ;;  %v2542_v16 = vld [vmem:[%s5641_s12 + $0xa0] sm:$0xff]  ;;  %v2544_v24 = vld [vmem:[%s5641_s12 + $0xb0] sm:$0xff] }
 0x9bd   :  { %v4188_v20 = vpack.c.bf16 %v2543_v18, %v2542_v16  ;;  %v2536_v18 = vld [vmem:[%s5641_s12 + $0x70] sm:$0xff] }
 0x9be   :  { %3718 = vmatmul.mubr.msk.f32.vlgmr.msra.gmra.mrb[20].mxu0 %vm164_vm2, %v5273_v5  ;;  %v1184_v41 = vadd.f32 %v1183_v30, %v1179_v21 }
 0x9bf   :  { %4123 = vmatpush3.bf16.msra.mxu0 %v4122_v4  ;;  %3736 = vmatprep.mubr.msk.f32.mxu0 %vm4321_vm0, %v4322_v11  ;;  %v4182_v4 = vpack.c.bf16 %v2539_v1, %v2538_v7  ;;  %v2531_v7 = vld [vmem:[%s5641_s12 + $0x48] sm:$0xff] }
 0x9c0   :  { %4124 = vmatprep.subr.bf16.mxu0 %v4320_v3  ;;  %v5304_v33 = vmax.f32 %v1184_v41, 0.0 }
 0x9c3   :  { %4126 = vmatpush3.bf16.msra.mxu0 %v4125_v10  ;;  %v4185_v10 = vpack.c.bf16 %v2541_v9, %v2540_v8  ;;  %v2534_v9 = vld [vmem:[%s5641_s12 + $0x60] sm:$0xff] }
 0x9c4   :  { %4127 = vmatprep.subr.bf16.mxu0 %v4320_v3 }
 0x9c7   :  { %4129 = vmatpush3.bf16.msra.mxu0 %v4128_v27  ;;  %v2545_v27 = vld [vmem:[%s5641_s12 + $0xb8] sm:$0xff] }
 0x9c8   :  { %4130 = vmatprep.subr.bf16.mxu0 %v4320_v3  ;;  %v4191_v25 = vpack.c.bf16 %v2545_v27, %v2544_v24 }
 0x9cb   :  { %4132 = vmatpush3.bf16.msra.mxu0 %v4131_v32 }
 0x9cc   :  { %4133 = vmatprep.subr.bf16.mxu0 %v4320_v3 }
 0x9ce   :  { %3737 = vmatmul.mubr.msk.f32.vlgmr.msra.gmra.mrb[20].mxu0 %vm164_vm2, %v5304_v33 }
 0x9cf   :  { %3755 = vmatprep.mubr.msk.f32.mxu0 %vm4321_vm0, %v4322_v11 }
 0xa38   :  { %v1958_v35 = vpop.f32.mrb[18].mxu0 }
 0xa39   :  { %v1959_v26 = vadd.f32 %v1958_v35, %v5191_v54  ;;  %v3681_v17 = vpop.f32.mrb[19].mxu0  ;;  %v2091_v54 = vld [vmem:[%s5638_s9 + $0x80] sm:$0xff] }
 0xa3b   :  { %v2045_v38 = vadd.f32 %v5214_v31, %v1959_v26  ;;  %v4134_v31 = vpack.c.bf16 %v2092_v48, %v2091_v54  ;;  %v2405_v54 = vld [vmem:[%s5639_s10 + $0x18] sm:$0xff] }
 0xa3d   :  { %v2050_v40 = vadd.f32 %v2049_v37, %v2045_v38  ;;  %4135 = vmatpush3.bf16.msra.mxu0 %v4134_v31  ;;  %v2406_v31 = vld [vmem:[%s5639_s10 + $0x20] sm:$0xff] }
 0xa3e   :  { %4136 = vmatprep.subr.bf16.mxu0 %v4320_v3  ;;  %v4152_v51 = vpack.c.bf16 %v2407_v23, %v2406_v31  ;;  %v4324_v23 = vmov 2  }
 0xa3f   :  { %v2051_v19 = vsel %vm164_vm2, %v2050_v40, 0.0  ;;  %4232 = vset.pattern.permute.xlu1 %v4324_v23 }
 0xa40   :  { %2052 = vadd.xlane.f32.xlu1 %v2051_v19 }
 0xa41   :  { %4138 = vmatpush3.bf16.msra.mxu0 %v4137_v29  ;;  %v2408_v29 = vld [vmem:[%s5639_s10 + $0x30] sm:$0xff] }
 0xa42   :  { %4139 = vmatprep.subr.bf16.mxu0 %v4320_v3  ;;  %v4155_v55 = vpack.c.bf16 %v2409_v52, %v2408_v29  ;;  %v2522_v29 = vld [vmem:[%s5641_s12] sm:$0xff]  ;;  %v2523_v52 = vld [vmem:[%s5641_s12 + $0x8] sm:$0xff] }
 0xa45   :  { %4141 = vmatpush3.bf16.msra.mxu0 %v4140_v56 }
 0xa46   :  { %4142 = vmatprep.subr.bf16.mxu0 %v4320_v3 }
 0xa49   :  { %4144 = vmatpush3.bf16.msra.mxu0 %v4143_v59 }
 0xa4a   :  { %4181 = vmatprep.subr.bf16.mxu0 %v4320_v3 }
 0xacd   :  { %v2053_v12 = vpop.xlane.xlu1 %2052 }
 0xace   :  { %v2054_v43 = vmul.f32 0.015625, %v2053_v12  ;;  %v2351_v12 = vrot.slane %v5228_v36, %v4504_v34 }
 0xad0   :  { %v2055_v44 = vsub.f32 %v2050_v40, %v2054_v43  ;;  %v2402_v43 = vld [vmem:[%s5639_s10] sm:$0xff] }
 0xad2   :  { %v2056_v45 = vmul.f32 %v2055_v44, %v2055_v44 }
 0xad4   :  { %v2057_v46 = vsel %vm164_vm2, %v2056_v45, 0.0 }
 0xad5   :  { %2058 = vadd.xlane.f32.xlu0 %v2057_v46  ;;  %v2404_v46 = vld [vmem:[%s5639_s10 + $0x10] sm:$0xff] }
 0xad6   :  { %v4149_v48 = vpack.c.bf16 %v2405_v54, %v2404_v46 }
 0xb62   :  { %v2059_v60 = vpop.xlane.xlu0 %2058 }
 0xb63   :  { %v2060_v61 = vmul.f32 0.015625, %v2059_v60 }
 0xb65   :  { %v2061_v50 = vadd.f32 1e-05, %v2060_v61  ;;  %v2340_v61 = vrot.slane %v5228_v36, %v4791_v14 }
 0xb67   :  { %4250 = vrsqrt.f32 %v2061_v50 }
 0xb71   :  { %v4251_v62 = vpop.eup %4250 }
 0xb72   :  { %v2063_v63 = vmul.f32 %v4251_v62, %v2055_v44  ;;  %v2403_v44 = vld [vmem:[%s5639_s10 + $0x8] sm:$0xff] }
 0xb73   :  { %v4146_v45 = vpack.c.bf16 %v2403_v44, %v2402_v43 }
 0xb74   :  { %v2068_v42 = vmul.f32 %v2067_v39, %v2063_v63  ;;  %v2345_v39 = vrot.slane %v5228_v36, %v4513_v47  ;;  %v2533_v36 = vld [vmem:[%s5641_s12 + $0x58] sm:$0xff] }
 0xb75   :  { %4147 = vmatpush3.bf16.msra.mxu1 %v4146_v45 }
 0xb76   :  { %v2073_v2 = vadd.f32 %v2072_v0, %v2068_v42  ;;  %4148 = vmatprep.subr.bf16.mxu1 %v4320_v3  ;;  %v2530_v42 = vld [vmem:[%s5641_s12 + $0x40] sm:$0xff] }
 0xb77   :  { %v4158_v1 = vpack.c.bf16 %v2531_v7, %v2530_v42 }
 0xb78   :  { %v5355_v6 = vmax.f32 %v2073_v2, 0.0  ;;  %v2532_v2 = vld [vmem:[%s5641_s12 + $0x50] sm:$0xff] }
 0xb79   :  { %4150 = vmatpush3.bf16.msra.mxu1 %v4149_v48  ;;  %v4161_v8 = vpack.c.bf16 %v2533_v36, %v2532_v2  ;;  %v2525_v2 = vld [vmem:[%s5641_s12 + $0x18] sm:$0xff] }
 0xb7a   :  { %3756 = vmatmul.mubr.msk.f32.vlgmr.msra.gmra.mrb[20].mxu0 %vm164_vm2, %v5355_v6  ;;  %4151 = vmatprep.subr.bf16.mxu1 %v4320_v3 }
 0xb7b   :  { %4183 = vmatpush3.bf16.msra.mxu0 %v4182_v4  ;;  %3831 = vmatprep.mubr.msk.f32.mxu0 %vm4321_vm0, %v4322_v11 }
 0xb7c   :  { %4184 = vmatprep.subr.bf16.mxu0 %v4320_v3 }
 0xb7d   :  { %4153 = vmatpush3.bf16.msra.mxu1 %v4152_v51  ;;  %v4325_v51 = vmov 0  }
 0xb7e   :  { %4154 = vmatprep.subr.bf16.mxu1 %v4320_v3  ;;  %4230 = vset.pattern.permute.xlu0 %v4325_v51 }
 0xb7f   :  { %4186 = vmatpush3.bf16.msra.mxu0 %v4185_v10  ;;  %v2535_v10 = vld [vmem:[%s5641_s12 + $0x68] sm:$0xff] }
 0xb80   :  { %4187 = vmatprep.subr.bf16.mxu0 %v4320_v3  ;;  %v4164_v16 = vpack.c.bf16 %v2535_v10, %v2534_v9  ;;  %v4326_v9 = vmov 1  }
 0xb81   :  { %4156 = vmatpush3.bf16.msra.mxu1 %v4155_v55  ;;  %v4170_v55 = vpack.c.bf16 %v2523_v52, %v2522_v29 }
 0xb82   :  { %4157 = vmatprep.subr.bf16.mxu1 %v4320_v3 }
 0xb83   :  { %4189 = vmatpush3.bf16.msra.mxu0 %v4188_v20  ;;  %v2537_v20 = vld [vmem:[%s5641_s12 + $0x78] sm:$0xff] }
 0xb84   :  { %4190 = vmatprep.subr.bf16.mxu0 %v4320_v3  ;;  %v4167_v24 = vpack.c.bf16 %v2537_v20, %v2536_v18  ;;  %v2528_v18 = vld [vmem:[%s5641_s12 + $0x30] sm:$0xff]  ;;  %v2529_v20 = vld [vmem:[%s5641_s12 + $0x38] sm:$0xff] }
 0xb87   :  { %4192 = vmatpush3.bf16.msra.mxu0 %v4191_v25 }
 0xb88   :  { %4205 = vmatprep.subr.bf16.mxu0 %v4320_v3 }
 0xb8a   :  { %3832 = vmatmul.mubr.msk.f32.vlgmr.msra.gmra.mrb[22].mxu0 %vm164_vm2, %v5273_v5 }
 0xb8b   :  { %3869 = vmatprep.mubr.msk.f32.mxu0 %vm4321_vm0, %v4322_v11 }
 0xc4d   :  { %v2314_v21 = vpop.f32.mrb[20].mxu0 }
 0xc4e   :  { %v2323_v30 = vadd.f32 %v2322_v49, %v2314_v21  ;;  %v3757_v32 = vpop.f32.mrb[21].mxu0  ;;  %v3055_v49 = vld [vmem:[%s5640_s11] ss:$0 sm:$0xff] }
 0xc50   :  { %v2324_v41 = vsel %vm164_vm2, %v2323_v30, 0.0 }
 0xc51   :  { %2325 = vadd.xlane.f32.xlu0 %v2324_v41 }
 0xc5d   :  { %v5390_v35 = vpop.f32.mrb[22].mxu0 }
 0xc5e   :  { %v3833_v26 = vpop.f32.mrb[23].mxu0 }
 0xcde   :  { %v2326_v17 = vpop.xlane.xlu0 %2325 }
 0xcdf   :  { %v2327_v37 = vmul.f32 0.015625, %v2326_v17 }
 0xce1   :  { %v2328_v38 = vsub.f32 %v2323_v30, %v2327_v37 }
 0xce3   :  { %v2329_v40 = vmul.f32 %v2328_v38, %v2328_v38 }
 0xce5   :  { %v2330_v19 = vsel %vm164_vm2, %v2329_v40, 0.0 }
 0xce6   :  { %2331 = vadd.xlane.f32.xlu0 %v2330_v19  ;;  %v5474_v19 = vld [vmem:[%s5643_s14 + $0x28] sm:$0xff] }
 0xce7   :  { %v2381_v31 = vrot.slane %v5474_v19, %v4491_v28 }
 0xcfc   :  { %2353 = vrot.lane.b32.xlu0 %v2351_v12, %s4323_s4  ;;  %v2390_v12 = vrot.slane %v5474_v19, %v4555_v13 }
 0xd73   :  { %v2332_v56 = vpop.xlane.xlu0 %2331 }
 0xd74   :  { %v2333_v57 = vmul.f32 0.015625, %v2332_v56 }
 0xd76   :  { %v2334_v58 = vadd.f32 1e-05, %v2333_v57 }
 0xd77   :  { %v2354_v59 = vpop.permute.xlu0 %2353 }
 0xd78   :  { %4252 = vrsqrt.f32 %v2334_v58  ;;  %v2356_v60 = vadd.f32 %v2354_v59, %v2314_v21 }
 0xd7a   :  { %2358 = vrot.lane.b32.xlu1 %v2356_v60, %s4323_s4 }
 0xd82   :  { %v4253_v50 = vpop.eup %4252 }
 0xd83   :  { %v2336_v62 = vmul.f32 %v4253_v50, %v2328_v38 }
 0xd85   :  { %v2341_v63 = vmul.f32 %v2340_v61, %v2336_v62 }
 0xd87   :  { %v2346_v0 = vadd.f32 %v2345_v39, %v2341_v63 }
 0xd89   :  { %4254 = vtanh.f32 %v2346_v0 }
 0xd93   :  { %v4255_v4 = vpop.eup %4254 }
 0xd94   :  { %3775 = vmatmul.mubr.msk.f32.vlgmr.msra.gmra.mrb[22].mxu1 %vm164_vm2, %v4255_v4  ;;  %v2526_v4 = vld [vmem:[%s5641_s12 + $0x20] sm:$0xff] }
 0xd95   :  { %4159 = vmatpush3.bf16.msra.mxu1 %v4158_v1  ;;  %3793 = vmatprep.mubr.msk.f32.mxu1 %vm4321_vm0, %v4322_v11  ;;  %v2524_v1 = vld [vmem:[%s5641_s12 + $0x10] sm:$0xff] }
 0xd96   :  { %4160 = vmatprep.subr.bf16.mxu1 %v4320_v3  ;;  %v4173_v36 = vpack.c.bf16 %v2525_v2, %v2524_v1  ;;  %v2872_v2 = vld [vmem:[%s5642_s13 + $0x20] sm:$0xff] }
 0xd99   :  { %4162 = vmatpush3.bf16.msra.mxu1 %v4161_v8  ;;  %v2527_v8 = vld [vmem:[%s5641_s12 + $0x28] sm:$0xff] }
 0xd9a   :  { %4163 = vmatprep.subr.bf16.mxu1 %v4320_v3  ;;  %v4176_v10 = vpack.c.bf16 %v2527_v8, %v2526_v4  ;;  %v2874_v8 = vld [vmem:[%s5642_s13 + $0x30] sm:$0xff] }
 0xd9d   :  { %4165 = vmatpush3.bf16.msra.mxu1 %v4164_v16 }
 0xd9e   :  { %4166 = vmatprep.subr.bf16.mxu1 %v4320_v3 }
 0xda1   :  { %4168 = vmatpush3.bf16.msra.mxu1 %v4167_v24 }
 0xda2   :  { %4169 = vmatprep.subr.bf16.mxu1 %v4320_v3 }
 0xda4   :  { %3794 = vmatmul.mubr.msk.f32.vlgmr.msra.gmra.mrb[24].mxu1 %vm164_vm2, %v5304_v33 }
 0xda5   :  { %3812 = vmatprep.mubr.msk.f32.mxu1 %vm4321_vm0, %v4322_v11  ;;  %4171 = vmatpush3.bf16.msra.mxu1 %v4170_v55 }
 0xda6   :  { %4172 = vmatprep.subr.bf16.mxu1 %v4320_v3 }
 0xda9   :  { %4174 = vmatpush3.bf16.msra.mxu1 %v4173_v36  ;;  %v2873_v36 = vld [vmem:[%s5642_s13 + $0x28] sm:$0xff] }
 0xdaa   :  { %4175 = vmatprep.subr.bf16.mxu1 %v4320_v3  ;;  %v4212_v4 = vpack.c.bf16 %v2873_v36, %v2872_v2 }
 0xdad   :  { %4177 = vmatpush3.bf16.msra.mxu1 %v4176_v10 }
 0xdae   :  { %4178 = vmatprep.subr.bf16.mxu1 %v4320_v3 }
 0xdec   :  { %v2359_v27 = vpop.permute.xlu1 %2358 }
 0xded   :  { %v2361_v25 = vsel %vm164_vm2, %v2359_v27, 0.0  ;;  %v4179_v27 = vpack.c.bf16 %v2529_v20, %v2528_v18 }
 0xdee   :  { %2362 = vadd.xlane.f32.xlu0 %v2361_v25 }
 0xdef   :  { %4180 = vmatpush3.bf16.msra.mxu1 %v4179_v27 }
 0xdf0   :  { %4193 = vmatprep.subr.bf16.mxu1 %v4320_v3 }
 0xe67   :  { %v2486_v21 = vpop.f32.mrb[22].mxu1 }
 0xe68   :  { %v2487_v30 = vadd.f32 %v3055_v49, %v2486_v21  ;;  %v3776_v32 = vpop.f32.mrb[23].mxu1 }
 0xe6a   :  { %2490 = vmax.xlane.f32.xlu1 %v2487_v30 }
 0xe77   :  { %v5468_v41 = vpop.f32.mrb[24].mxu1 }
 0xe78   :  { %v3795_v26 = vpop.f32.mrb[25].mxu1 }
 0xe7b   :  { %v2363_v17 = vpop.xlane.xlu0 %2362 }
 0xe7c   :  { %v2364_v37 = vmul.f32 0.015625, %v2363_v17 }
 0xe7e   :  { %v2365_v38 = vsub.f32 %v2356_v60, %v2364_v37 }
 0xe80   :  { %v2366_v40 = vmul.f32 %v2365_v38, %v2365_v38 }
 0xe82   :  { %2368 = vrot.lane.b32.xlu0 %v2366_v40, %s4323_s4  ;;  %v2547_v40 = vld [vmem:[%s5641_s12 + $0xc8] sm:$0xff] }
 0xe86   :  { %2392 = vrot.lane.b32.xlu0 %v2390_v12, %s4323_s4 }
 0xef4   :  { %v2369_v43 = vpop.permute.xlu0 %2368 }
 0xef5   :  { %v2371_v44 = vsel %vm164_vm2, %v2369_v43, 0.0 }
 0xef6   :  { %2372 = vadd.xlane.f32.xlu1 %v2371_v44 }
 0xef7   :  { %v2491_v45 = vpop.xlane.xlu1 %2490 }
 0xef8   :  { %v2492_v46 = vsub.f32 %v2487_v30, %v2491_v45  ;;  %v2393_v39 = vpop.permute.xlu0 %2392 }
 0xefa   :  { %v2493_v54 = vmul.f32 1.442695, %v2492_v46 }
 0xefc   :  { %4256 = vpow2.f32 %v2493_v54  ;;  %v2550_v54 = vld [vmem:[%s5641_s12 + $0xe0] sm:$0xff] }
 0xf06   :  { %v4257_v48 = vpop.eup %4256 }
 0xf07   :  { %2495 = vadd.xlane.f32.xlu1 %v4257_v48 }
 0xf18   :  { %2383 = vrot.lane.b32.xlu1 %v2381_v31, %s4323_s4 }
 0xf83   :  { %v2373_v56 = vpop.xlane.xlu1 %2372 }
 0xf84   :  { %v2374_v57 = vmul.f32 0.015625, %v2373_v56 }
 0xf86   :  { %v2375_v58 = vadd.f32 1e-05, %v2374_v57  ;;  %v2842_v57 = vrot.slane %v5474_v19, %v4558_v15  ;;  %v2869_v15 = vld [vmem:[%s5642_s13 + $0x8] sm:$0xff] }
 0xf88   :  { %4258 = vrsqrt.f32 %v2375_v58 }
 0xf92   :  { %v4259_v59 = vpop.eup %4258 }
 0xf93   :  { %v2377_v61 = vmul.f32 %v4259_v59, %v2365_v38  ;;  %v2546_v38 = vld [vmem:[%s5641_s12 + $0xc0] sm:$0xff] }
 0xf94   :  { %v2496_v60 = vpop.xlane.xlu1 %2495  ;;  %v4194_v44 = vpack.c.bf16 %v2547_v40, %v2546_v38 }
 0xf95   :  { %4260 = vrcp.f32 %v2496_v60 }
 0xf98   :  { %v2384_v50 = vpop.permute.xlu1 %2383 }
 0xf99   :  { %v2386_v62 = vmul.f32 %v2384_v50, %v2377_v61 }
 0xf9b   :  { %v2395_v63 = vadd.f32 %v2393_v39, %v2386_v62 }
 0xf9d   :  { %v3054_v0 = vmul.f32 -1.442695, %v2395_v63 }
 0xf9f   :  { %v4261_v42 = vpop.eup %4260  ;;  %4262 = vpow2.f32 %v3054_v0 }
 0xfa0   :  { %v2498_v7 = vmul.f32 %v4261_v42, %v4257_v48  ;;  %v2551_v48 = vld [vmem:[%s5641_s12 + $0xe8] sm:$0xff]  ;;  %v2870_v42 = vld [vmem:[%s5642_s13 + $0x10] sm:$0xff] }
 0xfa1   :  { %v4200_v31 = vpack.c.bf16 %v2551_v48, %v2550_v54  ;;  %v2974_v48 = vrot.slane %v5474_v19, %v4504_v34 }
 0xfa2   :  { %2512 = vperm.xlu1 %4232, %v2498_v7   ;;  %3001 = vst [vmem:[#allocation4] sm:$0xff] %v2498_v7  ;;  %2501 = vperm.xlu0 %4230, %v2498_v7  }
 0xfa6   :  { %4231 = vset.pattern.permute.xlu0 %v4326_v9  ;;  %v2875_v9 = vld [vmem:[%s5642_s13 + $0x38] sm:$0xff] }
 0xfa7   :  { %2506 = vperm.xlu0 %4231, %v2498_v7   ;;  %v2871_v7 = vld [vmem:[%s5642_s13 + $0x18] sm:$0xff]  ;;  %v4215_v10 = vpack.c.bf16 %v2875_v9, %v2874_v8 }
 0xfa8   :  { %v4209_v1 = vpack.c.bf16 %v2871_v7, %v2870_v42 }
 0xfa9   :  { %v4263_v16 = vpop.eup %4262 }
 0xfaa   :  { %v2399_v24 = vadd.f32 1.0, %v4263_v16 }
 0xfab   :  { %4233 = vset.pattern.permute.xlu0 %v4324_v23  ;;  %v2552_v23 = vld [vmem:[%s5641_s12 + $0xf0] sm:$0xff] }
 0xfac   :  { %4264 = vrcp.f32 %v2399_v24  ;;  %v2860_v24 = vrot.slane %v5474_v19, %v4655_v22 }
 0xfb6   :  { %v4265_v25 = vpop.eup %4264 }
 0xfb7   :  { %2518 = vrot.lane.b32.xlu0 %v4265_v25, %s4323_s4 }
0x1021   :  { %v2502_v49 = vpop.permute.xlu0 %2501  ;;  %v2513_v21 = vpop.permute.xlu1 %2512 }
0x1022   :  { %v2504_v32 = vmul.f32 %v2502_v49, %v5304_v33  ;;  %v2515_v17 = vmul.f32 %v2513_v21, %v5355_v6  ;;  %v2549_v33 = vld [vmem:[%s5641_s12 + $0xd8] sm:$0xff]  ;;  %v2865_v49 = vrot.slane %v5474_v19, %v4603_v53 }
0x1026   :  { %v2507_v30 = vpop.permute.xlu0 %2506 }
0x1027   :  { %v2509_v26 = vmul.f32 %v2507_v30, %v5273_v5  ;;  %v2548_v5 = vld [vmem:[%s5641_s12 + $0xd0] sm:$0xff] }
0x1028   :  { %v4197_v46 = vpack.c.bf16 %v2549_v33, %v2548_v5 }
0x1029   :  { %v2510_v37 = vadd.f32 %v2509_v26, %v2504_v32 }
0x102a   :  { %v2519_v43 = vpop.permute.xlu0 %2518 }
0x102b   :  { %v5521_v12 = vadd.f32 %v2515_v17, %v2510_v37 }
0x102d   :  { %v2521_v45 = vmul.f32 %v2519_v43, %v5521_v12 }
0x102f   :  { %3813 = vmatmul.mubr.msk.f32.vlgmr.msra.gmra.mrb[26].mxu1 %vm164_vm2, %v2521_v45 }
0x1030   :  { %4195 = vmatpush3.bf16.msra.mxu1 %v4194_v44  ;;  %3850 = vmatprep.mubr.msk.f32.mxu1 %vm4321_vm0, %v4322_v11  ;;  %v2553_v11 = vld [vmem:[%s5641_s12 + $0xf8] sm:$0xff] }
0x1031   :  { %4196 = vmatprep.subr.bf16.mxu1 %v4320_v3  ;;  %v4203_v51 = vpack.c.bf16 %v2553_v11, %v2552_v23 }
0x1034   :  { %4198 = vmatpush3.bf16.msra.mxu1 %v4197_v46 }
0x1035   :  { %4199 = vmatprep.subr.bf16.mxu1 %v4320_v3 }
0x1038   :  { %4201 = vmatpush3.bf16.msra.mxu1 %v4200_v31 }
0x1039   :  { %4202 = vmatprep.subr.bf16.mxu1 %v4320_v3 }
0x103c   :  { %4204 = vmatpush3.bf16.msra.mxu1 %v4203_v51 }
0x103f   :  { %3851 = vmatmul.mubr.msk.f32.vlgmr.msra.gmra.mrb[28].mxu1 %vm164_vm2, %v5355_v6 }
0x1102   :  { %v2693_v29 = vpop.f32.mrb[26].mxu1 }
0x1103   :  { %v2694_v52 = vadd.f32 %v2693_v29, %v5468_v41  ;;  %v3814_v55 = vpop.f32.mrb[27].mxu1 }
0x1105   :  { %v2767_v56 = vadd.f32 %v5390_v35, %v2694_v52  ;;  %v2868_v35 = vld [vmem:[%s5642_s13] sm:$0xff]  ;;  %s4327_s13 = smov [#allocation4]  }
0x1106   :  { %v4206_v41 = vpack.c.bf16 %v2869_v15, %v2868_v35  ;;  %s3018_s9 = sshll.u32 %s4327_s13, 4  ;;  %s3019_s9 = int_to_ptr.vmem [resolvable:$true] %s3018_s9 }
0x1107   :  { %s4272_s7 = scalar_lea.vmem %s3019_s9, 128  ;;  %p4277_p1 = scmp.lt.s32.totalorder %s3019_s9, %s3019_s9 }
0x1108   :  { %4207 = vmatpush3.bf16.msra.mxu0 %v4206_v41  ;;  %p4273_p0 = scmp.ne.s32.totalorder %s3019_s9, %s4272_s7  ;;  %p4278_p2 = scmp.lt.s32.totalorder %s4272_s7, %s4272_s7 }
0x1109   :  { %4208 = vmatprep.subr.bf16.mxu0 %v4320_v3 }
0x110a   :  { %p4279_p3 = por %p4278_p2, %p4277_p1 }
0x110c   :  { %4210 = vmatpush3.bf16.msra.mxu0 %v4209_v1  ;;  %p4280_p4 = pnand %p4279_p3, %p4273_p0 }
0x110d   :  { %4211 = vmatprep.subr.bf16.mxu0 %v4320_v3 }
0x1110   :  { %4213 = vmatpush3.bf16.msra.mxu0 %v4212_v4 }
0x1111   :  { %4214 = vmatprep.subr.bf16.mxu0 %v4320_v3  ;;  %v2879_v3 = vrot.slane %v5474_v19, %v4791_v14  ;;  %v2969_v14 = vrot.slane %v5474_v19, %v4513_v47 }
0x1112   :  { %v2834_v58 = vpop.f32.mrb[28].mxu1 }
0x1113   :  { %v2838_v59 = vadd.f32 %v2834_v58, %v2767_v56  ;;  %v3852_v60 = vpop.f32.mrb[29].mxu1 }
0x1114   :  { %4216 = vmatpush3.bf16.msra.mxu0 %v4215_v10 }
0x1115   :  { %v2843_v61 = vadd.f32 %v2842_v57, %v2838_v59 }
0x1117   :  { %v2844_v50 = vsel %vm164_vm2, %v2843_v61, 0.0 }
0x1118   :  { %2845 = vadd.xlane.f32.xlu1 %v2844_v50 }
0x11a5   :  { %v2846_v39 = vpop.xlane.xlu1 %2845 }
0x11a6   :  { %v2847_v62 = vmul.f32 0.015625, %v2846_v39 }
0x11a8   :  { %v2848_v63 = vsub.f32 %v2843_v61, %v2847_v62 }
0x11aa   :  { %v2849_v6 = vmul.f32 %v2848_v63, %v2848_v63 }
0x11ac   :  { %v2850_v0 = vsel %vm164_vm2, %v2849_v6, 0.0 }
0x11ad   :  { %2851 = vadd.xlane.f32.xlu0 %v2850_v0 }
0x123a   :  { %v2852_v16 = vpop.xlane.xlu0 %2851 }
0x123b   :  { %v2853_v18 = vmul.f32 0.015625, %v2852_v16 }
0x123d   :  { %v2854_v20 = vadd.f32 1e-05, %v2853_v18 }
0x123f   :  { %4266 = vrsqrt.f32 %v2854_v20 }
0x1249   :  { %v4267_v27 = vpop.eup %4266 }
0x124a   :  { %v2856_v25 = vmul.f32 %v4267_v27, %v2848_v63 }
0x124c   :  { %v2861_v21 = vmul.f32 %v2860_v24, %v2856_v25 }
0x124e   :  { %v2866_v30 = vadd.f32 %v2865_v49, %v2861_v21 }
0x1250   :  { %v2867_v32 = vmax.f32 %v2866_v30, 0.0 }
0x1252   :  { %3870 = vmatmul.mubr.msk.f32.vlgmr.msra.gmra.mrb[24].mxu0 %vm164_vm2, %v2867_v32 }
0x1325   :  { %v2949_v26 = vpop.f32.mrb[24].mxu0 }
0x1326   :  { %v2950_v17 = vadd.f32 %v2949_v26, %v2879_v3  ;;  %v3871_v37 = vpop.f32.mrb[25].mxu0 }
0x1328   :  { %v2953_v38 = vsel %vm164_vm2, %v2950_v17, 0.0 }
0x1329   :  { %2954 = vadd.xlane.f32.xlu0 %v2953_v38 }
0x13b6   :  { %v2955_v22 = vpop.xlane.xlu0 %2954 }
0x13b7   :  { %v2956_v40 = vmul.f32 0.015625, %v2955_v22 }
0x13b9   :  { %v2957_v43 = vsub.f32 %v2950_v17, %v2956_v40 }
0x13bb   :  { %v2958_v44 = vmul.f32 %v2957_v43, %v2957_v43 }
0x13bd   :  { %v2959_v53 = vsel %vm164_vm2, %v2958_v44, 0.0 }
0x13be   :  { %2960 = vadd.xlane.f32.xlu1 %v2959_v53 }
0x144b   :  { %v2961_v45 = vpop.xlane.xlu1 %2960 }
0x144c   :  { %v2962_v5 = vmul.f32 0.015625, %v2961_v45 }
0x144e   :  { %v2963_v33 = vadd.f32 1e-05, %v2962_v5 }
0x1450   :  { %4268 = vrsqrt.f32 %v2963_v33 }
0x145a   :  { %v4269_v46 = vpop.eup %4268 }
0x145b   :  { %v2965_v54 = vmul.f32 %v4269_v46, %v2957_v43 }
0x145d   :  { %v2970_v31 = vmul.f32 %v2969_v14, %v2965_v54 }
0x145f   :  { %v2975_v23 = vadd.f32 %v2974_v48, %v2970_v31 }
0x1461   :  { %v2976_v11 = vadd.f32 %v2975_v23, %v5521_v12 }
0x1463   :  { %v2977_v51 = vsel %vm164_vm2, %v2976_v11, 0.0 }
0x1464   :  { %2978 = vadd.xlane.f32.xlu0 %v2977_v51 }
0x14f1   :  { %v2979_v29 = vpop.xlane.xlu0 %2978 }
0x14f2   :  { %v2980_v52 = vmul.f32 0.015625, %v2979_v29 }
0x14f4   :  { %v2981_v55 = vsub.f32 %v2976_v11, %v2980_v52 }
0x14f6   :  { %v2982_v56 = vmul.f32 %v2981_v55, %v2981_v55 }
0x14f8   :  { %v2983_v57 = vsel %vm164_vm2, %v2982_v56, 0.0 }
0x14f9   :  { %2984 = vadd.xlane.f32.xlu1 %v2983_v57 }
0x14fa   :  { %4283 = shalt.err (!%p4280_p4)
}
0x14fb   :  { %s4284_s23 = scalar_lea.hbm %s5645_s16, 128 }
0x14fc   :  { %p4285_p5 = scmp.ne.s32.totalorder %s5645_s16, %s4284_s23  ;;  %p4288_p6 = scmp.lt.u32.totalorder %s4284_s23, %s5645_s16 }
0x14fe   :  { %p4290_p7 = pnand %p4288_p6, %p4285_p5 }
0x1500   :  { %4293 = shalt.err (!%p4290_p7)
}
0x1501   :  { %3021 = dma.vmem_to_hbm [thread:$0]  %s3019_s9, 128, %s5645_s16, [#allocation5]   ;;  %v60_v12 = vld [vmem:[%s5643_s14 + $0x30] sm:$0x3] }
0x1502   :  { %v2993_v58 = vrot.slane %v60_v12, %v4491_v28  ;;  %v2998_v61 = vrot.slane %v60_v12, %v4555_v13  ;;  %s4328_s29 = smov [#allocation2]  }
0x1503   :  { %s3008_s30 = sshll.u32 %s4328_s29, 4  ;;  %s3009_s30 = int_to_ptr.vmem [resolvable:$true] %s3008_s30 }
0x1504   :  { %s4294_s16 = scalar_lea.vmem %s3009_s30, 128  ;;  %p4299_p9 = scmp.lt.s32.totalorder %s3009_s30, %s3009_s30 }
0x1505   :  { %p4295_p8 = scmp.ne.s32.totalorder %s3009_s30, %s4294_s16  ;;  %p4300_p10 = scmp.lt.s32.totalorder %s4294_s16, %s4294_s16 }
0x1507   :  { %p4301_p11 = por %p4300_p10, %p4299_p9 }
0x1509   :  { %p4302_p12 = pnand %p4301_p11, %p4295_p8 }
0x1586   :  { %v2985_v34 = vpop.xlane.xlu1 %2984 }
0x1587   :  { %v2986_v47 = vmul.f32 0.015625, %v2985_v34 }
0x1589   :  { %v2987_v19 = vadd.f32 1e-05, %v2986_v47 }
0x158b   :  { %4270 = vrsqrt.f32 %v2987_v19 }
0x1595   :  { %v4271_v59 = vpop.eup %4270 }
0x1596   :  { %v2989_v60 = vmul.f32 %v4271_v59, %v2981_v55 }
0x1598   :  { %v2994_v50 = vmul.f32 %v2993_v58, %v2989_v60 }
0x159a   :  { %v2999_v39 = vadd.f32 %v2998_v61, %v2994_v50 }
0x159c   :  { %3000 = vst.msk [vmem:[#allocation2] sm:$0xff] %vm164_vm2, %v2999_v39 }
0x159d   :  { %4305 = shalt.err (!%p4302_p12)
}
0x159e   :  { %s4306_s17 = scalar_lea.hbm %s5644_s15, 128 }
0x159f   :  { %p4307_p13 = scmp.ne.s32.totalorder %s5644_s15, %s4306_s17  ;;  %p4310_p0 = scmp.lt.u32.totalorder %s4306_s17, %s5644_s15 }
0x15a1   :  { %p4312_p1 = pnand %p4310_p0, %p4307_p13 }
0x15a3   :  { %4315 = shalt.err (!%p4312_p1)
}
0x15a4   :  { %3011 = dma.vmem_to_hbm [thread:$0]  %s3009_s30, 128, %s5644_s15, [#allocation3]  }
0x15a5   :  { %4316 = dma.done.wait [#allocation3], 128  }
0x15a6   :  { %4317 = vsyncadd [#allocation3], 4294967168 }
0x15a7   :  { %4318 = dma.done.wait [#allocation5], 128  }
0x15a8   :  { %4319 = vsyncadd [#allocation5], 4294967168 }
0x15a9   :  { %3028 = vsyncpa [#allocation3], 1 }
0x15aa   :  { %3029 = vsyncpa [#allocation5], 1 }

</bundles_post_ra>
